<compile_context>
chip_gen: v5e
topology: v5e:2x2
jax: 0.10.0
libtpu: 0.0.40
codegen_flags: <defaults>
</compile_context>

<pallas_src>
import functools

import jax
import jax.numpy as jnp
from jax.experimental import pallas as pl
from jax.experimental.pallas import tpu as pltpu


# ----------------------------------------------------------------------------
# Fused kernel: embedding output -> bi-LSTM layer 0 -> bi-LSTM layer 1 -> Linear
# ----------------------------------------------------------------------------
def _fused_bilstm_kernel(
    x_ref,                                   # (S*B, E)
    wih_f0_ref, whh_f0_ref, b_f0_ref,        # layer 0, forward
    wih_b0_ref, whh_b0_ref, b_b0_ref,        # layer 0, backward
    wih_f1_ref, whh_f1_ref, b_f1_ref,        # layer 1, forward
    wih_b1_ref, whh_b1_ref, b_b1_ref,        # layer 1, backward
    wlin_ref, blin_ref,                      # final linear (2H, 5), (1, 5)
    out_ref,                                 # (S*B, 5) logits
    hf_scr, hb_scr,                          # VMEM scratch, (S*B, H) each
    *, seq_len, batch):
    S, B = seq_len, batch
    H = whh_f0_ref.shape[0]
    f32 = jnp.float32

    def cell(gates, c_prev):
        # torch gate order: i, f, g, o
        i = jax.nn.sigmoid(gates[:, 0 * H:1 * H])
        f = jax.nn.sigmoid(gates[:, 1 * H:2 * H])
        g = jnp.tanh(gates[:, 2 * H:3 * H])
        o = jax.nn.sigmoid(gates[:, 3 * H:4 * H])
        c = f * c_prev + i * g
        h = o * jnp.tanh(c)
        return h, c

    def run_bidir_layer(pf, pb, whh_f, whh_b):
        """pf/pb: (S*B, 4H) hoisted input projections (bias included), t order."""
        zero = jnp.zeros((B, H), f32)
        h_f, c_f, h_b, c_b = zero, zero, zero, zero
        for s in range(S):                   # fully unrolled: all slices static
            r = S - 1 - s                    # backward direction position
            g_f = pf[s * B:(s + 1) * B, :] + jnp.dot(
                h_f, whh_f, preferred_element_type=f32)
            g_b = pb[r * B:(r + 1) * B, :] + jnp.dot(
                h_b, whh_b, preferred_element_type=f32)
            h_f, c_f = cell(g_f, c_f)
            h_b, c_b = cell(g_b, c_b)
            hf_scr[s * B:(s + 1) * B, :] = h_f   # output position s
            hb_scr[r * B:(r + 1) * B, :] = h_b   # output position S-1-s
        return hf_scr[...], hb_scr[...]          # (S*B, H) each, natural t order

    x = x_ref[...]                           # (S*B, E)

    # ---- layer 0: hoisted input projections, then the recurrence ----
    pf0 = jnp.dot(x, wih_f0_ref[...], preferred_element_type=f32) + b_f0_ref[...]
    pb0 = jnp.dot(x, wih_b0_ref[...], preferred_element_type=f32) + b_b0_ref[...]
    hf0, hb0 = run_bidir_layer(pf0, pb0, whh_f0_ref[...], whh_b0_ref[...])

    # ---- layer 1: input is concat(h_fwd, h_bwd); split weights avoid the concat ----
    pf1 = (jnp.dot(hf0, wih_f1_ref[0:H, :], preferred_element_type=f32)
           + jnp.dot(hb0, wih_f1_ref[H:2 * H, :], preferred_element_type=f32)
           + b_f1_ref[...])
    pb1 = (jnp.dot(hf0, wih_b1_ref[0:H, :], preferred_element_type=f32)
           + jnp.dot(hb0, wih_b1_ref[H:2 * H, :], preferred_element_type=f32)
           + b_b1_ref[...])
    hf1, hb1 = run_bidir_layer(pf1, pb1, whh_f1_ref[...], whh_b1_ref[...])

    # ---- final linear, again with split weight to avoid the concat ----
    out_ref[...] = (jnp.dot(hf1, wlin_ref[0:H, :], preferred_element_type=f32)
                    + jnp.dot(hb1, wlin_ref[H:2 * H, :], preferred_element_type=f32)
                    + blin_ref[...])


def fused_forward(x_flat, params, seq_len, batch):
    """x_flat: (S*B, E) f32 -> logits (S*B, 5) f32."""
    l0, l1 = params["l0"], params["l1"]
    H = l0["whh_f"].shape[0]
    operands = (
        x_flat,
        l0["wih_f"], l0["whh_f"], l0["b_f"],
        l0["wih_b"], l0["whh_b"], l0["b_b"],
        l1["wih_f"], l1["whh_f"], l1["b_f"],
        l1["wih_b"], l1["whh_b"], l1["b_b"],
        params["w_lin"], params["b_lin"],
    )
    kernel = functools.partial(_fused_bilstm_kernel, seq_len=seq_len, batch=batch)
    return pl.pallas_call(
        kernel,
        out_shape=jax.ShapeDtypeStruct((seq_len * batch, 5), jnp.float32),
        grid=(1,),
        in_specs=[pl.BlockSpec(op.shape, lambda i: (0, 0)) for op in operands],
        out_specs=pl.BlockSpec((seq_len * batch, 5), lambda i: (0, 0)),
        scratch_shapes=[
            pltpu.VMEM((seq_len * batch, H), jnp.float32),   # fwd hidden seq
            pltpu.VMEM((seq_len * batch, H), jnp.float32),   # bwd hidden seq
        ],
        compiler_params=pltpu.CompilerParams(
            dimension_semantics=("arbitrary",)),
    )(*operands)


# ----------------------------------------------------------------------------
# Full model forward
# ----------------------------------------------------------------------------
def my_model0_forward(inpt, params, training=True):
    # inpt: (S, B) int32 token ids
    S, B = inpt.shape
    embedded = jnp.take(params["embed"], inpt, axis=0)       # (S, B, E) gather glue
    x_flat = embedded.reshape(S * B, embedded.shape[-1])     # row-major: free
    logits = fused_forward(x_flat, params, S, B).reshape(S, B, 5)
    if training:
        return logits
    # softmax(dim=2) is monotone -> argmax(softmax(x)) == argmax(x); skip softmax.
    # NOTE: torch.argmax returns int64; JAX gives int32 here (identical values).
    return jnp.argmax(logits, axis=2)


# ----------------------------------------------------------------------------
# Deterministic parameter construction (synthetic init, not a checkpoint load)
# ----------------------------------------------------------------------------
def make_params(key, vocab_size, embed_size, hidden_size):
    H = hidden_size
    k = 1.0 / jnp.sqrt(jnp.float32(H))
    keys = jax.random.split(key, 32)
    ki = iter(range(32))

    def unif(shape):
        return jax.random.uniform(keys[next(ki)], shape, jnp.float32, -k, k)

    params = {
        "embed": jax.random.normal(keys[next(ki)], (vocab_size, embed_size),
                                   jnp.float32),
        "w_lin": unif((2 * H, 5)),
        "b_lin": unif((1, 5)),
    }
    for layer in range(2):
        in_sz = embed_size if layer == 0 else 2 * H
        params[f"l{layer}"] = {
            "wih_f": unif((in_sz, 4 * H)),
            "whh_f": unif((H, 4 * H)),
            "b_f": unif((1, 4 * H)) + unif((1, 4 * H)),   # b_ih + b_hh
            "wih_b": unif((in_sz, 4 * H)),
            "whh_b": unif((H, 4 * H)),
            "b_b": unif((1, 4 * H)) + unif((1, 4 * H)),
        }
    return params


if __name__ == "__main__":
    VOCAB, EMBED, HIDDEN = 16, 32, 32
    SEQ, BATCH = 8, 2

    root = jax.random.PRNGKey(0)
    k_params, k_inpt = jax.random.split(root)
    params = make_params(k_params, VOCAB, EMBED, HIDDEN)
    inpt = jax.random.randint(k_inpt, (SEQ, BATCH), 0, VOCAB, dtype=jnp.int32)

    fwd_train = jax.jit(functools.partial(my_model0_forward, training=True))
    fwd_eval = jax.jit(functools.partial(my_model0_forward, training=False))

    out_train = jax.block_until_ready(fwd_train(inpt, params))   # (8, 2, 5) f32
    out_eval = jax.block_until_ready(fwd_eval(inpt, params))     # (8, 2) int32

    assert out_train.shape == (SEQ, BATCH, 5)
    assert out_eval.shape == (SEQ, BATCH)
    assert jnp.all(jnp.isfinite(out_train))
    print("KERNEL_OK")
</pallas_src>

<mosaic_0001>
module attributes {stable_mosaic.version = 11 : i64} {
  func.func @_fused_bilstm_kernel(%arg0: i32, %arg1: memref<16x32xf32, #tpu.memory_space<vmem>>, %arg2: memref<32x128xf32, #tpu.memory_space<vmem>>, %arg3: memref<32x128xf32, #tpu.memory_space<vmem>>, %arg4: memref<1x128xf32, #tpu.memory_space<vmem>>, %arg5: memref<32x128xf32, #tpu.memory_space<vmem>>, %arg6: memref<32x128xf32, #tpu.memory_space<vmem>>, %arg7: memref<1x128xf32, #tpu.memory_space<vmem>>, %arg8: memref<64x128xf32, #tpu.memory_space<vmem>>, %arg9: memref<32x128xf32, #tpu.memory_space<vmem>>, %arg10: memref<1x128xf32, #tpu.memory_space<vmem>>, %arg11: memref<64x128xf32, #tpu.memory_space<vmem>>, %arg12: memref<32x128xf32, #tpu.memory_space<vmem>>, %arg13: memref<1x128xf32, #tpu.memory_space<vmem>>, %arg14: memref<64x5xf32, #tpu.memory_space<vmem>>, %arg15: memref<1x5xf32, #tpu.memory_space<vmem>>, %arg16: memref<16x5xf32, #tpu.memory_space<vmem>>, %arg17: memref<16x32xf32, #tpu.memory_space<vmem>>, %arg18: memref<16x32xf32, #tpu.memory_space<vmem>>) attributes {dimension_semantics = [#tpu.dimension_semantics<arbitrary>], iteration_bounds = array<i64: 1>, scalar_prefetch = 0 : i64, scratch_operands = 2 : i64, tpu.core_type = #tpu.core_type<tc>, window_params = [{pipeline_mode = #tpu.pipeline_mode<synchronous>, transform_indices = @transform_0, window_bounds = array<i64: 16, 32>}, {pipeline_mode = #tpu.pipeline_mode<synchronous>, transform_indices = @transform_1, window_bounds = array<i64: 32, 128>}, {pipeline_mode = #tpu.pipeline_mode<synchronous>, transform_indices = @transform_2, window_bounds = array<i64: 32, 128>}, {pipeline_mode = #tpu.pipeline_mode<synchronous>, transform_indices = @transform_3, window_bounds = array<i64: 1, 128>}, {pipeline_mode = #tpu.pipeline_mode<synchronous>, transform_indices = @transform_4, window_bounds = array<i64: 32, 128>}, {pipeline_mode = #tpu.pipeline_mode<synchronous>, transform_indices = @transform_5, window_bounds = array<i64: 32, 128>}, {pipeline_mode = #tpu.pipeline_mode<synchronous>, transform_indices = @transform_6, window_bounds = array<i64: 1, 128>}, {pipeline_mode = #tpu.pipeline_mode<synchronous>, transform_indices = @transform_7, window_bounds = array<i64: 64, 128>}, {pipeline_mode = #tpu.pipeline_mode<synchronous>, transform_indices = @transform_8, window_bounds = array<i64: 32, 128>}, {pipeline_mode = #tpu.pipeline_mode<synchronous>, transform_indices = @transform_9, window_bounds = array<i64: 1, 128>}, {pipeline_mode = #tpu.pipeline_mode<synchronous>, transform_indices = @transform_10, window_bounds = array<i64: 64, 128>}, {pipeline_mode = #tpu.pipeline_mode<synchronous>, transform_indices = @transform_11, window_bounds = array<i64: 32, 128>}, {pipeline_mode = #tpu.pipeline_mode<synchronous>, transform_indices = @transform_12, window_bounds = array<i64: 1, 128>}, {pipeline_mode = #tpu.pipeline_mode<synchronous>, transform_indices = @transform_13, window_bounds = array<i64: 64, 5>}, {pipeline_mode = #tpu.pipeline_mode<synchronous>, transform_indices = @transform_14, window_bounds = array<i64: 1, 5>}, {pipeline_mode = #tpu.pipeline_mode<synchronous>, transform_indices = @transform_15, window_bounds = array<i64: 16, 5>}]} {
    %c0 = arith.constant 0 : index
    %c0_0 = arith.constant 0 : index
    %0 = vector.load %arg1[%c0, %c0_0] : memref<16x32xf32, #tpu.memory_space<vmem>>, vector<16x32xf32>
    %c0_1 = arith.constant 0 : index
    %c0_2 = arith.constant 0 : index
    %1 = vector.load %arg2[%c0_1, %c0_2] : memref<32x128xf32, #tpu.memory_space<vmem>>, vector<32x128xf32>
    %cst = arith.constant dense<0.000000e+00> : vector<16x128xf32>
    %2 = tpu.matmul %0, %1, %cst {dimension_numbers = #tpu.dot_dimension_numbers<[1], [0], [0], [1], [0, 0, 1, 1], [], []>} : vector<16x32xf32>, vector<32x128xf32>, vector<16x128xf32> -> vector<16x128xf32>
    %c0_3 = arith.constant 0 : index
    %c0_4 = arith.constant 0 : index
    %3 = vector.load %arg4[%c0_3, %c0_4] : memref<1x128xf32, #tpu.memory_space<vmem>>, vector<1x128xf32>
    %4 = vector.broadcast %3 : vector<1x128xf32> to vector<16x128xf32>
    %5 = arith.addf %2, %4 : vector<16x128xf32>
    %c0_5 = arith.constant 0 : index
    %c0_6 = arith.constant 0 : index
    %6 = vector.load %arg5[%c0_5, %c0_6] : memref<32x128xf32, #tpu.memory_space<vmem>>, vector<32x128xf32>
    %cst_7 = arith.constant dense<0.000000e+00> : vector<16x128xf32>
    %7 = tpu.matmul %0, %6, %cst_7 {dimension_numbers = #tpu.dot_dimension_numbers<[1], [0], [0], [1], [0, 0, 1, 1], [], []>} : vector<16x32xf32>, vector<32x128xf32>, vector<16x128xf32> -> vector<16x128xf32>
    %c0_8 = arith.constant 0 : index
    %c0_9 = arith.constant 0 : index
    %8 = vector.load %arg7[%c0_8, %c0_9] : memref<1x128xf32, #tpu.memory_space<vmem>>, vector<1x128xf32>
    %9 = vector.broadcast %8 : vector<1x128xf32> to vector<16x128xf32>
    %10 = arith.addf %7, %9 : vector<16x128xf32>
    %c0_10 = arith.constant 0 : index
    %c0_11 = arith.constant 0 : index
    %11 = vector.load %arg3[%c0_10, %c0_11] : memref<32x128xf32, #tpu.memory_space<vmem>>, vector<32x128xf32>
    %c0_12 = arith.constant 0 : index
    %c0_13 = arith.constant 0 : index
    %12 = vector.load %arg6[%c0_12, %c0_13] : memref<32x128xf32, #tpu.memory_space<vmem>>, vector<32x128xf32>
    %cst_14 = arith.constant 0.000000e+00 : f32
    %13 = vector.broadcast %cst_14 : f32 to vector<2x32xf32>
    %14 = vector.extract_strided_slice %5 {offsets = [0, 0], sizes = [2, 128], strides = [1, 1]} : vector<16x128xf32> to vector<2x128xf32>
    %cst_15 = arith.constant dense<0.000000e+00> : vector<2x128xf32>
    %15 = tpu.matmul %13, %11, %cst_15 {dimension_numbers = #tpu.dot_dimension_numbers<[1], [0], [0], [1], [0, 0, 1, 1], [], []>} : vector<2x32xf32>, vector<32x128xf32>, vector<2x128xf32> -> vector<2x128xf32>
    %16 = arith.addf %14, %15 : vector<2x128xf32>
    %17 = vector.extract_strided_slice %10 {offsets = [14, 0], sizes = [2, 128], strides = [1, 1]} : vector<16x128xf32> to vector<2x128xf32>
    %cst_16 = arith.constant dense<0.000000e+00> : vector<2x128xf32>
    %18 = tpu.matmul %13, %12, %cst_16 {dimension_numbers = #tpu.dot_dimension_numbers<[1], [0], [0], [1], [0, 0, 1, 1], [], []>} : vector<2x32xf32>, vector<32x128xf32>, vector<2x128xf32> -> vector<2x128xf32>
    %19 = arith.addf %17, %18 : vector<2x128xf32>
    %20 = vector.extract_strided_slice %16 {offsets = [0, 0], sizes = [2, 32], strides = [1, 1]} : vector<2x128xf32> to vector<2x32xf32>
    %21 = arith.negf %20 : vector<2x32xf32>
    %22 = math.exp %21 : vector<2x32xf32>
    %cst_17 = arith.constant 1.000000e+00 : f32
    %23 = vector.broadcast %cst_17 : f32 to vector<2x32xf32>
    %24 = arith.addf %23, %22 : vector<2x32xf32>
    %25 = arith.divf %23, %24 : vector<2x32xf32>
    %26 = vector.extract_strided_slice %16 {offsets = [0, 32], sizes = [2, 32], strides = [1, 1]} : vector<2x128xf32> to vector<2x32xf32>
    %27 = arith.negf %26 : vector<2x32xf32>
    %28 = math.exp %27 : vector<2x32xf32>
    %cst_18 = arith.constant 1.000000e+00 : f32
    %29 = vector.broadcast %cst_18 : f32 to vector<2x32xf32>
    %30 = arith.addf %29, %28 : vector<2x32xf32>
    %31 = arith.divf %29, %30 : vector<2x32xf32>
    %32 = vector.extract_strided_slice %16 {offsets = [0, 64], sizes = [2, 32], strides = [1, 1]} : vector<2x128xf32> to vector<2x32xf32>
    %33 = math.tanh %32 : vector<2x32xf32>
    %34 = vector.extract_strided_slice %16 {offsets = [0, 96], sizes = [2, 32], strides = [1, 1]} : vector<2x128xf32> to vector<2x32xf32>
    %35 = arith.negf %34 : vector<2x32xf32>
    %36 = math.exp %35 : vector<2x32xf32>
    %cst_19 = arith.constant 1.000000e+00 : f32
    %37 = vector.broadcast %cst_19 : f32 to vector<2x32xf32>
    %38 = arith.addf %37, %36 : vector<2x32xf32>
    %39 = arith.divf %37, %38 : vector<2x32xf32>
    %40 = arith.mulf %31, %13 : vector<2x32xf32>
    %41 = arith.mulf %25, %33 : vector<2x32xf32>
    %42 = arith.addf %40, %41 : vector<2x32xf32>
    %43 = math.tanh %42 : vector<2x32xf32>
    %44 = arith.mulf %39, %43 : vector<2x32xf32>
    %45 = vector.extract_strided_slice %19 {offsets = [0, 0], sizes = [2, 32], strides = [1, 1]} : vector<2x128xf32> to vector<2x32xf32>
    %46 = arith.negf %45 : vector<2x32xf32>
    %47 = math.exp %46 : vector<2x32xf32>
    %cst_20 = arith.constant 1.000000e+00 : f32
    %48 = vector.broadcast %cst_20 : f32 to vector<2x32xf32>
    %49 = arith.addf %48, %47 : vector<2x32xf32>
    %50 = arith.divf %48, %49 : vector<2x32xf32>
    %51 = vector.extract_strided_slice %19 {offsets = [0, 32], sizes = [2, 32], strides = [1, 1]} : vector<2x128xf32> to vector<2x32xf32>
    %52 = arith.negf %51 : vector<2x32xf32>
    %53 = math.exp %52 : vector<2x32xf32>
    %cst_21 = arith.constant 1.000000e+00 : f32
    %54 = vector.broadcast %cst_21 : f32 to vector<2x32xf32>
    %55 = arith.addf %54, %53 : vector<2x32xf32>
    %56 = arith.divf %54, %55 : vector<2x32xf32>
    %57 = vector.extract_strided_slice %19 {offsets = [0, 64], sizes = [2, 32], strides = [1, 1]} : vector<2x128xf32> to vector<2x32xf32>
    %58 = math.tanh %57 : vector<2x32xf32>
    %59 = vector.extract_strided_slice %19 {offsets = [0, 96], sizes = [2, 32], strides = [1, 1]} : vector<2x128xf32> to vector<2x32xf32>
    %60 = arith.negf %59 : vector<2x32xf32>
    %61 = math.exp %60 : vector<2x32xf32>
    %cst_22 = arith.constant 1.000000e+00 : f32
    %62 = vector.broadcast %cst_22 : f32 to vector<2x32xf32>
    %63 = arith.addf %62, %61 : vector<2x32xf32>
    %64 = arith.divf %62, %63 : vector<2x32xf32>
    %65 = arith.mulf %56, %13 : vector<2x32xf32>
    %66 = arith.mulf %50, %58 : vector<2x32xf32>
    %67 = arith.addf %65, %66 : vector<2x32xf32>
    %68 = math.tanh %67 : vector<2x32xf32>
    %69 = arith.mulf %64, %68 : vector<2x32xf32>
    %c0_23 = arith.constant 0 : index
    %c0_24 = arith.constant 0 : index
    %70 = vector.load %arg17[%c0_23, %c0_24] : memref<16x32xf32, #tpu.memory_space<vmem>>, vector<2x32xf32>
    tpu.vector_store %arg17[%c0_23, %c0_24], %44 {strides = array<i32>} : memref<16x32xf32, #tpu.memory_space<vmem>>, vector<2x32xf32>,
    %c14 = arith.constant 14 : index
    %c0_25 = arith.constant 0 : index
    %71 = vector.load %arg18[%c14, %c0_25] : memref<16x32xf32, #tpu.memory_space<vmem>>, vector<2x32xf32>
    tpu.vector_store %arg18[%c14, %c0_25], %69 {strides = array<i32>} : memref<16x32xf32, #tpu.memory_space<vmem>>, vector<2x32xf32>,
    %72 = vector.extract_strided_slice %5 {offsets = [2, 0], sizes = [2, 128], strides = [1, 1]} : vector<16x128xf32> to vector<2x128xf32>
    %cst_26 = arith.constant dense<0.000000e+00> : vector<2x128xf32>
    %73 = tpu.matmul %44, %11, %cst_26 {dimension_numbers = #tpu.dot_dimension_numbers<[1], [0], [0], [1], [0, 0, 1, 1], [], []>} : vector<2x32xf32>, vector<32x128xf32>, vector<2x128xf32> -> vector<2x128xf32>
    %74 = arith.addf %72, %73 : vector<2x128xf32>
    %75 = vector.extract_strided_slice %10 {offsets = [12, 0], sizes = [2, 128], strides = [1, 1]} : vector<16x128xf32> to vector<2x128xf32>
    %cst_27 = arith.constant dense<0.000000e+00> : vector<2x128xf32>
    %76 = tpu.matmul %69, %12, %cst_27 {dimension_numbers = #tpu.dot_dimension_numbers<[1], [0], [0], [1], [0, 0, 1, 1], [], []>} : vector<2x32xf32>, vector<32x128xf32>, vector<2x128xf32> -> vector<2x128xf32>
    %77 = arith.addf %75, %76 : vector<2x128xf32>
    %78 = vector.extract_strided_slice %74 {offsets = [0, 0], sizes = [2, 32], strides = [1, 1]} : vector<2x128xf32> to vector<2x32xf32>
    %79 = arith.negf %78 : vector<2x32xf32>
    %80 = math.exp %79 : vector<2x32xf32>
    %cst_28 = arith.constant 1.000000e+00 : f32
    %81 = vector.broadcast %cst_28 : f32 to vector<2x32xf32>
    %82 = arith.addf %81, %80 : vector<2x32xf32>
    %83 = arith.divf %81, %82 : vector<2x32xf32>
    %84 = vector.extract_strided_slice %74 {offsets = [0, 32], sizes = [2, 32], strides = [1, 1]} : vector<2x128xf32> to vector<2x32xf32>
    %85 = arith.negf %84 : vector<2x32xf32>
    %86 = math.exp %85 : vector<2x32xf32>
    %cst_29 = arith.constant 1.000000e+00 : f32
    %87 = vector.broadcast %cst_29 : f32 to vector<2x32xf32>
    %88 = arith.addf %87, %86 : vector<2x32xf32>
    %89 = arith.divf %87, %88 : vector<2x32xf32>
    %90 = vector.extract_strided_slice %74 {offsets = [0, 64], sizes = [2, 32], strides = [1, 1]} : vector<2x128xf32> to vector<2x32xf32>
    %91 = math.tanh %90 : vector<2x32xf32>
    %92 = vector.extract_strided_slice %74 {offsets = [0, 96], sizes = [2, 32], strides = [1, 1]} : vector<2x128xf32> to vector<2x32xf32>
    %93 = arith.negf %92 : vector<2x32xf32>
    %94 = math.exp %93 : vector<2x32xf32>
    %cst_30 = arith.constant 1.000000e+00 : f32
    %95 = vector.broadcast %cst_30 : f32 to vector<2x32xf32>
    %96 = arith.addf %95, %94 : vector<2x32xf32>
    %97 = arith.divf %95, %96 : vector<2x32xf32>
    %98 = arith.mulf %89, %42 : vector<2x32xf32>
    %99 = arith.mulf %83, %91 : vector<2x32xf32>
    %100 = arith.addf %98, %99 : vector<2x32xf32>
    %101 = math.tanh %100 : vector<2x32xf32>
    %102 = arith.mulf %97, %101 : vector<2x32xf32>
    %103 = vector.extract_strided_slice %77 {offsets = [0, 0], sizes = [2, 32], strides = [1, 1]} : vector<2x128xf32> to vector<2x32xf32>
    %104 = arith.negf %103 : vector<2x32xf32>
    %105 = math.exp %104 : vector<2x32xf32>
    %cst_31 = arith.constant 1.000000e+00 : f32
    %106 = vector.broadcast %cst_31 : f32 to vector<2x32xf32>
    %107 = arith.addf %106, %105 : vector<2x32xf32>
    %108 = arith.divf %106, %107 : vector<2x32xf32>
    %109 = vector.extract_strided_slice %77 {offsets = [0, 32], sizes = [2, 32], strides = [1, 1]} : vector<2x128xf32> to vector<2x32xf32>
    %110 = arith.negf %109 : vector<2x32xf32>
    %111 = math.exp %110 : vector<2x32xf32>
    %cst_32 = arith.constant 1.000000e+00 : f32
    %112 = vector.broadcast %cst_32 : f32 to vector<2x32xf32>
    %113 = arith.addf %112, %111 : vector<2x32xf32>
    %114 = arith.divf %112, %113 : vector<2x32xf32>
    %115 = vector.extract_strided_slice %77 {offsets = [0, 64], sizes = [2, 32], strides = [1, 1]} : vector<2x128xf32> to vector<2x32xf32>
    %116 = math.tanh %115 : vector<2x32xf32>
    %117 = vector.extract_strided_slice %77 {offsets = [0, 96], sizes = [2, 32], strides = [1, 1]} : vector<2x128xf32> to vector<2x32xf32>
    %118 = arith.negf %117 : vector<2x32xf32>
    %119 = math.exp %118 : vector<2x32xf32>
    %cst_33 = arith.constant 1.000000e+00 : f32
    %120 = vector.broadcast %cst_33 : f32 to vector<2x32xf32>
    %121 = arith.addf %120, %119 : vector<2x32xf32>
    %122 = arith.divf %120, %121 : vector<2x32xf32>
    %123 = arith.mulf %114, %67 : vector<2x32xf32>
    %124 = arith.mulf %108, %116 : vector<2x32xf32>
    %125 = arith.addf %123, %124 : vector<2x32xf32>
    %126 = math.tanh %125 : vector<2x32xf32>
    %127 = arith.mulf %122, %126 : vector<2x32xf32>
    %c2 = arith.constant 2 : index
    %c0_34 = arith.constant 0 : index
    %128 = vector.load %arg17[%c2, %c0_34] : memref<16x32xf32, #tpu.memory_space<vmem>>, vector<2x32xf32>
    tpu.vector_store %arg17[%c2, %c0_34], %102 {strides = array<i32>} : memref<16x32xf32, #tpu.memory_space<vmem>>, vector<2x32xf32>,
    %c12 = arith.constant 12 : index
    %c0_35 = arith.constant 0 : index
    %129 = vector.load %arg18[%c12, %c0_35] : memref<16x32xf32, #tpu.memory_space<vmem>>, vector<2x32xf32>
    tpu.vector_store %arg18[%c12, %c0_35], %127 {strides = array<i32>} : memref<16x32xf32, #tpu.memory_space<vmem>>, vector<2x32xf32>,
    %130 = vector.extract_strided_slice %5 {offsets = [4, 0], sizes = [2, 128], strides = [1, 1]} : vector<16x128xf32> to vector<2x128xf32>
    %cst_36 = arith.constant dense<0.000000e+00> : vector<2x128xf32>
    %131 = tpu.matmul %102, %11, %cst_36 {dimension_numbers = #tpu.dot_dimension_numbers<[1], [0], [0], [1], [0, 0, 1, 1], [], []>} : vector<2x32xf32>, vector<32x128xf32>, vector<2x128xf32> -> vector<2x128xf32>
    %132 = arith.addf %130, %131 : vector<2x128xf32>
    %133 = vector.extract_strided_slice %10 {offsets = [10, 0], sizes = [2, 128], strides = [1, 1]} : vector<16x128xf32> to vector<2x128xf32>
    %cst_37 = arith.constant dense<0.000000e+00> : vector<2x128xf32>
    %134 = tpu.matmul %127, %12, %cst_37 {dimension_numbers = #tpu.dot_dimension_numbers<[1], [0], [0], [1], [0, 0, 1, 1], [], []>} : vector<2x32xf32>, vector<32x128xf32>, vector<2x128xf32> -> vector<2x128xf32>
    %135 = arith.addf %133, %134 : vector<2x128xf32>
    %136 = vector.extract_strided_slice %132 {offsets = [0, 0], sizes = [2, 32], strides = [1, 1]} : vector<2x128xf32> to vector<2x32xf32>
    %137 = arith.negf %136 : vector<2x32xf32>
    %138 = math.exp %137 : vector<2x32xf32>
    %cst_38 = arith.constant 1.000000e+00 : f32
    %139 = vector.broadcast %cst_38 : f32 to vector<2x32xf32>
    %140 = arith.addf %139, %138 : vector<2x32xf32>
    %141 = arith.divf %139, %140 : vector<2x32xf32>
    %142 = vector.extract_strided_slice %132 {offsets = [0, 32], sizes = [2, 32], strides = [1, 1]} : vector<2x128xf32> to vector<2x32xf32>
    %143 = arith.negf %142 : vector<2x32xf32>
    %144 = math.exp %143 : vector<2x32xf32>
    %cst_39 = arith.constant 1.000000e+00 : f32
    %145 = vector.broadcast %cst_39 : f32 to vector<2x32xf32>
    %146 = arith.addf %145, %144 : vector<2x32xf32>
    %147 = arith.divf %145, %146 : vector<2x32xf32>
    %148 = vector.extract_strided_slice %132 {offsets = [0, 64], sizes = [2, 32], strides = [1, 1]} : vector<2x128xf32> to vector<2x32xf32>
    %149 = math.tanh %148 : vector<2x32xf32>
    %150 = vector.extract_strided_slice %132 {offsets = [0, 96], sizes = [2, 32], strides = [1, 1]} : vector<2x128xf32> to vector<2x32xf32>
    %151 = arith.negf %150 : vector<2x32xf32>
    %152 = math.exp %151 : vector<2x32xf32>
    %cst_40 = arith.constant 1.000000e+00 : f32
    %153 = vector.broadcast %cst_40 : f32 to vector<2x32xf32>
    %154 = arith.addf %153, %152 : vector<2x32xf32>
    %155 = arith.divf %153, %154 : vector<2x32xf32>
    %156 = arith.mulf %147, %100 : vector<2x32xf32>
    %157 = arith.mulf %141, %149 : vector<2x32xf32>
    %158 = arith.addf %156, %157 : vector<2x32xf32>
    %159 = math.tanh %158 : vector<2x32xf32>
    %160 = arith.mulf %155, %159 : vector<2x32xf32>
    %161 = vector.extract_strided_slice %135 {offsets = [0, 0], sizes = [2, 32], strides = [1, 1]} : vector<2x128xf32> to vector<2x32xf32>
    %162 = arith.negf %161 : vector<2x32xf32>
    %163 = math.exp %162 : vector<2x32xf32>
    %cst_41 = arith.constant 1.000000e+00 : f32
    %164 = vector.broadcast %cst_41 : f32 to vector<2x32xf32>
    %165 = arith.addf %164, %163 : vector<2x32xf32>
    %166 = arith.divf %164, %165 : vector<2x32xf32>
    %167 = vector.extract_strided_slice %135 {offsets = [0, 32], sizes = [2, 32], strides = [1, 1]} : vector<2x128xf32> to vector<2x32xf32>
    %168 = arith.negf %167 : vector<2x32xf32>
    %169 = math.exp %168 : vector<2x32xf32>
    %cst_42 = arith.constant 1.000000e+00 : f32
    %170 = vector.broadcast %cst_42 : f32 to vector<2x32xf32>
    %171 = arith.addf %170, %169 : vector<2x32xf32>
    %172 = arith.divf %170, %171 : vector<2x32xf32>
    %173 = vector.extract_strided_slice %135 {offsets = [0, 64], sizes = [2, 32], strides = [1, 1]} : vector<2x128xf32> to vector<2x32xf32>
    %174 = math.tanh %173 : vector<2x32xf32>
    %175 = vector.extract_strided_slice %135 {offsets = [0, 96], sizes = [2, 32], strides = [1, 1]} : vector<2x128xf32> to vector<2x32xf32>
    %176 = arith.negf %175 : vector<2x32xf32>
    %177 = math.exp %176 : vector<2x32xf32>
    %cst_43 = arith.constant 1.000000e+00 : f32
    %178 = vector.broadcast %cst_43 : f32 to vector<2x32xf32>
    %179 = arith.addf %178, %177 : vector<2x32xf32>
    %180 = arith.divf %178, %179 : vector<2x32xf32>
    %181 = arith.mulf %172, %125 : vector<2x32xf32>
    %182 = arith.mulf %166, %174 : vector<2x32xf32>
    %183 = arith.addf %181, %182 : vector<2x32xf32>
    %184 = math.tanh %183 : vector<2x32xf32>
    %185 = arith.mulf %180, %184 : vector<2x32xf32>
    %c4 = arith.constant 4 : index
    %c0_44 = arith.constant 0 : index
    %186 = vector.load %arg17[%c4, %c0_44] : memref<16x32xf32, #tpu.memory_space<vmem>>, vector<2x32xf32>
    tpu.vector_store %arg17[%c4, %c0_44], %160 {strides = array<i32>} : memref<16x32xf32, #tpu.memory_space<vmem>>, vector<2x32xf32>,
    %c10 = arith.constant 10 : index
    %c0_45 = arith.constant 0 : index
    %187 = vector.load %arg18[%c10, %c0_45] : memref<16x32xf32, #tpu.memory_space<vmem>>, vector<2x32xf32>
    tpu.vector_store %arg18[%c10, %c0_45], %185 {strides = array<i32>} : memref<16x32xf32, #tpu.memory_space<vmem>>, vector<2x32xf32>,
    %188 = vector.extract_strided_slice %5 {offsets = [6, 0], sizes = [2, 128], strides = [1, 1]} : vector<16x128xf32> to vector<2x128xf32>
    %cst_46 = arith.constant dense<0.000000e+00> : vector<2x128xf32>
    %189 = tpu.matmul %160, %11, %cst_46 {dimension_numbers = #tpu.dot_dimension_numbers<[1], [0], [0], [1], [0, 0, 1, 1], [], []>} : vector<2x32xf32>, vector<32x128xf32>, vector<2x128xf32> -> vector<2x128xf32>
    %190 = arith.addf %188, %189 : vector<2x128xf32>
    %191 = vector.extract_strided_slice %10 {offsets = [8, 0], sizes = [2, 128], strides = [1, 1]} : vector<16x128xf32> to vector<2x128xf32>
    %cst_47 = arith.constant dense<0.000000e+00> : vector<2x128xf32>
    %192 = tpu.matmul %185, %12, %cst_47 {dimension_numbers = #tpu.dot_dimension_numbers<[1], [0], [0], [1], [0, 0, 1, 1], [], []>} : vector<2x32xf32>, vector<32x128xf32>, vector<2x128xf32> -> vector<2x128xf32>
    %193 = arith.addf %191, %192 : vector<2x128xf32>
    %194 = vector.extract_strided_slice %190 {offsets = [0, 0], sizes = [2, 32], strides = [1, 1]} : vector<2x128xf32> to vector<2x32xf32>
    %195 = arith.negf %194 : vector<2x32xf32>
    %196 = math.exp %195 : vector<2x32xf32>
    %cst_48 = arith.constant 1.000000e+00 : f32
    %197 = vector.broadcast %cst_48 : f32 to vector<2x32xf32>
    %198 = arith.addf %197, %196 : vector<2x32xf32>
    %199 = arith.divf %197, %198 : vector<2x32xf32>
    %200 = vector.extract_strided_slice %190 {offsets = [0, 32], sizes = [2, 32], strides = [1, 1]} : vector<2x128xf32> to vector<2x32xf32>
    %201 = arith.negf %200 : vector<2x32xf32>
    %202 = math.exp %201 : vector<2x32xf32>
    %cst_49 = arith.constant 1.000000e+00 : f32
    %203 = vector.broadcast %cst_49 : f32 to vector<2x32xf32>
    %204 = arith.addf %203, %202 : vector<2x32xf32>
    %205 = arith.divf %203, %204 : vector<2x32xf32>
    %206 = vector.extract_strided_slice %190 {offsets = [0, 64], sizes = [2, 32], strides = [1, 1]} : vector<2x128xf32> to vector<2x32xf32>
    %207 = math.tanh %206 : vector<2x32xf32>
    %208 = vector.extract_strided_slice %190 {offsets = [0, 96], sizes = [2, 32], strides = [1, 1]} : vector<2x128xf32> to vector<2x32xf32>
    %209 = arith.negf %208 : vector<2x32xf32>
    %210 = math.exp %209 : vector<2x32xf32>
    %cst_50 = arith.constant 1.000000e+00 : f32
    %211 = vector.broadcast %cst_50 : f32 to vector<2x32xf32>
    %212 = arith.addf %211, %210 : vector<2x32xf32>
    %213 = arith.divf %211, %212 : vector<2x32xf32>
    %214 = arith.mulf %205, %158 : vector<2x32xf32>
    %215 = arith.mulf %199, %207 : vector<2x32xf32>
    %216 = arith.addf %214, %215 : vector<2x32xf32>
    %217 = math.tanh %216 : vector<2x32xf32>
    %218 = arith.mulf %213, %217 : vector<2x32xf32>
    %219 = vector.extract_strided_slice %193 {offsets = [0, 0], sizes = [2, 32], strides = [1, 1]} : vector<2x128xf32> to vector<2x32xf32>
    %220 = arith.negf %219 : vector<2x32xf32>
    %221 = math.exp %220 : vector<2x32xf32>
    %cst_51 = arith.constant 1.000000e+00 : f32
    %222 = vector.broadcast %cst_51 : f32 to vector<2x32xf32>
    %223 = arith.addf %222, %221 : vector<2x32xf32>
    %224 = arith.divf %222, %223 : vector<2x32xf32>
    %225 = vector.extract_strided_slice %193 {offsets = [0, 32], sizes = [2, 32], strides = [1, 1]} : vector<2x128xf32> to vector<2x32xf32>
    %226 = arith.negf %225 : vector<2x32xf32>
    %227 = math.exp %226 : vector<2x32xf32>
    %cst_52 = arith.constant 1.000000e+00 : f32
    %228 = vector.broadcast %cst_52 : f32 to vector<2x32xf32>
    %229 = arith.addf %228, %227 : vector<2x32xf32>
    %230 = arith.divf %228, %229 : vector<2x32xf32>
    %231 = vector.extract_strided_slice %193 {offsets = [0, 64], sizes = [2, 32], strides = [1, 1]} : vector<2x128xf32> to vector<2x32xf32>
    %232 = math.tanh %231 : vector<2x32xf32>
    %233 = vector.extract_strided_slice %193 {offsets = [0, 96], sizes = [2, 32], strides = [1, 1]} : vector<2x128xf32> to vector<2x32xf32>
    %234 = arith.negf %233 : vector<2x32xf32>
    %235 = math.exp %234 : vector<2x32xf32>
    %cst_53 = arith.constant 1.000000e+00 : f32
    %236 = vector.broadcast %cst_53 : f32 to vector<2x32xf32>
    %237 = arith.addf %236, %235 : vector<2x32xf32>
    %238 = arith.divf %236, %237 : vector<2x32xf32>
    %239 = arith.mulf %230, %183 : vector<2x32xf32>
    %240 = arith.mulf %224, %232 : vector<2x32xf32>
    %241 = arith.addf %239, %240 : vector<2x32xf32>
    %242 = math.tanh %241 : vector<2x32xf32>
    %243 = arith.mulf %238, %242 : vector<2x32xf32>
    %c6 = arith.constant 6 : index
    %c0_54 = arith.constant 0 : index
    %244 = vector.load %arg17[%c6, %c0_54] : memref<16x32xf32, #tpu.memory_space<vmem>>, vector<2x32xf32>
    tpu.vector_store %arg17[%c6, %c0_54], %218 {strides = array<i32>} : memref<16x32xf32, #tpu.memory_space<vmem>>, vector<2x32xf32>,
    %c8 = arith.constant 8 : index
    %c0_55 = arith.constant 0 : index
    %245 = vector.load %arg18[%c8, %c0_55] : memref<16x32xf32, #tpu.memory_space<vmem>>, vector<2x32xf32>
    tpu.vector_store %arg18[%c8, %c0_55], %243 {strides = array<i32>} : memref<16x32xf32, #tpu.memory_space<vmem>>, vector<2x32xf32>,
    %246 = vector.extract_strided_slice %5 {offsets = [8, 0], sizes = [2, 128], strides = [1, 1]} : vector<16x128xf32> to vector<2x128xf32>
    %cst_56 = arith.constant dense<0.000000e+00> : vector<2x128xf32>
    %247 = tpu.matmul %218, %11, %cst_56 {dimension_numbers = #tpu.dot_dimension_numbers<[1], [0], [0], [1], [0, 0, 1, 1], [], []>} : vector<2x32xf32>, vector<32x128xf32>, vector<2x128xf32> -> vector<2x128xf32>
    %248 = arith.addf %246, %247 : vector<2x128xf32>
    %249 = vector.extract_strided_slice %10 {offsets = [6, 0], sizes = [2, 128], strides = [1, 1]} : vector<16x128xf32> to vector<2x128xf32>
    %cst_57 = arith.constant dense<0.000000e+00> : vector<2x128xf32>
    %250 = tpu.matmul %243, %12, %cst_57 {dimension_numbers = #tpu.dot_dimension_numbers<[1], [0], [0], [1], [0, 0, 1, 1], [], []>} : vector<2x32xf32>, vector<32x128xf32>, vector<2x128xf32> -> vector<2x128xf32>
    %251 = arith.addf %249, %250 : vector<2x128xf32>
    %252 = vector.extract_strided_slice %248 {offsets = [0, 0], sizes = [2, 32], strides = [1, 1]} : vector<2x128xf32> to vector<2x32xf32>
    %253 = arith.negf %252 : vector<2x32xf32>
    %254 = math.exp %253 : vector<2x32xf32>
    %cst_58 = arith.constant 1.000000e+00 : f32
    %255 = vector.broadcast %cst_58 : f32 to vector<2x32xf32>
    %256 = arith.addf %255, %254 : vector<2x32xf32>
    %257 = arith.divf %255, %256 : vector<2x32xf32>
    %258 = vector.extract_strided_slice %248 {offsets = [0, 32], sizes = [2, 32], strides = [1, 1]} : vector<2x128xf32> to vector<2x32xf32>
    %259 = arith.negf %258 : vector<2x32xf32>
    %260 = math.exp %259 : vector<2x32xf32>
    %cst_59 = arith.constant 1.000000e+00 : f32
    %261 = vector.broadcast %cst_59 : f32 to vector<2x32xf32>
    %262 = arith.addf %261, %260 : vector<2x32xf32>
    %263 = arith.divf %261, %262 : vector<2x32xf32>
    %264 = vector.extract_strided_slice %248 {offsets = [0, 64], sizes = [2, 32], strides = [1, 1]} : vector<2x128xf32> to vector<2x32xf32>
    %265 = math.tanh %264 : vector<2x32xf32>
    %266 = vector.extract_strided_slice %248 {offsets = [0, 96], sizes = [2, 32], strides = [1, 1]} : vector<2x128xf32> to vector<2x32xf32>
    %267 = arith.negf %266 : vector<2x32xf32>
    %268 = math.exp %267 : vector<2x32xf32>
    %cst_60 = arith.constant 1.000000e+00 : f32
    %269 = vector.broadcast %cst_60 : f32 to vector<2x32xf32>
    %270 = arith.addf %269, %268 : vector<2x32xf32>
    %271 = arith.divf %269, %270 : vector<2x32xf32>
    %272 = arith.mulf %263, %216 : vector<2x32xf32>
    %273 = arith.mulf %257, %265 : vector<2x32xf32>
    %274 = arith.addf %272, %273 : vector<2x32xf32>
    %275 = math.tanh %274 : vector<2x32xf32>
    %276 = arith.mulf %271, %275 : vector<2x32xf32>
    %277 = vector.extract_strided_slice %251 {offsets = [0, 0], sizes = [2, 32], strides = [1, 1]} : vector<2x128xf32> to vector<2x32xf32>
    %278 = arith.negf %277 : vector<2x32xf32>
    %279 = math.exp %278 : vector<2x32xf32>
    %cst_61 = arith.constant 1.000000e+00 : f32
    %280 = vector.broadcast %cst_61 : f32 to vector<2x32xf32>
    %281 = arith.addf %280, %279 : vector<2x32xf32>
    %282 = arith.divf %280, %281 : vector<2x32xf32>
    %283 = vector.extract_strided_slice %251 {offsets = [0, 32], sizes = [2, 32], strides = [1, 1]} : vector<2x128xf32> to vector<2x32xf32>
    %284 = arith.negf %283 : vector<2x32xf32>
    %285 = math.exp %284 : vector<2x32xf32>
    %cst_62 = arith.constant 1.000000e+00 : f32
    %286 = vector.broadcast %cst_62 : f32 to vector<2x32xf32>
    %287 = arith.addf %286, %285 : vector<2x32xf32>
    %288 = arith.divf %286, %287 : vector<2x32xf32>
    %289 = vector.extract_strided_slice %251 {offsets = [0, 64], sizes = [2, 32], strides = [1, 1]} : vector<2x128xf32> to vector<2x32xf32>
    %290 = math.tanh %289 : vector<2x32xf32>
    %291 = vector.extract_strided_slice %251 {offsets = [0, 96], sizes = [2, 32], strides = [1, 1]} : vector<2x128xf32> to vector<2x32xf32>
    %292 = arith.negf %291 : vector<2x32xf32>
    %293 = math.exp %292 : vector<2x32xf32>
    %cst_63 = arith.constant 1.000000e+00 : f32
    %294 = vector.broadcast %cst_63 : f32 to vector<2x32xf32>
    %295 = arith.addf %294, %293 : vector<2x32xf32>
    %296 = arith.divf %294, %295 : vector<2x32xf32>
    %297 = arith.mulf %288, %241 : vector<2x32xf32>
    %298 = arith.mulf %282, %290 : vector<2x32xf32>
    %299 = arith.addf %297, %298 : vector<2x32xf32>
    %300 = math.tanh %299 : vector<2x32xf32>
    %301 = arith.mulf %296, %300 : vector<2x32xf32>
    %c8_64 = arith.constant 8 : index
    %c0_65 = arith.constant 0 : index
    %302 = vector.load %arg17[%c8_64, %c0_65] : memref<16x32xf32, #tpu.memory_space<vmem>>, vector<2x32xf32>
    tpu.vector_store %arg17[%c8_64, %c0_65], %276 {strides = array<i32>} : memref<16x32xf32, #tpu.memory_space<vmem>>, vector<2x32xf32>,
    %c6_66 = arith.constant 6 : index
    %c0_67 = arith.constant 0 : index
    %303 = vector.load %arg18[%c6_66, %c0_67] : memref<16x32xf32, #tpu.memory_space<vmem>>, vector<2x32xf32>
    tpu.vector_store %arg18[%c6_66, %c0_67], %301 {strides = array<i32>} : memref<16x32xf32, #tpu.memory_space<vmem>>, vector<2x32xf32>,
    %304 = vector.extract_strided_slice %5 {offsets = [10, 0], sizes = [2, 128], strides = [1, 1]} : vector<16x128xf32> to vector<2x128xf32>
    %cst_68 = arith.constant dense<0.000000e+00> : vector<2x128xf32>
    %305 = tpu.matmul %276, %11, %cst_68 {dimension_numbers = #tpu.dot_dimension_numbers<[1], [0], [0], [1], [0, 0, 1, 1], [], []>} : vector<2x32xf32>, vector<32x128xf32>, vector<2x128xf32> -> vector<2x128xf32>
    %306 = arith.addf %304, %305 : vector<2x128xf32>
    %307 = vector.extract_strided_slice %10 {offsets = [4, 0], sizes = [2, 128], strides = [1, 1]} : vector<16x128xf32> to vector<2x128xf32>
    %cst_69 = arith.constant dense<0.000000e+00> : vector<2x128xf32>
    %308 = tpu.matmul %301, %12, %cst_69 {dimension_numbers = #tpu.dot_dimension_numbers<[1], [0], [0], [1], [0, 0, 1, 1], [], []>} : vector<2x32xf32>, vector<32x128xf32>, vector<2x128xf32> -> vector<2x128xf32>
    %309 = arith.addf %307, %308 : vector<2x128xf32>
    %310 = vector.extract_strided_slice %306 {offsets = [0, 0], sizes = [2, 32], strides = [1, 1]} : vector<2x128xf32> to vector<2x32xf32>
    %311 = arith.negf %310 : vector<2x32xf32>
    %312 = math.exp %311 : vector<2x32xf32>
    %cst_70 = arith.constant 1.000000e+00 : f32
    %313 = vector.broadcast %cst_70 : f32 to vector<2x32xf32>
    %314 = arith.addf %313, %312 : vector<2x32xf32>
    %315 = arith.divf %313, %314 : vector<2x32xf32>
    %316 = vector.extract_strided_slice %306 {offsets = [0, 32], sizes = [2, 32], strides = [1, 1]} : vector<2x128xf32> to vector<2x32xf32>
    %317 = arith.negf %316 : vector<2x32xf32>
    %318 = math.exp %317 : vector<2x32xf32>
    %cst_71 = arith.constant 1.000000e+00 : f32
    %319 = vector.broadcast %cst_71 : f32 to vector<2x32xf32>
    %320 = arith.addf %319, %318 : vector<2x32xf32>
    %321 = arith.divf %319, %320 : vector<2x32xf32>
    %322 = vector.extract_strided_slice %306 {offsets = [0, 64], sizes = [2, 32], strides = [1, 1]} : vector<2x128xf32> to vector<2x32xf32>
    %323 = math.tanh %322 : vector<2x32xf32>
    %324 = vector.extract_strided_slice %306 {offsets = [0, 96], sizes = [2, 32], strides = [1, 1]} : vector<2x128xf32> to vector<2x32xf32>
    %325 = arith.negf %324 : vector<2x32xf32>
    %326 = math.exp %325 : vector<2x32xf32>
    %cst_72 = arith.constant 1.000000e+00 : f32
    %327 = vector.broadcast %cst_72 : f32 to vector<2x32xf32>
    %328 = arith.addf %327, %326 : vector<2x32xf32>
    %329 = arith.divf %327, %328 : vector<2x32xf32>
    %330 = arith.mulf %321, %274 : vector<2x32xf32>
    %331 = arith.mulf %315, %323 : vector<2x32xf32>
    %332 = arith.addf %330, %331 : vector<2x32xf32>
    %333 = math.tanh %332 : vector<2x32xf32>
    %334 = arith.mulf %329, %333 : vector<2x32xf32>
    %335 = vector.extract_strided_slice %309 {offsets = [0, 0], sizes = [2, 32], strides = [1, 1]} : vector<2x128xf32> to vector<2x32xf32>
    %336 = arith.negf %335 : vector<2x32xf32>
    %337 = math.exp %336 : vector<2x32xf32>
    %cst_73 = arith.constant 1.000000e+00 : f32
    %338 = vector.broadcast %cst_73 : f32 to vector<2x32xf32>
    %339 = arith.addf %338, %337 : vector<2x32xf32>
    %340 = arith.divf %338, %339 : vector<2x32xf32>
    %341 = vector.extract_strided_slice %309 {offsets = [0, 32], sizes = [2, 32], strides = [1, 1]} : vector<2x128xf32> to vector<2x32xf32>
    %342 = arith.negf %341 : vector<2x32xf32>
    %343 = math.exp %342 : vector<2x32xf32>
    %cst_74 = arith.constant 1.000000e+00 : f32
    %344 = vector.broadcast %cst_74 : f32 to vector<2x32xf32>
    %345 = arith.addf %344, %343 : vector<2x32xf32>
    %346 = arith.divf %344, %345 : vector<2x32xf32>
    %347 = vector.extract_strided_slice %309 {offsets = [0, 64], sizes = [2, 32], strides = [1, 1]} : vector<2x128xf32> to vector<2x32xf32>
    %348 = math.tanh %347 : vector<2x32xf32>
    %349 = vector.extract_strided_slice %309 {offsets = [0, 96], sizes = [2, 32], strides = [1, 1]} : vector<2x128xf32> to vector<2x32xf32>
    %350 = arith.negf %349 : vector<2x32xf32>
    %351 = math.exp %350 : vector<2x32xf32>
    %cst_75 = arith.constant 1.000000e+00 : f32
    %352 = vector.broadcast %cst_75 : f32 to vector<2x32xf32>
    %353 = arith.addf %352, %351 : vector<2x32xf32>
    %354 = arith.divf %352, %353 : vector<2x32xf32>
    %355 = arith.mulf %346, %299 : vector<2x32xf32>
    %356 = arith.mulf %340, %348 : vector<2x32xf32>
    %357 = arith.addf %355, %356 : vector<2x32xf32>
    %358 = math.tanh %357 : vector<2x32xf32>
    %359 = arith.mulf %354, %358 : vector<2x32xf32>
    %c10_76 = arith.constant 10 : index
    %c0_77 = arith.constant 0 : index
    %360 = vector.load %arg17[%c10_76, %c0_77] : memref<16x32xf32, #tpu.memory_space<vmem>>, vector<2x32xf32>
    tpu.vector_store %arg17[%c10_76, %c0_77], %334 {strides = array<i32>} : memref<16x32xf32, #tpu.memory_space<vmem>>, vector<2x32xf32>,
    %c4_78 = arith.constant 4 : index
    %c0_79 = arith.constant 0 : index
    %361 = vector.load %arg18[%c4_78, %c0_79] : memref<16x32xf32, #tpu.memory_space<vmem>>, vector<2x32xf32>
    tpu.vector_store %arg18[%c4_78, %c0_79], %359 {strides = array<i32>} : memref<16x32xf32, #tpu.memory_space<vmem>>, vector<2x32xf32>,
    %362 = vector.extract_strided_slice %5 {offsets = [12, 0], sizes = [2, 128], strides = [1, 1]} : vector<16x128xf32> to vector<2x128xf32>
    %cst_80 = arith.constant dense<0.000000e+00> : vector<2x128xf32>
    %363 = tpu.matmul %334, %11, %cst_80 {dimension_numbers = #tpu.dot_dimension_numbers<[1], [0], [0], [1], [0, 0, 1, 1], [], []>} : vector<2x32xf32>, vector<32x128xf32>, vector<2x128xf32> -> vector<2x128xf32>
    %364 = arith.addf %362, %363 : vector<2x128xf32>
    %365 = vector.extract_strided_slice %10 {offsets = [2, 0], sizes = [2, 128], strides = [1, 1]} : vector<16x128xf32> to vector<2x128xf32>
    %cst_81 = arith.constant dense<0.000000e+00> : vector<2x128xf32>
    %366 = tpu.matmul %359, %12, %cst_81 {dimension_numbers = #tpu.dot_dimension_numbers<[1], [0], [0], [1], [0, 0, 1, 1], [], []>} : vector<2x32xf32>, vector<32x128xf32>, vector<2x128xf32> -> vector<2x128xf32>
    %367 = arith.addf %365, %366 : vector<2x128xf32>
    %368 = vector.extract_strided_slice %364 {offsets = [0, 0], sizes = [2, 32], strides = [1, 1]} : vector<2x128xf32> to vector<2x32xf32>
    %369 = arith.negf %368 : vector<2x32xf32>
    %370 = math.exp %369 : vector<2x32xf32>
    %cst_82 = arith.constant 1.000000e+00 : f32
    %371 = vector.broadcast %cst_82 : f32 to vector<2x32xf32>
    %372 = arith.addf %371, %370 : vector<2x32xf32>
    %373 = arith.divf %371, %372 : vector<2x32xf32>
    %374 = vector.extract_strided_slice %364 {offsets = [0, 32], sizes = [2, 32], strides = [1, 1]} : vector<2x128xf32> to vector<2x32xf32>
    %375 = arith.negf %374 : vector<2x32xf32>
    %376 = math.exp %375 : vector<2x32xf32>
    %cst_83 = arith.constant 1.000000e+00 : f32
    %377 = vector.broadcast %cst_83 : f32 to vector<2x32xf32>
    %378 = arith.addf %377, %376 : vector<2x32xf32>
    %379 = arith.divf %377, %378 : vector<2x32xf32>
    %380 = vector.extract_strided_slice %364 {offsets = [0, 64], sizes = [2, 32], strides = [1, 1]} : vector<2x128xf32> to vector<2x32xf32>
    %381 = math.tanh %380 : vector<2x32xf32>
    %382 = vector.extract_strided_slice %364 {offsets = [0, 96], sizes = [2, 32], strides = [1, 1]} : vector<2x128xf32> to vector<2x32xf32>
    %383 = arith.negf %382 : vector<2x32xf32>
    %384 = math.exp %383 : vector<2x32xf32>
    %cst_84 = arith.constant 1.000000e+00 : f32
    %385 = vector.broadcast %cst_84 : f32 to vector<2x32xf32>
    %386 = arith.addf %385, %384 : vector<2x32xf32>
    %387 = arith.divf %385, %386 : vector<2x32xf32>
    %388 = arith.mulf %379, %332 : vector<2x32xf32>
    %389 = arith.mulf %373, %381 : vector<2x32xf32>
    %390 = arith.addf %388, %389 : vector<2x32xf32>
    %391 = math.tanh %390 : vector<2x32xf32>
    %392 = arith.mulf %387, %391 : vector<2x32xf32>
    %393 = vector.extract_strided_slice %367 {offsets = [0, 0], sizes = [2, 32], strides = [1, 1]} : vector<2x128xf32> to vector<2x32xf32>
    %394 = arith.negf %393 : vector<2x32xf32>
    %395 = math.exp %394 : vector<2x32xf32>
    %cst_85 = arith.constant 1.000000e+00 : f32
    %396 = vector.broadcast %cst_85 : f32 to vector<2x32xf32>
    %397 = arith.addf %396, %395 : vector<2x32xf32>
    %398 = arith.divf %396, %397 : vector<2x32xf32>
    %399 = vector.extract_strided_slice %367 {offsets = [0, 32], sizes = [2, 32], strides = [1, 1]} : vector<2x128xf32> to vector<2x32xf32>
    %400 = arith.negf %399 : vector<2x32xf32>
    %401 = math.exp %400 : vector<2x32xf32>
    %cst_86 = arith.constant 1.000000e+00 : f32
    %402 = vector.broadcast %cst_86 : f32 to vector<2x32xf32>
    %403 = arith.addf %402, %401 : vector<2x32xf32>
    %404 = arith.divf %402, %403 : vector<2x32xf32>
    %405 = vector.extract_strided_slice %367 {offsets = [0, 64], sizes = [2, 32], strides = [1, 1]} : vector<2x128xf32> to vector<2x32xf32>
    %406 = math.tanh %405 : vector<2x32xf32>
    %407 = vector.extract_strided_slice %367 {offsets = [0, 96], sizes = [2, 32], strides = [1, 1]} : vector<2x128xf32> to vector<2x32xf32>
    %408 = arith.negf %407 : vector<2x32xf32>
    %409 = math.exp %408 : vector<2x32xf32>
    %cst_87 = arith.constant 1.000000e+00 : f32
    %410 = vector.broadcast %cst_87 : f32 to vector<2x32xf32>
    %411 = arith.addf %410, %409 : vector<2x32xf32>
    %412 = arith.divf %410, %411 : vector<2x32xf32>
    %413 = arith.mulf %404, %357 : vector<2x32xf32>
    %414 = arith.mulf %398, %406 : vector<2x32xf32>
    %415 = arith.addf %413, %414 : vector<2x32xf32>
    %416 = math.tanh %415 : vector<2x32xf32>
    %417 = arith.mulf %412, %416 : vector<2x32xf32>
    %c12_88 = arith.constant 12 : index
    %c0_89 = arith.constant 0 : index
    %418 = vector.load %arg17[%c12_88, %c0_89] : memref<16x32xf32, #tpu.memory_space<vmem>>, vector<2x32xf32>
    tpu.vector_store %arg17[%c12_88, %c0_89], %392 {strides = array<i32>} : memref<16x32xf32, #tpu.memory_space<vmem>>, vector<2x32xf32>,
    %c2_90 = arith.constant 2 : index
    %c0_91 = arith.constant 0 : index
    %419 = vector.load %arg18[%c2_90, %c0_91] : memref<16x32xf32, #tpu.memory_space<vmem>>, vector<2x32xf32>
    tpu.vector_store %arg18[%c2_90, %c0_91], %417 {strides = array<i32>} : memref<16x32xf32, #tpu.memory_space<vmem>>, vector<2x32xf32>,
    %420 = vector.extract_strided_slice %5 {offsets = [14, 0], sizes = [2, 128], strides = [1, 1]} : vector<16x128xf32> to vector<2x128xf32>
    %cst_92 = arith.constant dense<0.000000e+00> : vector<2x128xf32>
    %421 = tpu.matmul %392, %11, %cst_92 {dimension_numbers = #tpu.dot_dimension_numbers<[1], [0], [0], [1], [0, 0, 1, 1], [], []>} : vector<2x32xf32>, vector<32x128xf32>, vector<2x128xf32> -> vector<2x128xf32>
    %422 = arith.addf %420, %421 : vector<2x128xf32>
    %423 = vector.extract_strided_slice %10 {offsets = [0, 0], sizes = [2, 128], strides = [1, 1]} : vector<16x128xf32> to vector<2x128xf32>
    %cst_93 = arith.constant dense<0.000000e+00> : vector<2x128xf32>
    %424 = tpu.matmul %417, %12, %cst_93 {dimension_numbers = #tpu.dot_dimension_numbers<[1], [0], [0], [1], [0, 0, 1, 1], [], []>} : vector<2x32xf32>, vector<32x128xf32>, vector<2x128xf32> -> vector<2x128xf32>
    %425 = arith.addf %423, %424 : vector<2x128xf32>
    %426 = vector.extract_strided_slice %422 {offsets = [0, 0], sizes = [2, 32], strides = [1, 1]} : vector<2x128xf32> to vector<2x32xf32>
    %427 = arith.negf %426 : vector<2x32xf32>
    %428 = math.exp %427 : vector<2x32xf32>
    %cst_94 = arith.constant 1.000000e+00 : f32
    %429 = vector.broadcast %cst_94 : f32 to vector<2x32xf32>
    %430 = arith.addf %429, %428 : vector<2x32xf32>
    %431 = arith.divf %429, %430 : vector<2x32xf32>
    %432 = vector.extract_strided_slice %422 {offsets = [0, 32], sizes = [2, 32], strides = [1, 1]} : vector<2x128xf32> to vector<2x32xf32>
    %433 = arith.negf %432 : vector<2x32xf32>
    %434 = math.exp %433 : vector<2x32xf32>
    %cst_95 = arith.constant 1.000000e+00 : f32
    %435 = vector.broadcast %cst_95 : f32 to vector<2x32xf32>
    %436 = arith.addf %435, %434 : vector<2x32xf32>
    %437 = arith.divf %435, %436 : vector<2x32xf32>
    %438 = vector.extract_strided_slice %422 {offsets = [0, 64], sizes = [2, 32], strides = [1, 1]} : vector<2x128xf32> to vector<2x32xf32>
    %439 = math.tanh %438 : vector<2x32xf32>
    %440 = vector.extract_strided_slice %422 {offsets = [0, 96], sizes = [2, 32], strides = [1, 1]} : vector<2x128xf32> to vector<2x32xf32>
    %441 = arith.negf %440 : vector<2x32xf32>
    %442 = math.exp %441 : vector<2x32xf32>
    %cst_96 = arith.constant 1.000000e+00 : f32
    %443 = vector.broadcast %cst_96 : f32 to vector<2x32xf32>
    %444 = arith.addf %443, %442 : vector<2x32xf32>
    %445 = arith.divf %443, %444 : vector<2x32xf32>
    %446 = arith.mulf %437, %390 : vector<2x32xf32>
    %447 = arith.mulf %431, %439 : vector<2x32xf32>
    %448 = arith.addf %446, %447 : vector<2x32xf32>
    %449 = math.tanh %448 : vector<2x32xf32>
    %450 = arith.mulf %445, %449 : vector<2x32xf32>
    %451 = vector.extract_strided_slice %425 {offsets = [0, 0], sizes = [2, 32], strides = [1, 1]} : vector<2x128xf32> to vector<2x32xf32>
    %452 = arith.negf %451 : vector<2x32xf32>
    %453 = math.exp %452 : vector<2x32xf32>
    %cst_97 = arith.constant 1.000000e+00 : f32
    %454 = vector.broadcast %cst_97 : f32 to vector<2x32xf32>
    %455 = arith.addf %454, %453 : vector<2x32xf32>
    %456 = arith.divf %454, %455 : vector<2x32xf32>
    %457 = vector.extract_strided_slice %425 {offsets = [0, 32], sizes = [2, 32], strides = [1, 1]} : vector<2x128xf32> to vector<2x32xf32>
    %458 = arith.negf %457 : vector<2x32xf32>
    %459 = math.exp %458 : vector<2x32xf32>
    %cst_98 = arith.constant 1.000000e+00 : f32
    %460 = vector.broadcast %cst_98 : f32 to vector<2x32xf32>
    %461 = arith.addf %460, %459 : vector<2x32xf32>
    %462 = arith.divf %460, %461 : vector<2x32xf32>
    %463 = vector.extract_strided_slice %425 {offsets = [0, 64], sizes = [2, 32], strides = [1, 1]} : vector<2x128xf32> to vector<2x32xf32>
    %464 = math.tanh %463 : vector<2x32xf32>
    %465 = vector.extract_strided_slice %425 {offsets = [0, 96], sizes = [2, 32], strides = [1, 1]} : vector<2x128xf32> to vector<2x32xf32>
    %466 = arith.negf %465 : vector<2x32xf32>
    %467 = math.exp %466 : vector<2x32xf32>
    %cst_99 = arith.constant 1.000000e+00 : f32
    %468 = vector.broadcast %cst_99 : f32 to vector<2x32xf32>
    %469 = arith.addf %468, %467 : vector<2x32xf32>
    %470 = arith.divf %468, %469 : vector<2x32xf32>
    %471 = arith.mulf %462, %415 : vector<2x32xf32>
    %472 = arith.mulf %456, %464 : vector<2x32xf32>
    %473 = arith.addf %471, %472 : vector<2x32xf32>
    %474 = math.tanh %473 : vector<2x32xf32>
    %475 = arith.mulf %470, %474 : vector<2x32xf32>
    %c14_100 = arith.constant 14 : index
    %c0_101 = arith.constant 0 : index
    %476 = vector.load %arg17[%c14_100, %c0_101] : memref<16x32xf32, #tpu.memory_space<vmem>>, vector<2x32xf32>
    tpu.vector_store %arg17[%c14_100, %c0_101], %450 {strides = array<i32>} : memref<16x32xf32, #tpu.memory_space<vmem>>, vector<2x32xf32>,
    %c0_102 = arith.constant 0 : index
    %c0_103 = arith.constant 0 : index
    %477 = vector.load %arg18[%c0_102, %c0_103] : memref<16x32xf32, #tpu.memory_space<vmem>>, vector<2x32xf32>
    tpu.vector_store %arg18[%c0_102, %c0_103], %475 {strides = array<i32>} : memref<16x32xf32, #tpu.memory_space<vmem>>, vector<2x32xf32>,
    %c0_104 = arith.constant 0 : index
    %c0_105 = arith.constant 0 : index
    %478 = vector.load %arg17[%c0_104, %c0_105] : memref<16x32xf32, #tpu.memory_space<vmem>>, vector<16x32xf32>
    %c0_106 = arith.constant 0 : index
    %c0_107 = arith.constant 0 : index
    %479 = vector.load %arg18[%c0_106, %c0_107] : memref<16x32xf32, #tpu.memory_space<vmem>>, vector<16x32xf32>
    %c0_108 = arith.constant 0 : index
    %c0_109 = arith.constant 0 : index
    %480 = vector.load %arg8[%c0_108, %c0_109] : memref<64x128xf32, #tpu.memory_space<vmem>>, vector<32x128xf32>
    %cst_110 = arith.constant dense<0.000000e+00> : vector<16x128xf32>
    %481 = tpu.matmul %478, %480, %cst_110 {dimension_numbers = #tpu.dot_dimension_numbers<[1], [0], [0], [1], [0, 0, 1, 1], [], []>} : vector<16x32xf32>, vector<32x128xf32>, vector<16x128xf32> -> vector<16x128xf32>
    %c32 = arith.constant 32 : index
    %c0_111 = arith.constant 0 : index
    %482 = vector.load %arg8[%c32, %c0_111] : memref<64x128xf32, #tpu.memory_space<vmem>>, vector<32x128xf32>
    %cst_112 = arith.constant dense<0.000000e+00> : vector<16x128xf32>
    %483 = tpu.matmul %479, %482, %cst_112 {dimension_numbers = #tpu.dot_dimension_numbers<[1], [0], [0], [1], [0, 0, 1, 1], [], []>} : vector<16x32xf32>, vector<32x128xf32>, vector<16x128xf32> -> vector<16x128xf32>
    %484 = arith.addf %481, %483 : vector<16x128xf32>
    %c0_113 = arith.constant 0 : index
    %c0_114 = arith.constant 0 : index
    %485 = vector.load %arg10[%c0_113, %c0_114] : memref<1x128xf32, #tpu.memory_space<vmem>>, vector<1x128xf32>
    %486 = vector.broadcast %485 : vector<1x128xf32> to vector<16x128xf32>
    %487 = arith.addf %484, %486 : vector<16x128xf32>
    %c0_115 = arith.constant 0 : index
    %c0_116 = arith.constant 0 : index
    %488 = vector.load %arg11[%c0_115, %c0_116] : memref<64x128xf32, #tpu.memory_space<vmem>>, vector<32x128xf32>
    %cst_117 = arith.constant dense<0.000000e+00> : vector<16x128xf32>
    %489 = tpu.matmul %478, %488, %cst_117 {dimension_numbers = #tpu.dot_dimension_numbers<[1], [0], [0], [1], [0, 0, 1, 1], [], []>} : vector<16x32xf32>, vector<32x128xf32>, vector<16x128xf32> -> vector<16x128xf32>
    %c32_118 = arith.constant 32 : index
    %c0_119 = arith.constant 0 : index
    %490 = vector.load %arg11[%c32_118, %c0_119] : memref<64x128xf32, #tpu.memory_space<vmem>>, vector<32x128xf32>
    %cst_120 = arith.constant dense<0.000000e+00> : vector<16x128xf32>
    %491 = tpu.matmul %479, %490, %cst_120 {dimension_numbers = #tpu.dot_dimension_numbers<[1], [0], [0], [1], [0, 0, 1, 1], [], []>} : vector<16x32xf32>, vector<32x128xf32>, vector<16x128xf32> -> vector<16x128xf32>
    %492 = arith.addf %489, %491 : vector<16x128xf32>
    %c0_121 = arith.constant 0 : index
    %c0_122 = arith.constant 0 : index
    %493 = vector.load %arg13[%c0_121, %c0_122] : memref<1x128xf32, #tpu.memory_space<vmem>>, vector<1x128xf32>
    %494 = vector.broadcast %493 : vector<1x128xf32> to vector<16x128xf32>
    %495 = arith.addf %492, %494 : vector<16x128xf32>
    %c0_123 = arith.constant 0 : index
    %c0_124 = arith.constant 0 : index
    %496 = vector.load %arg9[%c0_123, %c0_124] : memref<32x128xf32, #tpu.memory_space<vmem>>, vector<32x128xf32>
    %c0_125 = arith.constant 0 : index
    %c0_126 = arith.constant 0 : index
    %497 = vector.load %arg12[%c0_125, %c0_126] : memref<32x128xf32, #tpu.memory_space<vmem>>, vector<32x128xf32>
    %cst_127 = arith.constant 0.000000e+00 : f32
    %498 = vector.broadcast %cst_127 : f32 to vector<2x32xf32>
    %499 = vector.extract_strided_slice %487 {offsets = [0, 0], sizes = [2, 128], strides = [1, 1]} : vector<16x128xf32> to vector<2x128xf32>
    %cst_128 = arith.constant dense<0.000000e+00> : vector<2x128xf32>
    %500 = tpu.matmul %498, %496, %cst_128 {dimension_numbers = #tpu.dot_dimension_numbers<[1], [0], [0], [1], [0, 0, 1, 1], [], []>} : vector<2x32xf32>, vector<32x128xf32>, vector<2x128xf32> -> vector<2x128xf32>
    %501 = arith.addf %499, %500 : vector<2x128xf32>
    %502 = vector.extract_strided_slice %495 {offsets = [14, 0], sizes = [2, 128], strides = [1, 1]} : vector<16x128xf32> to vector<2x128xf32>
    %cst_129 = arith.constant dense<0.000000e+00> : vector<2x128xf32>
    %503 = tpu.matmul %498, %497, %cst_129 {dimension_numbers = #tpu.dot_dimension_numbers<[1], [0], [0], [1], [0, 0, 1, 1], [], []>} : vector<2x32xf32>, vector<32x128xf32>, vector<2x128xf32> -> vector<2x128xf32>
    %504 = arith.addf %502, %503 : vector<2x128xf32>
    %505 = vector.extract_strided_slice %501 {offsets = [0, 0], sizes = [2, 32], strides = [1, 1]} : vector<2x128xf32> to vector<2x32xf32>
    %506 = arith.negf %505 : vector<2x32xf32>
    %507 = math.exp %506 : vector<2x32xf32>
    %cst_130 = arith.constant 1.000000e+00 : f32
    %508 = vector.broadcast %cst_130 : f32 to vector<2x32xf32>
    %509 = arith.addf %508, %507 : vector<2x32xf32>
    %510 = arith.divf %508, %509 : vector<2x32xf32>
    %511 = vector.extract_strided_slice %501 {offsets = [0, 32], sizes = [2, 32], strides = [1, 1]} : vector<2x128xf32> to vector<2x32xf32>
    %512 = arith.negf %511 : vector<2x32xf32>
    %513 = math.exp %512 : vector<2x32xf32>
    %cst_131 = arith.constant 1.000000e+00 : f32
    %514 = vector.broadcast %cst_131 : f32 to vector<2x32xf32>
    %515 = arith.addf %514, %513 : vector<2x32xf32>
    %516 = arith.divf %514, %515 : vector<2x32xf32>
    %517 = vector.extract_strided_slice %501 {offsets = [0, 64], sizes = [2, 32], strides = [1, 1]} : vector<2x128xf32> to vector<2x32xf32>
    %518 = math.tanh %517 : vector<2x32xf32>
    %519 = vector.extract_strided_slice %501 {offsets = [0, 96], sizes = [2, 32], strides = [1, 1]} : vector<2x128xf32> to vector<2x32xf32>
    %520 = arith.negf %519 : vector<2x32xf32>
    %521 = math.exp %520 : vector<2x32xf32>
    %cst_132 = arith.constant 1.000000e+00 : f32
    %522 = vector.broadcast %cst_132 : f32 to vector<2x32xf32>
    %523 = arith.addf %522, %521 : vector<2x32xf32>
    %524 = arith.divf %522, %523 : vector<2x32xf32>
    %525 = arith.mulf %516, %498 : vector<2x32xf32>
    %526 = arith.mulf %510, %518 : vector<2x32xf32>
    %527 = arith.addf %525, %526 : vector<2x32xf32>
    %528 = math.tanh %527 : vector<2x32xf32>
    %529 = arith.mulf %524, %528 : vector<2x32xf32>
    %530 = vector.extract_strided_slice %504 {offsets = [0, 0], sizes = [2, 32], strides = [1, 1]} : vector<2x128xf32> to vector<2x32xf32>
    %531 = arith.negf %530 : vector<2x32xf32>
    %532 = math.exp %531 : vector<2x32xf32>
    %cst_133 = arith.constant 1.000000e+00 : f32
    %533 = vector.broadcast %cst_133 : f32 to vector<2x32xf32>
    %534 = arith.addf %533, %532 : vector<2x32xf32>
    %535 = arith.divf %533, %534 : vector<2x32xf32>
    %536 = vector.extract_strided_slice %504 {offsets = [0, 32], sizes = [2, 32], strides = [1, 1]} : vector<2x128xf32> to vector<2x32xf32>
    %537 = arith.negf %536 : vector<2x32xf32>
    %538 = math.exp %537 : vector<2x32xf32>
    %cst_134 = arith.constant 1.000000e+00 : f32
    %539 = vector.broadcast %cst_134 : f32 to vector<2x32xf32>
    %540 = arith.addf %539, %538 : vector<2x32xf32>
    %541 = arith.divf %539, %540 : vector<2x32xf32>
    %542 = vector.extract_strided_slice %504 {offsets = [0, 64], sizes = [2, 32], strides = [1, 1]} : vector<2x128xf32> to vector<2x32xf32>
    %543 = math.tanh %542 : vector<2x32xf32>
    %544 = vector.extract_strided_slice %504 {offsets = [0, 96], sizes = [2, 32], strides = [1, 1]} : vector<2x128xf32> to vector<2x32xf32>
    %545 = arith.negf %544 : vector<2x32xf32>
    %546 = math.exp %545 : vector<2x32xf32>
    %cst_135 = arith.constant 1.000000e+00 : f32
    %547 = vector.broadcast %cst_135 : f32 to vector<2x32xf32>
    %548 = arith.addf %547, %546 : vector<2x32xf32>
    %549 = arith.divf %547, %548 : vector<2x32xf32>
    %550 = arith.mulf %541, %498 : vector<2x32xf32>
    %551 = arith.mulf %535, %543 : vector<2x32xf32>
    %552 = arith.addf %550, %551 : vector<2x32xf32>
    %553 = math.tanh %552 : vector<2x32xf32>
    %554 = arith.mulf %549, %553 : vector<2x32xf32>
    %c0_136 = arith.constant 0 : index
    %c0_137 = arith.constant 0 : index
    %555 = vector.load %arg17[%c0_136, %c0_137] : memref<16x32xf32, #tpu.memory_space<vmem>>, vector<2x32xf32>
    tpu.vector_store %arg17[%c0_136, %c0_137], %529 {strides = array<i32>} : memref<16x32xf32, #tpu.memory_space<vmem>>, vector<2x32xf32>,
    %c14_138 = arith.constant 14 : index
    %c0_139 = arith.constant 0 : index
    %556 = vector.load %arg18[%c14_138, %c0_139] : memref<16x32xf32, #tpu.memory_space<vmem>>, vector<2x32xf32>
    tpu.vector_store %arg18[%c14_138, %c0_139], %554 {strides = array<i32>} : memref<16x32xf32, #tpu.memory_space<vmem>>, vector<2x32xf32>,
    %557 = vector.extract_strided_slice %487 {offsets = [2, 0], sizes = [2, 128], strides = [1, 1]} : vector<16x128xf32> to vector<2x128xf32>
    %cst_140 = arith.constant dense<0.000000e+00> : vector<2x128xf32>
    %558 = tpu.matmul %529, %496, %cst_140 {dimension_numbers = #tpu.dot_dimension_numbers<[1], [0], [0], [1], [0, 0, 1, 1], [], []>} : vector<2x32xf32>, vector<32x128xf32>, vector<2x128xf32> -> vector<2x128xf32>
    %559 = arith.addf %557, %558 : vector<2x128xf32>
    %560 = vector.extract_strided_slice %495 {offsets = [12, 0], sizes = [2, 128], strides = [1, 1]} : vector<16x128xf32> to vector<2x128xf32>
    %cst_141 = arith.constant dense<0.000000e+00> : vector<2x128xf32>
    %561 = tpu.matmul %554, %497, %cst_141 {dimension_numbers = #tpu.dot_dimension_numbers<[1], [0], [0], [1], [0, 0, 1, 1], [], []>} : vector<2x32xf32>, vector<32x128xf32>, vector<2x128xf32> -> vector<2x128xf32>
    %562 = arith.addf %560, %561 : vector<2x128xf32>
    %563 = vector.extract_strided_slice %559 {offsets = [0, 0], sizes = [2, 32], strides = [1, 1]} : vector<2x128xf32> to vector<2x32xf32>
    %564 = arith.negf %563 : vector<2x32xf32>
    %565 = math.exp %564 : vector<2x32xf32>
    %cst_142 = arith.constant 1.000000e+00 : f32
    %566 = vector.broadcast %cst_142 : f32 to vector<2x32xf32>
    %567 = arith.addf %566, %565 : vector<2x32xf32>
    %568 = arith.divf %566, %567 : vector<2x32xf32>
    %569 = vector.extract_strided_slice %559 {offsets = [0, 32], sizes = [2, 32], strides = [1, 1]} : vector<2x128xf32> to vector<2x32xf32>
    %570 = arith.negf %569 : vector<2x32xf32>
    %571 = math.exp %570 : vector<2x32xf32>
    %cst_143 = arith.constant 1.000000e+00 : f32
    %572 = vector.broadcast %cst_143 : f32 to vector<2x32xf32>
    %573 = arith.addf %572, %571 : vector<2x32xf32>
    %574 = arith.divf %572, %573 : vector<2x32xf32>
    %575 = vector.extract_strided_slice %559 {offsets = [0, 64], sizes = [2, 32], strides = [1, 1]} : vector<2x128xf32> to vector<2x32xf32>
    %576 = math.tanh %575 : vector<2x32xf32>
    %577 = vector.extract_strided_slice %559 {offsets = [0, 96], sizes = [2, 32], strides = [1, 1]} : vector<2x128xf32> to vector<2x32xf32>
    %578 = arith.negf %577 : vector<2x32xf32>
    %579 = math.exp %578 : vector<2x32xf32>
    %cst_144 = arith.constant 1.000000e+00 : f32
    %580 = vector.broadcast %cst_144 : f32 to vector<2x32xf32>
    %581 = arith.addf %580, %579 : vector<2x32xf32>
    %582 = arith.divf %580, %581 : vector<2x32xf32>
    %583 = arith.mulf %574, %527 : vector<2x32xf32>
    %584 = arith.mulf %568, %576 : vector<2x32xf32>
    %585 = arith.addf %583, %584 : vector<2x32xf32>
    %586 = math.tanh %585 : vector<2x32xf32>
    %587 = arith.mulf %582, %586 : vector<2x32xf32>
    %588 = vector.extract_strided_slice %562 {offsets = [0, 0], sizes = [2, 32], strides = [1, 1]} : vector<2x128xf32> to vector<2x32xf32>
    %589 = arith.negf %588 : vector<2x32xf32>
    %590 = math.exp %589 : vector<2x32xf32>
    %cst_145 = arith.constant 1.000000e+00 : f32
    %591 = vector.broadcast %cst_145 : f32 to vector<2x32xf32>
    %592 = arith.addf %591, %590 : vector<2x32xf32>
    %593 = arith.divf %591, %592 : vector<2x32xf32>
    %594 = vector.extract_strided_slice %562 {offsets = [0, 32], sizes = [2, 32], strides = [1, 1]} : vector<2x128xf32> to vector<2x32xf32>
    %595 = arith.negf %594 : vector<2x32xf32>
    %596 = math.exp %595 : vector<2x32xf32>
    %cst_146 = arith.constant 1.000000e+00 : f32
    %597 = vector.broadcast %cst_146 : f32 to vector<2x32xf32>
    %598 = arith.addf %597, %596 : vector<2x32xf32>
    %599 = arith.divf %597, %598 : vector<2x32xf32>
    %600 = vector.extract_strided_slice %562 {offsets = [0, 64], sizes = [2, 32], strides = [1, 1]} : vector<2x128xf32> to vector<2x32xf32>
    %601 = math.tanh %600 : vector<2x32xf32>
    %602 = vector.extract_strided_slice %562 {offsets = [0, 96], sizes = [2, 32], strides = [1, 1]} : vector<2x128xf32> to vector<2x32xf32>
    %603 = arith.negf %602 : vector<2x32xf32>
    %604 = math.exp %603 : vector<2x32xf32>
    %cst_147 = arith.constant 1.000000e+00 : f32
    %605 = vector.broadcast %cst_147 : f32 to vector<2x32xf32>
    %606 = arith.addf %605, %604 : vector<2x32xf32>
    %607 = arith.divf %605, %606 : vector<2x32xf32>
    %608 = arith.mulf %599, %552 : vector<2x32xf32>
    %609 = arith.mulf %593, %601 : vector<2x32xf32>
    %610 = arith.addf %608, %609 : vector<2x32xf32>
    %611 = math.tanh %610 : vector<2x32xf32>
    %612 = arith.mulf %607, %611 : vector<2x32xf32>
    %c2_148 = arith.constant 2 : index
    %c0_149 = arith.constant 0 : index
    %613 = vector.load %arg17[%c2_148, %c0_149] : memref<16x32xf32, #tpu.memory_space<vmem>>, vector<2x32xf32>
    tpu.vector_store %arg17[%c2_148, %c0_149], %587 {strides = array<i32>} : memref<16x32xf32, #tpu.memory_space<vmem>>, vector<2x32xf32>,
    %c12_150 = arith.constant 12 : index
    %c0_151 = arith.constant 0 : index
    %614 = vector.load %arg18[%c12_150, %c0_151] : memref<16x32xf32, #tpu.memory_space<vmem>>, vector<2x32xf32>
    tpu.vector_store %arg18[%c12_150, %c0_151], %612 {strides = array<i32>} : memref<16x32xf32, #tpu.memory_space<vmem>>, vector<2x32xf32>,
    %615 = vector.extract_strided_slice %487 {offsets = [4, 0], sizes = [2, 128], strides = [1, 1]} : vector<16x128xf32> to vector<2x128xf32>
    %cst_152 = arith.constant dense<0.000000e+00> : vector<2x128xf32>
    %616 = tpu.matmul %587, %496, %cst_152 {dimension_numbers = #tpu.dot_dimension_numbers<[1], [0], [0], [1], [0, 0, 1, 1], [], []>} : vector<2x32xf32>, vector<32x128xf32>, vector<2x128xf32> -> vector<2x128xf32>
    %617 = arith.addf %615, %616 : vector<2x128xf32>
    %618 = vector.extract_strided_slice %495 {offsets = [10, 0], sizes = [2, 128], strides = [1, 1]} : vector<16x128xf32> to vector<2x128xf32>
    %cst_153 = arith.constant dense<0.000000e+00> : vector<2x128xf32>
    %619 = tpu.matmul %612, %497, %cst_153 {dimension_numbers = #tpu.dot_dimension_numbers<[1], [0], [0], [1], [0, 0, 1, 1], [], []>} : vector<2x32xf32>, vector<32x128xf32>, vector<2x128xf32> -> vector<2x128xf32>
    %620 = arith.addf %618, %619 : vector<2x128xf32>
    %621 = vector.extract_strided_slice %617 {offsets = [0, 0], sizes = [2, 32], strides = [1, 1]} : vector<2x128xf32> to vector<2x32xf32>
    %622 = arith.negf %621 : vector<2x32xf32>
    %623 = math.exp %622 : vector<2x32xf32>
    %cst_154 = arith.constant 1.000000e+00 : f32
    %624 = vector.broadcast %cst_154 : f32 to vector<2x32xf32>
    %625 = arith.addf %624, %623 : vector<2x32xf32>
    %626 = arith.divf %624, %625 : vector<2x32xf32>
    %627 = vector.extract_strided_slice %617 {offsets = [0, 32], sizes = [2, 32], strides = [1, 1]} : vector<2x128xf32> to vector<2x32xf32>
    %628 = arith.negf %627 : vector<2x32xf32>
    %629 = math.exp %628 : vector<2x32xf32>
    %cst_155 = arith.constant 1.000000e+00 : f32
    %630 = vector.broadcast %cst_155 : f32 to vector<2x32xf32>
    %631 = arith.addf %630, %629 : vector<2x32xf32>
    %632 = arith.divf %630, %631 : vector<2x32xf32>
    %633 = vector.extract_strided_slice %617 {offsets = [0, 64], sizes = [2, 32], strides = [1, 1]} : vector<2x128xf32> to vector<2x32xf32>
    %634 = math.tanh %633 : vector<2x32xf32>
    %635 = vector.extract_strided_slice %617 {offsets = [0, 96], sizes = [2, 32], strides = [1, 1]} : vector<2x128xf32> to vector<2x32xf32>
    %636 = arith.negf %635 : vector<2x32xf32>
    %637 = math.exp %636 : vector<2x32xf32>
    %cst_156 = arith.constant 1.000000e+00 : f32
    %638 = vector.broadcast %cst_156 : f32 to vector<2x32xf32>
    %639 = arith.addf %638, %637 : vector<2x32xf32>
    %640 = arith.divf %638, %639 : vector<2x32xf32>
    %641 = arith.mulf %632, %585 : vector<2x32xf32>
    %642 = arith.mulf %626, %634 : vector<2x32xf32>
    %643 = arith.addf %641, %642 : vector<2x32xf32>
    %644 = math.tanh %643 : vector<2x32xf32>
    %645 = arith.mulf %640, %644 : vector<2x32xf32>
    %646 = vector.extract_strided_slice %620 {offsets = [0, 0], sizes = [2, 32], strides = [1, 1]} : vector<2x128xf32> to vector<2x32xf32>
    %647 = arith.negf %646 : vector<2x32xf32>
    %648 = math.exp %647 : vector<2x32xf32>
    %cst_157 = arith.constant 1.000000e+00 : f32
    %649 = vector.broadcast %cst_157 : f32 to vector<2x32xf32>
    %650 = arith.addf %649, %648 : vector<2x32xf32>
    %651 = arith.divf %649, %650 : vector<2x32xf32>
    %652 = vector.extract_strided_slice %620 {offsets = [0, 32], sizes = [2, 32], strides = [1, 1]} : vector<2x128xf32> to vector<2x32xf32>
    %653 = arith.negf %652 : vector<2x32xf32>
    %654 = math.exp %653 : vector<2x32xf32>
    %cst_158 = arith.constant 1.000000e+00 : f32
    %655 = vector.broadcast %cst_158 : f32 to vector<2x32xf32>
    %656 = arith.addf %655, %654 : vector<2x32xf32>
    %657 = arith.divf %655, %656 : vector<2x32xf32>
    %658 = vector.extract_strided_slice %620 {offsets = [0, 64], sizes = [2, 32], strides = [1, 1]} : vector<2x128xf32> to vector<2x32xf32>
    %659 = math.tanh %658 : vector<2x32xf32>
    %660 = vector.extract_strided_slice %620 {offsets = [0, 96], sizes = [2, 32], strides = [1, 1]} : vector<2x128xf32> to vector<2x32xf32>
    %661 = arith.negf %660 : vector<2x32xf32>
    %662 = math.exp %661 : vector<2x32xf32>
    %cst_159 = arith.constant 1.000000e+00 : f32
    %663 = vector.broadcast %cst_159 : f32 to vector<2x32xf32>
    %664 = arith.addf %663, %662 : vector<2x32xf32>
    %665 = arith.divf %663, %664 : vector<2x32xf32>
    %666 = arith.mulf %657, %610 : vector<2x32xf32>
    %667 = arith.mulf %651, %659 : vector<2x32xf32>
    %668 = arith.addf %666, %667 : vector<2x32xf32>
    %669 = math.tanh %668 : vector<2x32xf32>
    %670 = arith.mulf %665, %669 : vector<2x32xf32>
    %c4_160 = arith.constant 4 : index
    %c0_161 = arith.constant 0 : index
    %671 = vector.load %arg17[%c4_160, %c0_161] : memref<16x32xf32, #tpu.memory_space<vmem>>, vector<2x32xf32>
    tpu.vector_store %arg17[%c4_160, %c0_161], %645 {strides = array<i32>} : memref<16x32xf32, #tpu.memory_space<vmem>>, vector<2x32xf32>,
    %c10_162 = arith.constant 10 : index
    %c0_163 = arith.constant 0 : index
    %672 = vector.load %arg18[%c10_162, %c0_163] : memref<16x32xf32, #tpu.memory_space<vmem>>, vector<2x32xf32>
    tpu.vector_store %arg18[%c10_162, %c0_163], %670 {strides = array<i32>} : memref<16x32xf32, #tpu.memory_space<vmem>>, vector<2x32xf32>,
    %673 = vector.extract_strided_slice %487 {offsets = [6, 0], sizes = [2, 128], strides = [1, 1]} : vector<16x128xf32> to vector<2x128xf32>
    %cst_164 = arith.constant dense<0.000000e+00> : vector<2x128xf32>
    %674 = tpu.matmul %645, %496, %cst_164 {dimension_numbers = #tpu.dot_dimension_numbers<[1], [0], [0], [1], [0, 0, 1, 1], [], []>} : vector<2x32xf32>, vector<32x128xf32>, vector<2x128xf32> -> vector<2x128xf32>
    %675 = arith.addf %673, %674 : vector<2x128xf32>
    %676 = vector.extract_strided_slice %495 {offsets = [8, 0], sizes = [2, 128], strides = [1, 1]} : vector<16x128xf32> to vector<2x128xf32>
    %cst_165 = arith.constant dense<0.000000e+00> : vector<2x128xf32>
    %677 = tpu.matmul %670, %497, %cst_165 {dimension_numbers = #tpu.dot_dimension_numbers<[1], [0], [0], [1], [0, 0, 1, 1], [], []>} : vector<2x32xf32>, vector<32x128xf32>, vector<2x128xf32> -> vector<2x128xf32>
    %678 = arith.addf %676, %677 : vector<2x128xf32>
    %679 = vector.extract_strided_slice %675 {offsets = [0, 0], sizes = [2, 32], strides = [1, 1]} : vector<2x128xf32> to vector<2x32xf32>
    %680 = arith.negf %679 : vector<2x32xf32>
    %681 = math.exp %680 : vector<2x32xf32>
    %cst_166 = arith.constant 1.000000e+00 : f32
    %682 = vector.broadcast %cst_166 : f32 to vector<2x32xf32>
    %683 = arith.addf %682, %681 : vector<2x32xf32>
    %684 = arith.divf %682, %683 : vector<2x32xf32>
    %685 = vector.extract_strided_slice %675 {offsets = [0, 32], sizes = [2, 32], strides = [1, 1]} : vector<2x128xf32> to vector<2x32xf32>
    %686 = arith.negf %685 : vector<2x32xf32>
    %687 = math.exp %686 : vector<2x32xf32>
    %cst_167 = arith.constant 1.000000e+00 : f32
    %688 = vector.broadcast %cst_167 : f32 to vector<2x32xf32>
    %689 = arith.addf %688, %687 : vector<2x32xf32>
    %690 = arith.divf %688, %689 : vector<2x32xf32>
    %691 = vector.extract_strided_slice %675 {offsets = [0, 64], sizes = [2, 32], strides = [1, 1]} : vector<2x128xf32> to vector<2x32xf32>
    %692 = math.tanh %691 : vector<2x32xf32>
    %693 = vector.extract_strided_slice %675 {offsets = [0, 96], sizes = [2, 32], strides = [1, 1]} : vector<2x128xf32> to vector<2x32xf32>
    %694 = arith.negf %693 : vector<2x32xf32>
    %695 = math.exp %694 : vector<2x32xf32>
    %cst_168 = arith.constant 1.000000e+00 : f32
    %696 = vector.broadcast %cst_168 : f32 to vector<2x32xf32>
    %697 = arith.addf %696, %695 : vector<2x32xf32>
    %698 = arith.divf %696, %697 : vector<2x32xf32>
    %699 = arith.mulf %690, %643 : vector<2x32xf32>
    %700 = arith.mulf %684, %692 : vector<2x32xf32>
    %701 = arith.addf %699, %700 : vector<2x32xf32>
    %702 = math.tanh %701 : vector<2x32xf32>
    %703 = arith.mulf %698, %702 : vector<2x32xf32>
    %704 = vector.extract_strided_slice %678 {offsets = [0, 0], sizes = [2, 32], strides = [1, 1]} : vector<2x128xf32> to vector<2x32xf32>
    %705 = arith.negf %704 : vector<2x32xf32>
    %706 = math.exp %705 : vector<2x32xf32>
    %cst_169 = arith.constant 1.000000e+00 : f32
    %707 = vector.broadcast %cst_169 : f32 to vector<2x32xf32>
    %708 = arith.addf %707, %706 : vector<2x32xf32>
    %709 = arith.divf %707, %708 : vector<2x32xf32>
    %710 = vector.extract_strided_slice %678 {offsets = [0, 32], sizes = [2, 32], strides = [1, 1]} : vector<2x128xf32> to vector<2x32xf32>
    %711 = arith.negf %710 : vector<2x32xf32>
    %712 = math.exp %711 : vector<2x32xf32>
    %cst_170 = arith.constant 1.000000e+00 : f32
    %713 = vector.broadcast %cst_170 : f32 to vector<2x32xf32>
    %714 = arith.addf %713, %712 : vector<2x32xf32>
    %715 = arith.divf %713, %714 : vector<2x32xf32>
    %716 = vector.extract_strided_slice %678 {offsets = [0, 64], sizes = [2, 32], strides = [1, 1]} : vector<2x128xf32> to vector<2x32xf32>
    %717 = math.tanh %716 : vector<2x32xf32>
    %718 = vector.extract_strided_slice %678 {offsets = [0, 96], sizes = [2, 32], strides = [1, 1]} : vector<2x128xf32> to vector<2x32xf32>
    %719 = arith.negf %718 : vector<2x32xf32>
    %720 = math.exp %719 : vector<2x32xf32>
    %cst_171 = arith.constant 1.000000e+00 : f32
    %721 = vector.broadcast %cst_171 : f32 to vector<2x32xf32>
    %722 = arith.addf %721, %720 : vector<2x32xf32>
    %723 = arith.divf %721, %722 : vector<2x32xf32>
    %724 = arith.mulf %715, %668 : vector<2x32xf32>
    %725 = arith.mulf %709, %717 : vector<2x32xf32>
    %726 = arith.addf %724, %725 : vector<2x32xf32>
    %727 = math.tanh %726 : vector<2x32xf32>
    %728 = arith.mulf %723, %727 : vector<2x32xf32>
    %c6_172 = arith.constant 6 : index
    %c0_173 = arith.constant 0 : index
    %729 = vector.load %arg17[%c6_172, %c0_173] : memref<16x32xf32, #tpu.memory_space<vmem>>, vector<2x32xf32>
    tpu.vector_store %arg17[%c6_172, %c0_173], %703 {strides = array<i32>} : memref<16x32xf32, #tpu.memory_space<vmem>>, vector<2x32xf32>,
    %c8_174 = arith.constant 8 : index
    %c0_175 = arith.constant 0 : index
    %730 = vector.load %arg18[%c8_174, %c0_175] : memref<16x32xf32, #tpu.memory_space<vmem>>, vector<2x32xf32>
    tpu.vector_store %arg18[%c8_174, %c0_175], %728 {strides = array<i32>} : memref<16x32xf32, #tpu.memory_space<vmem>>, vector<2x32xf32>,
    %731 = vector.extract_strided_slice %487 {offsets = [8, 0], sizes = [2, 128], strides = [1, 1]} : vector<16x128xf32> to vector<2x128xf32>
    %cst_176 = arith.constant dense<0.000000e+00> : vector<2x128xf32>
    %732 = tpu.matmul %703, %496, %cst_176 {dimension_numbers = #tpu.dot_dimension_numbers<[1], [0], [0], [1], [0, 0, 1, 1], [], []>} : vector<2x32xf32>, vector<32x128xf32>, vector<2x128xf32> -> vector<2x128xf32>
    %733 = arith.addf %731, %732 : vector<2x128xf32>
    %734 = vector.extract_strided_slice %495 {offsets = [6, 0], sizes = [2, 128], strides = [1, 1]} : vector<16x128xf32> to vector<2x128xf32>
    %cst_177 = arith.constant dense<0.000000e+00> : vector<2x128xf32>
    %735 = tpu.matmul %728, %497, %cst_177 {dimension_numbers = #tpu.dot_dimension_numbers<[1], [0], [0], [1], [0, 0, 1, 1], [], []>} : vector<2x32xf32>, vector<32x128xf32>, vector<2x128xf32> -> vector<2x128xf32>
    %736 = arith.addf %734, %735 : vector<2x128xf32>
    %737 = vector.extract_strided_slice %733 {offsets = [0, 0], sizes = [2, 32], strides = [1, 1]} : vector<2x128xf32> to vector<2x32xf32>
    %738 = arith.negf %737 : vector<2x32xf32>
    %739 = math.exp %738 : vector<2x32xf32>
    %cst_178 = arith.constant 1.000000e+00 : f32
    %740 = vector.broadcast %cst_178 : f32 to vector<2x32xf32>
    %741 = arith.addf %740, %739 : vector<2x32xf32>
    %742 = arith.divf %740, %741 : vector<2x32xf32>
    %743 = vector.extract_strided_slice %733 {offsets = [0, 32], sizes = [2, 32], strides = [1, 1]} : vector<2x128xf32> to vector<2x32xf32>
    %744 = arith.negf %743 : vector<2x32xf32>
    %745 = math.exp %744 : vector<2x32xf32>
    %cst_179 = arith.constant 1.000000e+00 : f32
    %746 = vector.broadcast %cst_179 : f32 to vector<2x32xf32>
    %747 = arith.addf %746, %745 : vector<2x32xf32>
    %748 = arith.divf %746, %747 : vector<2x32xf32>
    %749 = vector.extract_strided_slice %733 {offsets = [0, 64], sizes = [2, 32], strides = [1, 1]} : vector<2x128xf32> to vector<2x32xf32>
    %750 = math.tanh %749 : vector<2x32xf32>
    %751 = vector.extract_strided_slice %733 {offsets = [0, 96], sizes = [2, 32], strides = [1, 1]} : vector<2x128xf32> to vector<2x32xf32>
    %752 = arith.negf %751 : vector<2x32xf32>
    %753 = math.exp %752 : vector<2x32xf32>
    %cst_180 = arith.constant 1.000000e+00 : f32
    %754 = vector.broadcast %cst_180 : f32 to vector<2x32xf32>
    %755 = arith.addf %754, %753 : vector<2x32xf32>
    %756 = arith.divf %754, %755 : vector<2x32xf32>
    %757 = arith.mulf %748, %701 : vector<2x32xf32>
    %758 = arith.mulf %742, %750 : vector<2x32xf32>
    %759 = arith.addf %757, %758 : vector<2x32xf32>
    %760 = math.tanh %759 : vector<2x32xf32>
    %761 = arith.mulf %756, %760 : vector<2x32xf32>
    %762 = vector.extract_strided_slice %736 {offsets = [0, 0], sizes = [2, 32], strides = [1, 1]} : vector<2x128xf32> to vector<2x32xf32>
    %763 = arith.negf %762 : vector<2x32xf32>
    %764 = math.exp %763 : vector<2x32xf32>
    %cst_181 = arith.constant 1.000000e+00 : f32
    %765 = vector.broadcast %cst_181 : f32 to vector<2x32xf32>
    %766 = arith.addf %765, %764 : vector<2x32xf32>
    %767 = arith.divf %765, %766 : vector<2x32xf32>
    %768 = vector.extract_strided_slice %736 {offsets = [0, 32], sizes = [2, 32], strides = [1, 1]} : vector<2x128xf32> to vector<2x32xf32>
    %769 = arith.negf %768 : vector<2x32xf32>
    %770 = math.exp %769 : vector<2x32xf32>
    %cst_182 = arith.constant 1.000000e+00 : f32
    %771 = vector.broadcast %cst_182 : f32 to vector<2x32xf32>
    %772 = arith.addf %771, %770 : vector<2x32xf32>
    %773 = arith.divf %771, %772 : vector<2x32xf32>
    %774 = vector.extract_strided_slice %736 {offsets = [0, 64], sizes = [2, 32], strides = [1, 1]} : vector<2x128xf32> to vector<2x32xf32>
    %775 = math.tanh %774 : vector<2x32xf32>
    %776 = vector.extract_strided_slice %736 {offsets = [0, 96], sizes = [2, 32], strides = [1, 1]} : vector<2x128xf32> to vector<2x32xf32>
    %777 = arith.negf %776 : vector<2x32xf32>
    %778 = math.exp %777 : vector<2x32xf32>
    %cst_183 = arith.constant 1.000000e+00 : f32
    %779 = vector.broadcast %cst_183 : f32 to vector<2x32xf32>
    %780 = arith.addf %779, %778 : vector<2x32xf32>
    %781 = arith.divf %779, %780 : vector<2x32xf32>
    %782 = arith.mulf %773, %726 : vector<2x32xf32>
    %783 = arith.mulf %767, %775 : vector<2x32xf32>
    %784 = arith.addf %782, %783 : vector<2x32xf32>
    %785 = math.tanh %784 : vector<2x32xf32>
    %786 = arith.mulf %781, %785 : vector<2x32xf32>
    %c8_184 = arith.constant 8 : index
    %c0_185 = arith.constant 0 : index
    %787 = vector.load %arg17[%c8_184, %c0_185] : memref<16x32xf32, #tpu.memory_space<vmem>>, vector<2x32xf32>
    tpu.vector_store %arg17[%c8_184, %c0_185], %761 {strides = array<i32>} : memref<16x32xf32, #tpu.memory_space<vmem>>, vector<2x32xf32>,
    %c6_186 = arith.constant 6 : index
    %c0_187 = arith.constant 0 : index
    %788 = vector.load %arg18[%c6_186, %c0_187] : memref<16x32xf32, #tpu.memory_space<vmem>>, vector<2x32xf32>
    tpu.vector_store %arg18[%c6_186, %c0_187], %786 {strides = array<i32>} : memref<16x32xf32, #tpu.memory_space<vmem>>, vector<2x32xf32>,
    %789 = vector.extract_strided_slice %487 {offsets = [10, 0], sizes = [2, 128], strides = [1, 1]} : vector<16x128xf32> to vector<2x128xf32>
    %cst_188 = arith.constant dense<0.000000e+00> : vector<2x128xf32>
    %790 = tpu.matmul %761, %496, %cst_188 {dimension_numbers = #tpu.dot_dimension_numbers<[1], [0], [0], [1], [0, 0, 1, 1], [], []>} : vector<2x32xf32>, vector<32x128xf32>, vector<2x128xf32> -> vector<2x128xf32>
    %791 = arith.addf %789, %790 : vector<2x128xf32>
    %792 = vector.extract_strided_slice %495 {offsets = [4, 0], sizes = [2, 128], strides = [1, 1]} : vector<16x128xf32> to vector<2x128xf32>
    %cst_189 = arith.constant dense<0.000000e+00> : vector<2x128xf32>
    %793 = tpu.matmul %786, %497, %cst_189 {dimension_numbers = #tpu.dot_dimension_numbers<[1], [0], [0], [1], [0, 0, 1, 1], [], []>} : vector<2x32xf32>, vector<32x128xf32>, vector<2x128xf32> -> vector<2x128xf32>
    %794 = arith.addf %792, %793 : vector<2x128xf32>
    %795 = vector.extract_strided_slice %791 {offsets = [0, 0], sizes = [2, 32], strides = [1, 1]} : vector<2x128xf32> to vector<2x32xf32>
    %796 = arith.negf %795 : vector<2x32xf32>
    %797 = math.exp %796 : vector<2x32xf32>
    %cst_190 = arith.constant 1.000000e+00 : f32
    %798 = vector.broadcast %cst_190 : f32 to vector<2x32xf32>
    %799 = arith.addf %798, %797 : vector<2x32xf32>
    %800 = arith.divf %798, %799 : vector<2x32xf32>
    %801 = vector.extract_strided_slice %791 {offsets = [0, 32], sizes = [2, 32], strides = [1, 1]} : vector<2x128xf32> to vector<2x32xf32>
    %802 = arith.negf %801 : vector<2x32xf32>
    %803 = math.exp %802 : vector<2x32xf32>
    %cst_191 = arith.constant 1.000000e+00 : f32
    %804 = vector.broadcast %cst_191 : f32 to vector<2x32xf32>
    %805 = arith.addf %804, %803 : vector<2x32xf32>
    %806 = arith.divf %804, %805 : vector<2x32xf32>
    %807 = vector.extract_strided_slice %791 {offsets = [0, 64], sizes = [2, 32], strides = [1, 1]} : vector<2x128xf32> to vector<2x32xf32>
    %808 = math.tanh %807 : vector<2x32xf32>
    %809 = vector.extract_strided_slice %791 {offsets = [0, 96], sizes = [2, 32], strides = [1, 1]} : vector<2x128xf32> to vector<2x32xf32>
    %810 = arith.negf %809 : vector<2x32xf32>
    %811 = math.exp %810 : vector<2x32xf32>
    %cst_192 = arith.constant 1.000000e+00 : f32
    %812 = vector.broadcast %cst_192 : f32 to vector<2x32xf32>
    %813 = arith.addf %812, %811 : vector<2x32xf32>
    %814 = arith.divf %812, %813 : vector<2x32xf32>
    %815 = arith.mulf %806, %759 : vector<2x32xf32>
    %816 = arith.mulf %800, %808 : vector<2x32xf32>
    %817 = arith.addf %815, %816 : vector<2x32xf32>
    %818 = math.tanh %817 : vector<2x32xf32>
    %819 = arith.mulf %814, %818 : vector<2x32xf32>
    %820 = vector.extract_strided_slice %794 {offsets = [0, 0], sizes = [2, 32], strides = [1, 1]} : vector<2x128xf32> to vector<2x32xf32>
    %821 = arith.negf %820 : vector<2x32xf32>
    %822 = math.exp %821 : vector<2x32xf32>
    %cst_193 = arith.constant 1.000000e+00 : f32
    %823 = vector.broadcast %cst_193 : f32 to vector<2x32xf32>
    %824 = arith.addf %823, %822 : vector<2x32xf32>
    %825 = arith.divf %823, %824 : vector<2x32xf32>
    %826 = vector.extract_strided_slice %794 {offsets = [0, 32], sizes = [2, 32], strides = [1, 1]} : vector<2x128xf32> to vector<2x32xf32>
    %827 = arith.negf %826 : vector<2x32xf32>
    %828 = math.exp %827 : vector<2x32xf32>
    %cst_194 = arith.constant 1.000000e+00 : f32
    %829 = vector.broadcast %cst_194 : f32 to vector<2x32xf32>
    %830 = arith.addf %829, %828 : vector<2x32xf32>
    %831 = arith.divf %829, %830 : vector<2x32xf32>
    %832 = vector.extract_strided_slice %794 {offsets = [0, 64], sizes = [2, 32], strides = [1, 1]} : vector<2x128xf32> to vector<2x32xf32>
    %833 = math.tanh %832 : vector<2x32xf32>
    %834 = vector.extract_strided_slice %794 {offsets = [0, 96], sizes = [2, 32], strides = [1, 1]} : vector<2x128xf32> to vector<2x32xf32>
    %835 = arith.negf %834 : vector<2x32xf32>
    %836 = math.exp %835 : vector<2x32xf32>
    %cst_195 = arith.constant 1.000000e+00 : f32
    %837 = vector.broadcast %cst_195 : f32 to vector<2x32xf32>
    %838 = arith.addf %837, %836 : vector<2x32xf32>
    %839 = arith.divf %837, %838 : vector<2x32xf32>
    %840 = arith.mulf %831, %784 : vector<2x32xf32>
    %841 = arith.mulf %825, %833 : vector<2x32xf32>
    %842 = arith.addf %840, %841 : vector<2x32xf32>
    %843 = math.tanh %842 : vector<2x32xf32>
    %844 = arith.mulf %839, %843 : vector<2x32xf32>
    %c10_196 = arith.constant 10 : index
    %c0_197 = arith.constant 0 : index
    %845 = vector.load %arg17[%c10_196, %c0_197] : memref<16x32xf32, #tpu.memory_space<vmem>>, vector<2x32xf32>
    tpu.vector_store %arg17[%c10_196, %c0_197], %819 {strides = array<i32>} : memref<16x32xf32, #tpu.memory_space<vmem>>, vector<2x32xf32>,
    %c4_198 = arith.constant 4 : index
    %c0_199 = arith.constant 0 : index
    %846 = vector.load %arg18[%c4_198, %c0_199] : memref<16x32xf32, #tpu.memory_space<vmem>>, vector<2x32xf32>
    tpu.vector_store %arg18[%c4_198, %c0_199], %844 {strides = array<i32>} : memref<16x32xf32, #tpu.memory_space<vmem>>, vector<2x32xf32>,
    %847 = vector.extract_strided_slice %487 {offsets = [12, 0], sizes = [2, 128], strides = [1, 1]} : vector<16x128xf32> to vector<2x128xf32>
    %cst_200 = arith.constant dense<0.000000e+00> : vector<2x128xf32>
    %848 = tpu.matmul %819, %496, %cst_200 {dimension_numbers = #tpu.dot_dimension_numbers<[1], [0], [0], [1], [0, 0, 1, 1], [], []>} : vector<2x32xf32>, vector<32x128xf32>, vector<2x128xf32> -> vector<2x128xf32>
    %849 = arith.addf %847, %848 : vector<2x128xf32>
    %850 = vector.extract_strided_slice %495 {offsets = [2, 0], sizes = [2, 128], strides = [1, 1]} : vector<16x128xf32> to vector<2x128xf32>
    %cst_201 = arith.constant dense<0.000000e+00> : vector<2x128xf32>
    %851 = tpu.matmul %844, %497, %cst_201 {dimension_numbers = #tpu.dot_dimension_numbers<[1], [0], [0], [1], [0, 0, 1, 1], [], []>} : vector<2x32xf32>, vector<32x128xf32>, vector<2x128xf32> -> vector<2x128xf32>
    %852 = arith.addf %850, %851 : vector<2x128xf32>
    %853 = vector.extract_strided_slice %849 {offsets = [0, 0], sizes = [2, 32], strides = [1, 1]} : vector<2x128xf32> to vector<2x32xf32>
    %854 = arith.negf %853 : vector<2x32xf32>
    %855 = math.exp %854 : vector<2x32xf32>
    %cst_202 = arith.constant 1.000000e+00 : f32
    %856 = vector.broadcast %cst_202 : f32 to vector<2x32xf32>
    %857 = arith.addf %856, %855 : vector<2x32xf32>
    %858 = arith.divf %856, %857 : vector<2x32xf32>
    %859 = vector.extract_strided_slice %849 {offsets = [0, 32], sizes = [2, 32], strides = [1, 1]} : vector<2x128xf32> to vector<2x32xf32>
    %860 = arith.negf %859 : vector<2x32xf32>
    %861 = math.exp %860 : vector<2x32xf32>
    %cst_203 = arith.constant 1.000000e+00 : f32
    %862 = vector.broadcast %cst_203 : f32 to vector<2x32xf32>
    %863 = arith.addf %862, %861 : vector<2x32xf32>
    %864 = arith.divf %862, %863 : vector<2x32xf32>
    %865 = vector.extract_strided_slice %849 {offsets = [0, 64], sizes = [2, 32], strides = [1, 1]} : vector<2x128xf32> to vector<2x32xf32>
    %866 = math.tanh %865 : vector<2x32xf32>
    %867 = vector.extract_strided_slice %849 {offsets = [0, 96], sizes = [2, 32], strides = [1, 1]} : vector<2x128xf32> to vector<2x32xf32>
    %868 = arith.negf %867 : vector<2x32xf32>
    %869 = math.exp %868 : vector<2x32xf32>
    %cst_204 = arith.constant 1.000000e+00 : f32
    %870 = vector.broadcast %cst_204 : f32 to vector<2x32xf32>
    %871 = arith.addf %870, %869 : vector<2x32xf32>
    %872 = arith.divf %870, %871 : vector<2x32xf32>
    %873 = arith.mulf %864, %817 : vector<2x32xf32>
    %874 = arith.mulf %858, %866 : vector<2x32xf32>
    %875 = arith.addf %873, %874 : vector<2x32xf32>
    %876 = math.tanh %875 : vector<2x32xf32>
    %877 = arith.mulf %872, %876 : vector<2x32xf32>
    %878 = vector.extract_strided_slice %852 {offsets = [0, 0], sizes = [2, 32], strides = [1, 1]} : vector<2x128xf32> to vector<2x32xf32>
    %879 = arith.negf %878 : vector<2x32xf32>
    %880 = math.exp %879 : vector<2x32xf32>
    %cst_205 = arith.constant 1.000000e+00 : f32
    %881 = vector.broadcast %cst_205 : f32 to vector<2x32xf32>
    %882 = arith.addf %881, %880 : vector<2x32xf32>
    %883 = arith.divf %881, %882 : vector<2x32xf32>
    %884 = vector.extract_strided_slice %852 {offsets = [0, 32], sizes = [2, 32], strides = [1, 1]} : vector<2x128xf32> to vector<2x32xf32>
    %885 = arith.negf %884 : vector<2x32xf32>
    %886 = math.exp %885 : vector<2x32xf32>
    %cst_206 = arith.constant 1.000000e+00 : f32
    %887 = vector.broadcast %cst_206 : f32 to vector<2x32xf32>
    %888 = arith.addf %887, %886 : vector<2x32xf32>
    %889 = arith.divf %887, %888 : vector<2x32xf32>
    %890 = vector.extract_strided_slice %852 {offsets = [0, 64], sizes = [2, 32], strides = [1, 1]} : vector<2x128xf32> to vector<2x32xf32>
    %891 = math.tanh %890 : vector<2x32xf32>
    %892 = vector.extract_strided_slice %852 {offsets = [0, 96], sizes = [2, 32], strides = [1, 1]} : vector<2x128xf32> to vector<2x32xf32>
    %893 = arith.negf %892 : vector<2x32xf32>
    %894 = math.exp %893 : vector<2x32xf32>
    %cst_207 = arith.constant 1.000000e+00 : f32
    %895 = vector.broadcast %cst_207 : f32 to vector<2x32xf32>
    %896 = arith.addf %895, %894 : vector<2x32xf32>
    %897 = arith.divf %895, %896 : vector<2x32xf32>
    %898 = arith.mulf %889, %842 : vector<2x32xf32>
    %899 = arith.mulf %883, %891 : vector<2x32xf32>
    %900 = arith.addf %898, %899 : vector<2x32xf32>
    %901 = math.tanh %900 : vector<2x32xf32>
    %902 = arith.mulf %897, %901 : vector<2x32xf32>
    %c12_208 = arith.constant 12 : index
    %c0_209 = arith.constant 0 : index
    %903 = vector.load %arg17[%c12_208, %c0_209] : memref<16x32xf32, #tpu.memory_space<vmem>>, vector<2x32xf32>
    tpu.vector_store %arg17[%c12_208, %c0_209], %877 {strides = array<i32>} : memref<16x32xf32, #tpu.memory_space<vmem>>, vector<2x32xf32>,
    %c2_210 = arith.constant 2 : index
    %c0_211 = arith.constant 0 : index
    %904 = vector.load %arg18[%c2_210, %c0_211] : memref<16x32xf32, #tpu.memory_space<vmem>>, vector<2x32xf32>
    tpu.vector_store %arg18[%c2_210, %c0_211], %902 {strides = array<i32>} : memref<16x32xf32, #tpu.memory_space<vmem>>, vector<2x32xf32>,
    %905 = vector.extract_strided_slice %487 {offsets = [14, 0], sizes = [2, 128], strides = [1, 1]} : vector<16x128xf32> to vector<2x128xf32>
    %cst_212 = arith.constant dense<0.000000e+00> : vector<2x128xf32>
    %906 = tpu.matmul %877, %496, %cst_212 {dimension_numbers = #tpu.dot_dimension_numbers<[1], [0], [0], [1], [0, 0, 1, 1], [], []>} : vector<2x32xf32>, vector<32x128xf32>, vector<2x128xf32> -> vector<2x128xf32>
    %907 = arith.addf %905, %906 : vector<2x128xf32>
    %908 = vector.extract_strided_slice %495 {offsets = [0, 0], sizes = [2, 128], strides = [1, 1]} : vector<16x128xf32> to vector<2x128xf32>
    %cst_213 = arith.constant dense<0.000000e+00> : vector<2x128xf32>
    %909 = tpu.matmul %902, %497, %cst_213 {dimension_numbers = #tpu.dot_dimension_numbers<[1], [0], [0], [1], [0, 0, 1, 1], [], []>} : vector<2x32xf32>, vector<32x128xf32>, vector<2x128xf32> -> vector<2x128xf32>
    %910 = arith.addf %908, %909 : vector<2x128xf32>
    %911 = vector.extract_strided_slice %907 {offsets = [0, 0], sizes = [2, 32], strides = [1, 1]} : vector<2x128xf32> to vector<2x32xf32>
    %912 = arith.negf %911 : vector<2x32xf32>
    %913 = math.exp %912 : vector<2x32xf32>
    %cst_214 = arith.constant 1.000000e+00 : f32
    %914 = vector.broadcast %cst_214 : f32 to vector<2x32xf32>
    %915 = arith.addf %914, %913 : vector<2x32xf32>
    %916 = arith.divf %914, %915 : vector<2x32xf32>
    %917 = vector.extract_strided_slice %907 {offsets = [0, 32], sizes = [2, 32], strides = [1, 1]} : vector<2x128xf32> to vector<2x32xf32>
    %918 = arith.negf %917 : vector<2x32xf32>
    %919 = math.exp %918 : vector<2x32xf32>
    %cst_215 = arith.constant 1.000000e+00 : f32
    %920 = vector.broadcast %cst_215 : f32 to vector<2x32xf32>
    %921 = arith.addf %920, %919 : vector<2x32xf32>
    %922 = arith.divf %920, %921 : vector<2x32xf32>
    %923 = vector.extract_strided_slice %907 {offsets = [0, 64], sizes = [2, 32], strides = [1, 1]} : vector<2x128xf32> to vector<2x32xf32>
    %924 = math.tanh %923 : vector<2x32xf32>
    %925 = vector.extract_strided_slice %907 {offsets = [0, 96], sizes = [2, 32], strides = [1, 1]} : vector<2x128xf32> to vector<2x32xf32>
    %926 = arith.negf %925 : vector<2x32xf32>
    %927 = math.exp %926 : vector<2x32xf32>
    %cst_216 = arith.constant 1.000000e+00 : f32
    %928 = vector.broadcast %cst_216 : f32 to vector<2x32xf32>
    %929 = arith.addf %928, %927 : vector<2x32xf32>
    %930 = arith.divf %928, %929 : vector<2x32xf32>
    %931 = arith.mulf %922, %875 : vector<2x32xf32>
    %932 = arith.mulf %916, %924 : vector<2x32xf32>
    %933 = arith.addf %931, %932 : vector<2x32xf32>
    %934 = math.tanh %933 : vector<2x32xf32>
    %935 = arith.mulf %930, %934 : vector<2x32xf32>
    %936 = vector.extract_strided_slice %910 {offsets = [0, 0], sizes = [2, 32], strides = [1, 1]} : vector<2x128xf32> to vector<2x32xf32>
    %937 = arith.negf %936 : vector<2x32xf32>
    %938 = math.exp %937 : vector<2x32xf32>
    %cst_217 = arith.constant 1.000000e+00 : f32
    %939 = vector.broadcast %cst_217 : f32 to vector<2x32xf32>
    %940 = arith.addf %939, %938 : vector<2x32xf32>
    %941 = arith.divf %939, %940 : vector<2x32xf32>
    %942 = vector.extract_strided_slice %910 {offsets = [0, 32], sizes = [2, 32], strides = [1, 1]} : vector<2x128xf32> to vector<2x32xf32>
    %943 = arith.negf %942 : vector<2x32xf32>
    %944 = math.exp %943 : vector<2x32xf32>
    %cst_218 = arith.constant 1.000000e+00 : f32
    %945 = vector.broadcast %cst_218 : f32 to vector<2x32xf32>
    %946 = arith.addf %945, %944 : vector<2x32xf32>
    %947 = arith.divf %945, %946 : vector<2x32xf32>
    %948 = vector.extract_strided_slice %910 {offsets = [0, 64], sizes = [2, 32], strides = [1, 1]} : vector<2x128xf32> to vector<2x32xf32>
    %949 = math.tanh %948 : vector<2x32xf32>
    %950 = vector.extract_strided_slice %910 {offsets = [0, 96], sizes = [2, 32], strides = [1, 1]} : vector<2x128xf32> to vector<2x32xf32>
    %951 = arith.negf %950 : vector<2x32xf32>
    %952 = math.exp %951 : vector<2x32xf32>
    %cst_219 = arith.constant 1.000000e+00 : f32
    %953 = vector.broadcast %cst_219 : f32 to vector<2x32xf32>
    %954 = arith.addf %953, %952 : vector<2x32xf32>
    %955 = arith.divf %953, %954 : vector<2x32xf32>
    %956 = arith.mulf %947, %900 : vector<2x32xf32>
    %957 = arith.mulf %941, %949 : vector<2x32xf32>
    %958 = arith.addf %956, %957 : vector<2x32xf32>
    %959 = math.tanh %958 : vector<2x32xf32>
    %960 = arith.mulf %955, %959 : vector<2x32xf32>
    %c14_220 = arith.constant 14 : index
    %c0_221 = arith.constant 0 : index
    %961 = vector.load %arg17[%c14_220, %c0_221] : memref<16x32xf32, #tpu.memory_space<vmem>>, vector<2x32xf32>
    tpu.vector_store %arg17[%c14_220, %c0_221], %935 {strides = array<i32>} : memref<16x32xf32, #tpu.memory_space<vmem>>, vector<2x32xf32>,
    %c0_222 = arith.constant 0 : index
    %c0_223 = arith.constant 0 : index
    %962 = vector.load %arg18[%c0_222, %c0_223] : memref<16x32xf32, #tpu.memory_space<vmem>>, vector<2x32xf32>
    tpu.vector_store %arg18[%c0_222, %c0_223], %960 {strides = array<i32>} : memref<16x32xf32, #tpu.memory_space<vmem>>, vector<2x32xf32>,
    %c0_224 = arith.constant 0 : index
    %c0_225 = arith.constant 0 : index
    %963 = vector.load %arg17[%c0_224, %c0_225] : memref<16x32xf32, #tpu.memory_space<vmem>>, vector<16x32xf32>
    %c0_226 = arith.constant 0 : index
    %c0_227 = arith.constant 0 : index
    %964 = vector.load %arg18[%c0_226, %c0_227] : memref<16x32xf32, #tpu.memory_space<vmem>>, vector<16x32xf32>
    %c0_228 = arith.constant 0 : index
    %c0_229 = arith.constant 0 : index
    %965 = vector.load %arg14[%c0_228, %c0_229] : memref<64x5xf32, #tpu.memory_space<vmem>>, vector<32x5xf32>
    %cst_230 = arith.constant dense<0.000000e+00> : vector<16x5xf32>
    %966 = tpu.matmul %963, %965, %cst_230 {dimension_numbers = #tpu.dot_dimension_numbers<[1], [0], [0], [1], [0, 0, 1, 1], [], []>} : vector<16x32xf32>, vector<32x5xf32>, vector<16x5xf32> -> vector<16x5xf32>
    %c32_231 = arith.constant 32 : index
    %c0_232 = arith.constant 0 : index
    %967 = vector.load %arg14[%c32_231, %c0_232] : memref<64x5xf32, #tpu.memory_space<vmem>>, vector<32x5xf32>
    %cst_233 = arith.constant dense<0.000000e+00> : vector<16x5xf32>
    %968 = tpu.matmul %964, %967, %cst_233 {dimension_numbers = #tpu.dot_dimension_numbers<[1], [0], [0], [1], [0, 0, 1, 1], [], []>} : vector<16x32xf32>, vector<32x5xf32>, vector<16x5xf32> -> vector<16x5xf32>
    %969 = arith.addf %966, %968 : vector<16x5xf32>
    %c0_234 = arith.constant 0 : index
    %c0_235 = arith.constant 0 : index
    %970 = vector.load %arg15[%c0_234, %c0_235] : memref<1x5xf32, #tpu.memory_space<vmem>>, vector<1x5xf32>
    %971 = vector.broadcast %970 : vector<1x5xf32> to vector<16x5xf32>
    %972 = arith.addf %969, %971 : vector<16x5xf32>
    %c0_236 = arith.constant 0 : index
    %c0_237 = arith.constant 0 : index
    %973 = vector.load %arg16[%c0_236, %c0_237] : memref<16x5xf32, #tpu.memory_space<vmem>>, vector<16x5xf32>
    tpu.vector_store %arg16[%c0_236, %c0_237], %972 {strides = array<i32>} : memref<16x5xf32, #tpu.memory_space<vmem>>, vector<16x5xf32>,
    return
  }
  func.func @transform_0(%arg0: i32) -> (i32, i32) {
    %c0_i32 = arith.constant 0 : i32
    %c0_i32_0 = arith.constant 0 : i32
    %c0_i32_1 = arith.constant 0 : i32
    return %c0_i32, %c0_i32_0 : i32, i32
  }
  func.func @transform_1(%arg0: i32) -> (i32, i32) {
    %c0_i32 = arith.constant 0 : i32
    %c0_i32_0 = arith.constant 0 : i32
    %c0_i32_1 = arith.constant 0 : i32
    return %c0_i32, %c0_i32_0 : i32, i32
  }
  func.func @transform_2(%arg0: i32) -> (i32, i32) {
    %c0_i32 = arith.constant 0 : i32
    %c0_i32_0 = arith.constant 0 : i32
    %c0_i32_1 = arith.constant 0 : i32
    return %c0_i32, %c0_i32_0 : i32, i32
  }
  func.func @transform_3(%arg0: i32) -> (i32, i32) {
    %c0_i32 = arith.constant 0 : i32
    %c0_i32_0 = arith.constant 0 : i32
    %c0_i32_1 = arith.constant 0 : i32
    return %c0_i32, %c0_i32_0 : i32, i32
  }
  func.func @transform_4(%arg0: i32) -> (i32, i32) {
    %c0_i32 = arith.constant 0 : i32
    %c0_i32_0 = arith.constant 0 : i32
    %c0_i32_1 = arith.constant 0 : i32
    return %c0_i32, %c0_i32_0 : i32, i32
  }
  func.func @transform_5(%arg0: i32) -> (i32, i32) {
    %c0_i32 = arith.constant 0 : i32
    %c0_i32_0 = arith.constant 0 : i32
    %c0_i32_1 = arith.constant 0 : i32
    return %c0_i32, %c0_i32_0 : i32, i32
  }
  func.func @transform_6(%arg0: i32) -> (i32, i32) {
    %c0_i32 = arith.constant 0 : i32
    %c0_i32_0 = arith.constant 0 : i32
    %c0_i32_1 = arith.constant 0 : i32
    return %c0_i32, %c0_i32_0 : i32, i32
  }
  func.func @transform_7(%arg0: i32) -> (i32, i32) {
    %c0_i32 = arith.constant 0 : i32
    %c0_i32_0 = arith.constant 0 : i32
    %c0_i32_1 = arith.constant 0 : i32
    return %c0_i32, %c0_i32_0 : i32, i32
  }
  func.func @transform_8(%arg0: i32) -> (i32, i32) {
    %c0_i32 = arith.constant 0 : i32
    %c0_i32_0 = arith.constant 0 : i32
    %c0_i32_1 = arith.constant 0 : i32
    return %c0_i32, %c0_i32_0 : i32, i32
  }
  func.func @transform_9(%arg0: i32) -> (i32, i32) {
    %c0_i32 = arith.constant 0 : i32
    %c0_i32_0 = arith.constant 0 : i32
    %c0_i32_1 = arith.constant 0 : i32
    return %c0_i32, %c0_i32_0 : i32, i32
  }
  func.func @transform_10(%arg0: i32) -> (i32, i32) {
    %c0_i32 = arith.constant 0 : i32
    %c0_i32_0 = arith.constant 0 : i32
    %c0_i32_1 = arith.constant 0 : i32
    return %c0_i32, %c0_i32_0 : i32, i32
  }
  func.func @transform_11(%arg0: i32) -> (i32, i32) {
    %c0_i32 = arith.constant 0 : i32
    %c0_i32_0 = arith.constant 0 : i32
    %c0_i32_1 = arith.constant 0 : i32
    return %c0_i32, %c0_i32_0 : i32, i32
  }
  func.func @transform_12(%arg0: i32) -> (i32, i32) {
    %c0_i32 = arith.constant 0 : i32
    %c0_i32_0 = arith.constant 0 : i32
    %c0_i32_1 = arith.constant 0 : i32
    return %c0_i32, %c0_i32_0 : i32, i32
  }
  func.func @transform_13(%arg0: i32) -> (i32, i32) {
    %c0_i32 = arith.constant 0 : i32
    %c0_i32_0 = arith.constant 0 : i32
    %c0_i32_1 = arith.constant 0 : i32
    return %c0_i32, %c0_i32_0 : i32, i32
  }
  func.func @transform_14(%arg0: i32) -> (i32, i32) {
    %c0_i32 = arith.constant 0 : i32
    %c0_i32_0 = arith.constant 0 : i32
    %c0_i32_1 = arith.constant 0 : i32
    return %c0_i32, %c0_i32_0 : i32, i32
  }
  func.func @transform_15(%arg0: i32) -> (i32, i32) {
    %c0_i32 = arith.constant 0 : i32
    %c0_i32_0 = arith.constant 0 : i32
    %c0_i32_1 = arith.constant 0 : i32
    return %c0_i32, %c0_i32_0 : i32, i32
  }
}

</mosaic_0001>

<bundles_post_ra>
// kernel: my_model0_forward.1
= control target key start
LH: loop header
LB: loop body
LE: loop exit
PB: predicated region body
PF: predicated region fallthrough
CT: control target
= control target key end

     0   :  { %20 = vsyncpa [#allocation5], 0  ;;  %s3992_s0 = inlined_call_operand.vmem [shape: f32[16,32], index: 0, kind: input, shape index: {}]   ;;  %s3993_s1 = inlined_call_operand.vmem [shape: f32[32,128], index: 1, kind: input, shape index: {}]   ;;  %s3994_s2 = inlined_call_operand.vmem [shape: f32[32,128], index: 2, kind: input, shape index: {}]   ;;  %s3995_s3 = inlined_call_operand.vmem [shape: f32[1,128], index: 3, kind: input, shape index: {}]   ;;  %s3996_s4 = inlined_call_operand.vmem [shape: f32[32,128], index: 4, kind: input, shape index: {}]   ;;  %s3997_s5 = inlined_call_operand.vmem [shape: f32[32,128], index: 5, kind: input, shape index: {}]   ;;  %s3998_s6 = inlined_call_operand.vmem [shape: f32[1,128], index: 6, kind: input, shape index: {}]   ;;  %s3999_s7 = inlined_call_operand.vmem [shape: f32[64,128], index: 7, kind: input, shape index: {}]   ;;  %s4000_s8 = inlined_call_operand.vmem [shape: f32[32,128], index: 8, kind: input, shape index: {}]   ;;  %s4001_s9 = inlined_call_operand.vmem [shape: f32[1,128], index: 9, kind: input, shape index: {}]   ;;  %s4002_s10 = inlined_call_operand.vmem [shape: f32[64,128], index: 10, kind: input, shape index: {}]   ;;  %s4003_s11 = inlined_call_operand.hbm [shape: f32[32,128], index: 11, kind: input, shape index: {}]   ;;  %s4004_s12 = inlined_call_operand.vmem [shape: f32[1,128], index: 12, kind: input, shape index: {}]   ;;  %s4005_s13 = inlined_call_operand.vmem [shape: f32[64,5], index: 13, kind: input, shape index: {}]   ;;  %s4006_s14 = inlined_call_operand.hbm [shape: f32[1,5], index: 14, kind: input, shape index: {}]   ;;  %s4007_s15 = inlined_call_operand.vmem [shape: f32[16,5], index: 15, kind: output, shape index: {}]  }
   0x1   :  { %s48_s20 = sshll.u32 %s4003_s11, 4  ;;  %s49_s20 = int_to_ptr.hbm [resolvable:$true] %s48_s20 }
   0x2   :  { %21 = vsyncpa [#allocation7], 0  ;;  %s3093_s21 = smov [#allocation4]   ;;  %s66_s25 = sshll.u32 %s4006_s14, 4  ;;  %s67_s25 = int_to_ptr.hbm [resolvable:$true] %s66_s25 }
   0x3   :  { %s50_s22 = sshll.u32 %s3093_s21, 4  ;;  %s3094_s26 = smov 128   ;;  %s51_s22 = int_to_ptr.vmem [resolvable:$true] %s50_s22 }
   0x4   :  { %s3095_s27 = smov 8   ;;  %s3096_s28 = smov [#allocation6]  }
   0x5   :  { %56 = dma.hbm_to_vmem [thread:$0]  %s49_s20, 512, %s51_s22, [#allocation5], %s3094_s26, %s3094_s26, %s3095_s27  }
   0x6   :  { %s68_s29 = sshll.u32 %s3096_s28, 4  ;;  %s69_s29 = int_to_ptr.vmem [resolvable:$true] %s68_s29 }
   0x7   :  { %71 = dma.hbm_to_vmem [thread:$0]  %s67_s25, 16, %s69_s29, [#allocation7]  }
   0x8   :  { %3089 = dma.done.wait [#allocation5], 512  }
   0x9   :  { %3090 = vsyncadd [#allocation5], 4294966784 }
   0xa   :  { %3091 = dma.done.wait [#allocation7], 16  }
   0xb   :  { %3092 = vsyncadd [#allocation7], 4294967280  ;;  %v85_v0 = vld [vmem:[%s3993_s1 + $0x18] sm:$0xff]  ;;  %v84_v2 = vld [vmem:[%s3993_s1 + $0x10] sm:$0xff]  ;;  %vm90_vm0 = vcmask 261120   ;;  %v3097_v18 = vmov 0.0  }
   0xc   :  { %v123_v1 = vld [vmem:[%s3996_s4 + $0x18] sm:$0xff]  ;;  %2765 = vmatpush.msra.mxu2 %v85_v0  ;;  %v122_v3 = vld [vmem:[%s3996_s4 + $0x10] sm:$0xff]  ;;  %v83_v4 = vld [vmem:[%s3993_s1 + $0x8] sm:$0xff]  ;;  %109 = vmatpush.msra.mxu0 %v85_v0  ;;  %vm285_vm9 = vcmask 254976  }
   0xd   :  { %2769 = vmatpush.msra.mxu3 %v123_v1  ;;  %v121_v5 = vld [vmem:[%s3996_s4 + $0x8] sm:$0xff]  ;;  %140 = vmatpush.msra.mxu1 %v123_v1  ;;  %v82_v6 = vld [vmem:[%s3993_s1] sm:$0xff]  ;;  %v3216_v9 = vld [vmem:[%s3997_s5 + $0x18] sm:$0xff] }
   0xe   :  { %2766 = vmatpush.msra.mxu2 %v84_v2  ;;  %v120_v7 = vld [vmem:[%s3996_s4] sm:$0xff]  ;;  %110 = vmatpush.msra.mxu0 %v84_v2  ;;  %v81_v8 = vld [vmem:[%s3992_s0 + $0x8] sm:$0xff]  ;;  %v3221_v10 = vld [vmem:[%s3994_s2 + $0x18] sm:$0xff] }
   0xf   :  { %2770 = vmatpush.msra.mxu3 %v122_v3  ;;  %141 = vmatpush.msra.mxu1 %v122_v3  ;;  %v3228_v11 = vld [vmem:[%s3997_s5 + $0x10] sm:$0xff]  ;;  %v80_v13 = vld [vmem:[%s3992_s0] sm:$0xff]  ;;  %v3243_v14 = vld [vmem:[%s3997_s5 + $0x8] sm:$0xff] }
  0x10   :  { %2767 = vmatpush.msra.mxu2 %v83_v4  ;;  %111 = vmatpush.msra.mxu0 %v83_v4  ;;  %v3233_v12 = vld [vmem:[%s3994_s2 + $0x10] sm:$0xff]  ;;  %v3248_v15 = vld [vmem:[%s3994_s2 + $0x8] sm:$0xff]  ;;  %v3255_v16 = vld [vmem:[%s3997_s5] sm:$0xff] }
  0x11   :  { %2771 = vmatpush.msra.mxu3 %v121_v5  ;;  %142 = vmatpush.msra.mxu1 %v121_v5  ;;  %v3260_v17 = vld [vmem:[%s3994_s2] sm:$0xff] }
  0x12   :  { %2768 = vmatpush.msra.mxu2 %v82_v6  ;;  %112 = vmatpush.msra.mxu0 %v82_v6  ;;  %v2780_v19 = vld [vmem:[%s3995_s3] ss:$0 sm:$0xff]  ;;  %s3098_s3 = smov 64  }
  0x13   :  { %2772 = vmatpush.msra.mxu3 %v120_v7  ;;  %2690 = vmatmul.msk.f32.vlgmr.msra.gmra.mxu2 %vm90_vm0, %v81_v8  ;;  %v3310_v23 = vld [vmem:[%s3998_s6] ss:$0 sm:$0xff]  ;;  %s3099_s6 = smov 32  }
  0x14   :  { %2692 = vmatmul.msk.f32.vlgmr.msra.gmra.mxu3 %vm90_vm0, %v81_v8  ;;  %174 = vmatpush.msrb.mxu2 %v3221_v10 }
  0x15   :  { %195 = vmatpush.msrb.mxu3 %v3216_v9  ;;  %143 = vmatpush.msra.mxu1 %v120_v7 }
  0x16   :  { %175 = vmatpush.msrb.mxu2 %v3233_v12  ;;  %2689 = vmatmul.msk.f32.vlgmr.msra.gmra.mxu0 %vm90_vm0, %v80_v13 }
  0x17   :  { %196 = vmatpush.msrb.mxu3 %v3228_v11  ;;  %2691 = vmatmul.msk.f32.vlgmr.msra.gmra.mxu1 %vm90_vm0, %v80_v13 }
  0x18   :  { %176 = vmatpush.msrb.mxu2 %v3248_v15  ;;  %486 = vmatpush.msrb.mxu1 %v3216_v9 }
  0x19   :  { %197 = vmatpush.msrb.mxu3 %v3243_v14  ;;  %457 = vmatpush.msrb.mxu0 %v3221_v10 }
  0x1a   :  { %177 = vmatpush.msrb.mxu2 %v3260_v17  ;;  %487 = vmatpush.msrb.mxu1 %v3228_v11 }
  0x1b   :  { %198 = vmatpush.msrb.mxu3 %v3255_v16  ;;  %178 = vmatmul.f32.vlgmr.msrb.gmra.mxu2 %v3097_v18 }
  0x1c   :  { %199 = vmatmul.f32.vlgmr.msrb.gmra.mxu3 %v3097_v18  ;;  %307 = vmatpush.msra.mxu2 %v3221_v10 }
  0x1d   :  { %336 = vmatpush.msra.mxu3 %v3216_v9  ;;  %458 = vmatpush.msrb.mxu0 %v3233_v12 }
  0x1e   :  { %308 = vmatpush.msra.mxu2 %v3233_v12  ;;  %488 = vmatpush.msrb.mxu1 %v3243_v14 }
  0x1f   :  { %337 = vmatpush.msra.mxu3 %v3228_v11  ;;  %459 = vmatpush.msrb.mxu0 %v3248_v15 }
  0x20   :  { %309 = vmatpush.msra.mxu2 %v3248_v15  ;;  %489 = vmatpush.msrb.mxu1 %v3255_v16 }
  0x21   :  { %338 = vmatpush.msra.mxu3 %v3243_v14  ;;  %460 = vmatpush.msrb.mxu0 %v3260_v17 }
  0x22   :  { %310 = vmatpush.msra.mxu2 %v3260_v17  ;;  %773 = vmatpush.msra.mxu1 %v3216_v9 }
  0x23   :  { %339 = vmatpush.msra.mxu3 %v3255_v16  ;;  %750 = vmatpush.msra.mxu0 %v3221_v10 }
  0x24   :  { %605 = vmatpush.msrb.mxu2 %v3221_v10  ;;  %774 = vmatpush.msra.mxu1 %v3228_v11 }
  0x25   :  { %634 = vmatpush.msrb.mxu3 %v3216_v9  ;;  %751 = vmatpush.msra.mxu0 %v3233_v12 }
  0x26   :  { %606 = vmatpush.msrb.mxu2 %v3233_v12  ;;  %775 = vmatpush.msra.mxu1 %v3243_v14 }
  0x27   :  { %635 = vmatpush.msrb.mxu3 %v3228_v11  ;;  %752 = vmatpush.msra.mxu0 %v3248_v15 }
  0x28   :  { %607 = vmatpush.msrb.mxu2 %v3248_v15  ;;  %776 = vmatpush.msra.mxu1 %v3255_v16 }
  0x29   :  { %636 = vmatpush.msrb.mxu3 %v3243_v14  ;;  %753 = vmatpush.msra.mxu0 %v3260_v17 }
  0x2a   :  { %608 = vmatpush.msrb.mxu2 %v3260_v17 }
  0x2b   :  { %637 = vmatpush.msrb.mxu3 %v3255_v16 }
  0x93   :  { %v114_v27 = vpop.f32.mrf.mxu0 }
  0x94   :  { %v3316_v29 = vadd.f32 %v2780_v19, %v114_v27 }
  0x96   :  { %v117_v20 = vpop.f32.mrf.mxu2 }
  0x97   :  { %v148_v21 = vpop.f32.mrf.mxu3  ;;  %v3305_v22 = vadd.f32 %v2780_v19, %v117_v20 }
  0x98   :  { %v3313_v25 = vadd.f32 %v3310_v23, %v148_v21 }
  0x9e   :  { %v179_v30 = vpop.f32.mrf.mxu2 }
  0x9f   :  { %v200_v24 = vpop.f32.mrf.mxu3  ;;  %v182_v31 = vadd.f32 %v179_v30, %v3316_v29 }
  0xa0   :  { %v204_v26 = vrot.slane %v200_v24, 2 }
  0xa1   :  { %v2693_v35 = vmul.f32 -1.442695, %v182_v31 }
  0xa2   :  { %v206_v28 = vadd.f32 %v204_v26, %v3313_v25 }
  0xa4   :  { %2785 = vtanh.f32 %v206_v28  ;;  %v2694_v34 = vmul.f32 -1.442695, %v206_v28 }
  0xa5   :  { %2787 = vtanh.f32 %v182_v31 }
  0xa6   :  { %2789 = vpow2.f32 %v2694_v34 }
  0xa7   :  { %2791 = vpow2.f32 %v2693_v35 }
  0xaa   :  { %v2786_v32 = vpop.eup %2785 }
  0xab   :  { %266 = vrot.lane.b32.xlu0 %v2786_v32, %s3098_s3  ;;  %v2788_v33 = vpop.eup %2787 }
  0xac   :  { %v2790_v36 = vpop.eup %2789 }
  0xad   :  { %v247_v37 = vadd.f32 1.0, %v2790_v36  ;;  %v2792_v38 = vpop.eup %2791 }
  0xae   :  { %v210_v39 = vadd.f32 1.0, %v2792_v38 }
  0xaf   :  { %2793 = vrcp.f32 %v247_v37  ;;  %v259_v48 = vand.u32 2147483648, %v247_v37  ;;  %vm253_vm2 = vweird.f32 %v247_v37  ;;  %v257_v49 = vand.u32 2147483647, %v247_v37 }
  0xb0   :  { %2795 = vrcp.f32 %v210_v39  ;;  %vm216_vm5 = vweird.f32 %v210_v39  ;;  %v222_v57 = vand.u32 2147483648, %v210_v39  ;;  %v220_v58 = vand.u32 2147483647, %v210_v39 }
  0xb1   :  { %v260_v52 = vor.u32 1.1754944e-38, %v259_v48  ;;  %vm258_vm4 = vcmp.eq.f32.partialorder %v257_v49, 8.507059e+37 }
  0xb2   :  { %v223_v60 = vor.u32 1.1754944e-38, %v222_v57  ;;  %vm221_vm8 = vcmp.eq.f32.partialorder %v220_v58, 8.507059e+37 }
  0xb3   :  { %229 = vrot.lane.b32.xlu0 %v2788_v33, %s3098_s3 }
  0xb5   :  { %v2794_v40 = vpop.eup %2793 }
  0xb6   :  { %v249_v41 = vmul.f32 %v2794_v40, %v247_v37  ;;  %v2796_v43 = vpop.eup %2795  ;;  %vm254_vm1 = vweird.f32 %v2794_v40 }
  0xb7   :  { %v212_v45 = vmul.f32 %v2796_v43, %v210_v39  ;;  %vm255_vm3 = vmor %vm253_vm2, %vm254_vm1  ;;  %vm217_vm6 = vweird.f32 %v2796_v43 }
  0xb8   :  { %v250_v42 = vsub.f32 1.0, %v249_v41  ;;  %vm218_vm7 = vmor %vm216_vm5, %vm217_vm6 }
  0xb9   :  { %v213_v47 = vsub.f32 1.0, %v212_v45 }
  0xba   :  { %v251_v44 = vmul.f32 %v2794_v40, %v250_v42 }
  0xbb   :  { %v214_v51 = vmul.f32 %v2796_v43, %v213_v47 }
  0xbc   :  { %v252_v46 = vadd.f32 %v2794_v40, %v251_v44 }
  0xbd   :  { %v215_v56 = vadd.f32 %v2796_v43, %v214_v51 }
  0xbe   :  { %v256_v50 = vsel %vm255_vm3, %v2794_v40, %v252_v46 }
  0xbf   :  { %v261_v54 = vsel %vm258_vm4, %v260_v52, %v256_v50  ;;  %v219_v59 = vsel %vm218_vm7, %v2796_v43, %v215_v56 }
  0xc0   :  { %v224_v62 = vsel %vm221_vm8, %v223_v60, %v219_v59  ;;  %v264_v0 = vmul.f32 0.0, %v261_v54 }
  0xc1   :  { %v227_v3 = vmul.f32 0.0, %v224_v62 }
 0x11d   :  { %v267_v53 = vpop.permute.xlu0 %266 }
 0x11e   :  { %v269_v55 = vmul.f32 %v267_v53, %v261_v54 }
 0x120   :  { %271 = vrot.lane.b32.xlu1 %v269_v55, %s3099_s6 }
 0x125   :  { %v230_v61 = vpop.permute.xlu0 %229 }
 0x126   :  { %v232_v63 = vmul.f32 %v230_v61, %v224_v62 }
 0x128   :  { %234 = vrot.lane.b32.xlu1 %v232_v63, %s3099_s6 }
 0x192   :  { %v272_v1 = vpop.permute.xlu1 %271 }
 0x193   :  { %v3323_v2 = vadd.f32 %v272_v1, %v264_v0 }
 0x195   :  { %2797 = vtanh.f32 %v3323_v2 }
 0x19a   :  { %v235_v4 = vpop.permute.xlu1 %234 }
 0x19b   :  { %v2798_v5 = vpop.eup %2797  ;;  %v3326_v6 = vadd.f32 %v235_v4, %v227_v3  ;;  %v409_v3 = vrot.slane %v3323_v2, 2 }
 0x19c   :  { %277 = vrot.lane.b32.xlu2 %v2798_v5, %s3098_s3 }
 0x19d   :  { %2799 = vtanh.f32 %v3326_v6 }
 0x1a3   :  { %v2800_v7 = vpop.eup %2799 }
 0x1a4   :  { %240 = vrot.lane.b32.xlu2 %v2800_v7, %s3098_s3 }
 0x1f6   :  { %v278_v8 = vpop.permute.xlu2 %277 }
 0x1f7   :  { %v3331_v13 = vmul.f32 %v278_v8, %v261_v54  ;;  %v369_v8 = vrot.slane %v3326_v6, 6 }
 0x1f9   :  { %v319_v19 = vrot.slane %v3331_v13, 6 }
 0x1fb   :  { %320 = vrot.lane.b32.xlu0 %v319_v19, %s3099_s6 }
 0x1fe   :  { %v241_v20 = vpop.permute.xlu2 %240 }
 0x1ff   :  { %v243_v21 = vmul.f32 %v241_v20, %v224_v62 }
 0x201   :  { %282 = vrot.lane.b32.xlu1 %v243_v21, %s3099_s6 }
 0x26d   :  { %v321_v24 = vpop.permute.xlu0 %320 }
 0x26e   :  { %2696 = vmatmul.msk.f32.vlgmr.msra.gmra.mxu3 %vm90_vm0, %v321_v24 }
 0x26f   :  { %918 = vmatpush.msra.mxu3 %v3216_v9 }
 0x271   :  { %919 = vmatpush.msra.mxu3 %v3228_v11 }
 0x273   :  { %v283_v26 = vpop.permute.xlu1 %282  ;;  %920 = vmatpush.msra.mxu3 %v3243_v14 }
 0x274   :  { %286 = vst.msk [vmem:[#allocation2] sm:$0x3] %vm285_vm9, %v283_v26  ;;  %2695 = vmatmul.msk.f32.vlgmr.msra.gmra.mxu2 %vm90_vm0, %v283_v26 }
 0x275   :  { %921 = vmatpush.msra.mxu3 %v3255_v16  ;;  %889 = vmatpush.msra.mxu2 %v3221_v10 }
 0x277   :  { %890 = vmatpush.msra.mxu2 %v3233_v12 }
 0x279   :  { %891 = vmatpush.msra.mxu2 %v3248_v15 }
 0x27b   :  { %892 = vmatpush.msra.mxu2 %v3260_v17 }
 0x2f1   :  { %v341_v27 = vpop.f32.mrf.mxu3 }
 0x2f2   :  { %v345_v28 = vrot.slane %v341_v27, 4 }
 0x2f4   :  { %v347_v30 = vadd.f32 %v345_v28, %v3313_v25 }
 0x2f6   :  { %2801 = vtanh.f32 %v347_v30  ;;  %v2698_v36 = vmul.f32 -1.442695, %v347_v30 }
 0x2f7   :  { %v312_v31 = vpop.f32.mrf.mxu2 }
 0x2f8   :  { %v316_v32 = vrot.slane %v312_v31, 6 }
 0x2fa   :  { %v318_v33 = vadd.f32 %v316_v32, %v3316_v29 }
 0x2fc   :  { %v2802_v34 = vpop.eup %2801  ;;  %2803 = vtanh.f32 %v318_v33  ;;  %v2697_v41 = vmul.f32 -1.442695, %v318_v33 }
 0x2fd   :  { %413 = vrot.lane.b32.xlu2 %v2802_v34, %s3098_s3  ;;  %2805 = vpow2.f32 %v2698_v36  ;;  %v3381_v34 = vpop.f32.mrf.mxu1 }
 0x302   :  { %v2804_v35 = vpop.eup %2803 }
 0x303   :  { %373 = vrot.lane.b32.xlu0 %v2804_v35, %s3098_s3  ;;  %v2806_v37 = vpop.eup %2805 }
 0x304   :  { %v391_v38 = vadd.f32 1.0, %v2806_v37 }
 0x306   :  { %2807 = vrcp.f32 %v391_v38  ;;  %v403_v45 = vand.u32 2147483648, %v391_v38  ;;  %vm397_vm11 = vweird.f32 %v391_v38  ;;  %v401_v47 = vand.u32 2147483647, %v391_v38 }
 0x307   :  { %2809 = vpow2.f32 %v2697_v41 }
 0x308   :  { %v404_v50 = vor.u32 1.1754944e-38, %v403_v45  ;;  %vm402_vm13 = vcmp.eq.f32.partialorder %v401_v47, 8.507059e+37 }
 0x30c   :  { %v2808_v39 = vpop.eup %2807 }
 0x30d   :  { %v393_v40 = vmul.f32 %v2808_v39, %v391_v38  ;;  %vm398_vm10 = vweird.f32 %v2808_v39  ;;  %v2810_v46 = vpop.eup %2809 }
 0x30e   :  { %vm399_vm12 = vmor %vm397_vm11, %vm398_vm10  ;;  %v351_v49 = vadd.f32 1.0, %v2810_v46 }
 0x30f   :  { %v394_v42 = vsub.f32 1.0, %v393_v40 }
 0x310   :  { %2811 = vrcp.f32 %v351_v49  ;;  %v363_v59 = vand.u32 2147483648, %v351_v49  ;;  %vm357_vm15 = vweird.f32 %v351_v49  ;;  %v361_v60 = vand.u32 2147483647, %v351_v49 }
 0x311   :  { %v395_v43 = vmul.f32 %v2808_v39, %v394_v42 }
 0x312   :  { %v364_v62 = vor.u32 1.1754944e-38, %v363_v59  ;;  %vm362_vm2 = vcmp.eq.f32.partialorder %v361_v60, 8.507059e+37 }
 0x313   :  { %v396_v44 = vadd.f32 %v2808_v39, %v395_v43 }
 0x315   :  { %v400_v48 = vsel %vm399_vm12, %v2808_v39, %v396_v44 }
 0x316   :  { %v405_v51 = vsel %vm402_vm13, %v404_v50, %v400_v48  ;;  %v2812_v54 = vpop.eup %2811 }
 0x317   :  { %v353_v55 = vmul.f32 %v2812_v54, %v351_v49  ;;  %vm358_vm14 = vweird.f32 %v2812_v54  ;;  %v411_v4 = vmul.f32 %v409_v3, %v405_v51 }
 0x318   :  { %vm359_vm1 = vmor %vm357_vm15, %vm358_vm14 }
 0x319   :  { %v354_v56 = vsub.f32 1.0, %v353_v55 }
 0x31b   :  { %v355_v57 = vmul.f32 %v2812_v54, %v354_v56 }
 0x31d   :  { %v356_v58 = vadd.f32 %v2812_v54, %v355_v57 }
 0x31f   :  { %v360_v61 = vsel %vm359_vm1, %v2812_v54, %v356_v58 }
 0x320   :  { %v365_v0 = vsel %vm362_vm2, %v364_v62, %v360_v61 }
 0x321   :  { %v371_v19 = vmul.f32 %v369_v8, %v365_v0 }
 0x357   :  { %v414_v52 = vpop.permute.xlu2 %413 }
 0x358   :  { %v416_v53 = vmul.f32 %v414_v52, %v405_v51 }
 0x35a   :  { %418 = vrot.lane.b32.xlu1 %v416_v53, %s3099_s6 }
 0x375   :  { %v374_v63 = vpop.permute.xlu0 %373 }
 0x376   :  { %v376_v1 = vmul.f32 %v374_v63, %v365_v0 }
 0x378   :  { %378 = vrot.lane.b32.xlu2 %v376_v1, %s3099_s6 }
 0x3cc   :  { %v419_v5 = vpop.permute.xlu1 %418 }
 0x3cd   :  { %v3354_v7 = vadd.f32 %v419_v5, %v411_v4 }
 0x3cf   :  { %2813 = vtanh.f32 %v3354_v7 }
 0x3d2   :  { %v379_v20 = vpop.permute.xlu2 %378 }
 0x3d3   :  { %v3358_v21 = vadd.f32 %v379_v20, %v371_v19 }
 0x3d5   :  { %v2814_v24 = vpop.eup %2813  ;;  %2815 = vtanh.f32 %v3358_v21 }
 0x3d6   :  { %424 = vrot.lane.b32.xlu0 %v2814_v24, %s3098_s3 }
 0x3db   :  { %v2816_v26 = vpop.eup %2815 }
 0x3dc   :  { %384 = vrot.lane.b32.xlu1 %v2816_v26, %s3098_s3  ;;  %v559_v26 = vrot.slane %v3354_v7, 2 }
 0x448   :  { %v425_v2 = vpop.permute.xlu0 %424 }
 0x449   :  { %v3363_v27 = vmul.f32 %v425_v2, %v405_v51 }
 0x44b   :  { %v469_v28 = vrot.slane %v3363_v27, 4 }
 0x44d   :  { %470 = vrot.lane.b32.xlu2 %v469_v28, %s3099_s6 }
 0x44e   :  { %v385_v6 = vpop.permute.xlu1 %384 }
 0x44f   :  { %v3367_v30 = vmul.f32 %v385_v6, %v365_v0 }
 0x451   :  { %v440_v31 = vrot.slane %v3367_v30, 2 }
 0x453   :  { %441 = vrot.lane.b32.xlu0 %v440_v31, %s3099_s6  ;;  %v519_v31 = vrot.slane %v3358_v21, 6 }
 0x4a7   :  { %v471_v32 = vpop.permute.xlu2 %470 }
 0x4a8   :  { %2700 = vmatmul.msk.f32.vlgmr.msrb.gmra.mxu1 %vm90_vm0, %v471_v32 }
 0x4a9   :  { %1066 = vmatpush.msrb.mxu1 %v3216_v9 }
 0x4ab   :  { %1067 = vmatpush.msrb.mxu1 %v3228_v11 }
 0x4ad   :  { %1068 = vmatpush.msrb.mxu1 %v3243_v14 }
 0x4af   :  { %1069 = vmatpush.msrb.mxu1 %v3255_v16 }
 0x4c5   :  { %v442_v33 = vpop.permute.xlu0 %441 }
 0x4c6   :  { %2699 = vmatmul.msk.f32.vlgmr.msrb.gmra.mxu0 %vm90_vm0, %v442_v33 }
 0x4c7   :  { %1037 = vmatpush.msrb.mxu0 %v3221_v10 }
 0x4c9   :  { %1038 = vmatpush.msrb.mxu0 %v3233_v12 }
 0x4cb   :  { %1039 = vmatpush.msrb.mxu0 %v3248_v15 }
 0x4cd   :  { %1040 = vmatpush.msrb.mxu0 %v3260_v17 }
 0x525   :  { %v491_v35 = vpop.f32.mrf.mxu1 }
 0x526   :  { %v495_v36 = vrot.slane %v491_v35, 6 }
 0x528   :  { %v497_v37 = vadd.f32 %v495_v36, %v3313_v25 }
 0x52a   :  { %2817 = vtanh.f32 %v497_v37  ;;  %v2702_v43 = vmul.f32 -1.442695, %v497_v37 }
 0x530   :  { %v2818_v38 = vpop.eup %2817 }
 0x531   :  { %563 = vrot.lane.b32.xlu1 %v2818_v38, %s3098_s3 }
 0x543   :  { %v462_v39 = vpop.f32.mrf.mxu0 }
 0x544   :  { %v466_v40 = vrot.slane %v462_v39, 4 }
 0x546   :  { %v468_v41 = vadd.f32 %v466_v40, %v3316_v29 }
 0x548   :  { %2819 = vtanh.f32 %v468_v41  ;;  %v2701_v44 = vmul.f32 -1.442695, %v468_v41 }
 0x549   :  { %2821 = vpow2.f32 %v2702_v43 }
 0x54a   :  { %2823 = vpow2.f32 %v2701_v44 }
 0x54e   :  { %v2820_v42 = vpop.eup %2819 }
 0x54f   :  { %523 = vrot.lane.b32.xlu2 %v2820_v42, %s3098_s3  ;;  %v2822_v45 = vpop.eup %2821 }
 0x550   :  { %v541_v46 = vadd.f32 1.0, %v2822_v45  ;;  %v2824_v47 = vpop.eup %2823 }
 0x551   :  { %v501_v48 = vadd.f32 1.0, %v2824_v47 }
 0x552   :  { %2825 = vrcp.f32 %v541_v46  ;;  %v553_v57 = vand.u32 2147483648, %v541_v46  ;;  %vm547_vm4 = vweird.f32 %v541_v46  ;;  %v551_v58 = vand.u32 2147483647, %v541_v46 }
 0x553   :  { %2827 = vrcp.f32 %v501_v48  ;;  %v513_v1 = vand.u32 2147483648, %v501_v48  ;;  %vm507_vm8 = vweird.f32 %v501_v48  ;;  %v511_v4 = vand.u32 2147483647, %v501_v48 }
 0x554   :  { %v554_v61 = vor.u32 1.1754944e-38, %v553_v57  ;;  %vm552_vm6 = vcmp.eq.f32.partialorder %v551_v58, 8.507059e+37 }
 0x555   :  { %v514_v8 = vor.u32 1.1754944e-38, %v513_v1  ;;  %vm512_vm11 = vcmp.eq.f32.partialorder %v511_v4, 8.507059e+37 }
 0x558   :  { %v2826_v49 = vpop.eup %2825 }
 0x559   :  { %v543_v50 = vmul.f32 %v2826_v49, %v541_v46  ;;  %v2828_v51 = vpop.eup %2827  ;;  %vm548_vm3 = vweird.f32 %v2826_v49 }
 0x55a   :  { %v503_v53 = vmul.f32 %v2828_v51, %v501_v48  ;;  %vm549_vm5 = vmor %vm547_vm4, %vm548_vm3  ;;  %vm508_vm7 = vweird.f32 %v2828_v51 }
 0x55b   :  { %v544_v52 = vsub.f32 1.0, %v543_v50  ;;  %vm509_vm10 = vmor %vm507_vm8, %vm508_vm7 }
 0x55c   :  { %v504_v55 = vsub.f32 1.0, %v503_v53 }
 0x55d   :  { %v545_v54 = vmul.f32 %v2826_v49, %v544_v52 }
 0x55e   :  { %v505_v59 = vmul.f32 %v2828_v51, %v504_v55 }
 0x55f   :  { %v546_v56 = vadd.f32 %v2826_v49, %v545_v54 }
 0x560   :  { %v506_v62 = vadd.f32 %v2828_v51, %v505_v59 }
 0x561   :  { %v550_v60 = vsel %vm549_vm5, %v2826_v49, %v546_v56 }
 0x562   :  { %v555_v0 = vsel %vm552_vm6, %v554_v61, %v550_v60  ;;  %v510_v5 = vsel %vm509_vm10, %v2828_v51, %v506_v62 }
 0x563   :  { %v515_v19 = vsel %vm512_vm11, %v514_v8, %v510_v5  ;;  %v561_v2 = vmul.f32 %v559_v26, %v555_v0 }
 0x564   :  { %v521_v32 = vmul.f32 %v519_v31, %v515_v19 }
 0x5a3   :  { %v564_v63 = vpop.permute.xlu1 %563 }
 0x5a4   :  { %v566_v3 = vmul.f32 %v564_v63, %v555_v0 }
 0x5a6   :  { %568 = vrot.lane.b32.xlu0 %v566_v3, %s3099_s6 }
 0x5a9   :  { %v524_v20 = vpop.permute.xlu2 %523 }
 0x5aa   :  { %v526_v24 = vmul.f32 %v524_v20, %v515_v19 }
 0x5ac   :  { %528 = vrot.lane.b32.xlu1 %v526_v24, %s3099_s6 }
 0x618   :  { %v569_v28 = vpop.permute.xlu0 %568 }
 0x619   :  { %v3390_v6 = vadd.f32 %v569_v28, %v561_v2 }
 0x61b   :  { %2829 = vtanh.f32 %v3390_v6  ;;  %v704_v20 = vrot.slane %v3390_v6, 2 }
 0x61e   :  { %v529_v33 = vpop.permute.xlu1 %528 }
 0x61f   :  { %v3394_v35 = vadd.f32 %v529_v33, %v521_v32 }
 0x621   :  { %v2830_v36 = vpop.eup %2829  ;;  %2831 = vtanh.f32 %v3394_v35  ;;  %v664_v31 = vrot.slane %v3394_v35, 6 }
 0x622   :  { %574 = vrot.lane.b32.xlu2 %v2830_v36, %s3098_s3 }
 0x627   :  { %v2832_v37 = vpop.eup %2831 }
 0x628   :  { %534 = vrot.lane.b32.xlu0 %v2832_v37, %s3098_s3 }
 0x67c   :  { %v575_v7 = vpop.permute.xlu2 %574 }
 0x67d   :  { %v3399_v38 = vmul.f32 %v575_v7, %v555_v0 }
 0x67f   :  { %v617_v39 = vrot.slane %v3399_v38, 2 }
 0x681   :  { %618 = vrot.lane.b32.xlu1 %v617_v39, %s3099_s6 }
 0x69a   :  { %v535_v21 = vpop.permute.xlu0 %534 }
 0x69b   :  { %v3403_v40 = vmul.f32 %v535_v21, %v515_v19 }
 0x69d   :  { %v588_v41 = vrot.slane %v3403_v40, 4 }
 0x69f   :  { %589 = vrot.lane.b32.xlu2 %v588_v41, %s3099_s6 }
 0x6f3   :  { %v619_v42 = vpop.permute.xlu1 %618 }
 0x6f4   :  { %2704 = vmatmul.msk.f32.vlgmr.msrb.gmra.mxu3 %vm90_vm0, %v619_v42 }
 0x6f5   :  { %1214 = vmatpush.msrb.mxu3 %v3216_v9 }
 0x6f7   :  { %1215 = vmatpush.msrb.mxu3 %v3228_v11 }
 0x6f9   :  { %v590_v43 = vpop.permute.xlu2 %589  ;;  %1216 = vmatpush.msrb.mxu3 %v3243_v14 }
 0x6fa   :  { %2703 = vmatmul.msk.f32.vlgmr.msrb.gmra.mxu2 %vm90_vm0, %v590_v43 }
 0x6fb   :  { %1185 = vmatpush.msrb.mxu2 %v3221_v10  ;;  %1217 = vmatpush.msrb.mxu3 %v3255_v16 }
 0x6fd   :  { %1186 = vmatpush.msrb.mxu2 %v3233_v12 }
 0x6ff   :  { %1187 = vmatpush.msrb.mxu2 %v3248_v15 }
 0x701   :  { %1188 = vmatpush.msrb.mxu2 %v3260_v17 }
 0x777   :  { %v639_v44 = vpop.f32.mrf.mxu3 }
 0x778   :  { %v642_v9 = vadd.f32 %v639_v44, %v3313_v25  ;;  %v3443_v44 = vadd.f32 %v3310_v23, %v3381_v34 }
 0x77a   :  { %2833 = vtanh.f32 %v642_v9  ;;  %v2706_v12 = vmul.f32 -1.442695, %v642_v9 }
 0x77d   :  { %v610_v11 = vpop.f32.mrf.mxu2 }
 0x77e   :  { %v614_v45 = vrot.slane %v610_v11, 2 }
 0x780   :  { %v2834_v46 = vpop.eup %2833  ;;  %v616_v14 = vadd.f32 %v614_v45, %v3316_v29 }
 0x781   :  { %708 = vrot.lane.b32.xlu0 %v2834_v46, %s3098_s3 }
 0x782   :  { %2835 = vtanh.f32 %v616_v14  ;;  %v2705_v15 = vmul.f32 -1.442695, %v616_v14 }
 0x783   :  { %2837 = vpow2.f32 %v2706_v12 }
 0x784   :  { %2839 = vpow2.f32 %v2705_v15 }
 0x788   :  { %v2836_v10 = vpop.eup %2835 }
 0x789   :  { %668 = vrot.lane.b32.xlu1 %v2836_v10, %s3098_s3  ;;  %v2838_v16 = vpop.eup %2837 }
 0x78a   :  { %v686_v17 = vadd.f32 1.0, %v2838_v16  ;;  %v2840_v25 = vpop.eup %2839 }
 0x78b   :  { %v646_v47 = vadd.f32 1.0, %v2840_v25 }
 0x78c   :  { %2841 = vrcp.f32 %v686_v17  ;;  %v698_v55 = vand.u32 2147483648, %v686_v17  ;;  %vm692_vm13 = vweird.f32 %v686_v17  ;;  %v696_v56 = vand.u32 2147483647, %v686_v17 }
 0x78d   :  { %2843 = vrcp.f32 %v646_v47  ;;  %v658_v0 = vand.u32 2147483648, %v646_v47  ;;  %vm652_vm2 = vweird.f32 %v646_v47  ;;  %v656_v1 = vand.u32 2147483647, %v646_v47 }
 0x78e   :  { %v699_v59 = vor.u32 1.1754944e-38, %v698_v55  ;;  %vm697_vm15 = vcmp.eq.f32.partialorder %v696_v56, 8.507059e+37 }
 0x78f   :  { %v659_v4 = vor.u32 1.1754944e-38, %v658_v0  ;;  %vm657_vm4 = vcmp.eq.f32.partialorder %v656_v1, 8.507059e+37 }
 0x792   :  { %v2842_v48 = vpop.eup %2841 }
 0x793   :  { %v688_v49 = vmul.f32 %v2842_v48, %v686_v17  ;;  %v2844_v29 = vpop.eup %2843  ;;  %vm693_vm12 = vweird.f32 %v2842_v48 }
 0x794   :  { %v648_v52 = vmul.f32 %v2844_v29, %v646_v47  ;;  %vm694_vm14 = vmor %vm692_vm13, %vm693_vm12  ;;  %vm653_vm1 = vweird.f32 %v2844_v29 }
 0x795   :  { %v689_v50 = vsub.f32 1.0, %v688_v49  ;;  %vm654_vm3 = vmor %vm652_vm2, %vm653_vm1 }
 0x796   :  { %v649_v54 = vsub.f32 1.0, %v648_v52 }
 0x797   :  { %v690_v51 = vmul.f32 %v2842_v48, %v689_v50 }
 0x798   :  { %v650_v58 = vmul.f32 %v2844_v29, %v649_v54 }
 0x799   :  { %v691_v53 = vadd.f32 %v2842_v48, %v690_v51 }
 0x79a   :  { %v651_v63 = vadd.f32 %v2844_v29, %v650_v58 }
 0x79b   :  { %v695_v57 = vsel %vm694_vm14, %v2842_v48, %v691_v53 }
 0x79c   :  { %v700_v61 = vsel %vm697_vm15, %v699_v59, %v695_v57  ;;  %v655_v3 = vsel %vm654_vm3, %v2844_v29, %v651_v63 }
 0x79d   :  { %v660_v8 = vsel %vm657_vm4, %v659_v4, %v655_v3  ;;  %v706_v24 = vmul.f32 %v704_v20, %v700_v61 }
 0x79e   :  { %v666_v32 = vmul.f32 %v664_v31, %v660_v8 }
 0x7f3   :  { %v709_v60 = vpop.permute.xlu0 %708 }
 0x7f4   :  { %v711_v62 = vmul.f32 %v709_v60, %v700_v61 }
 0x7f6   :  { %713 = vrot.lane.b32.xlu2 %v711_v62, %s3099_s6 }
 0x7fb   :  { %v669_v5 = vpop.permute.xlu1 %668 }
 0x7fc   :  { %v671_v19 = vmul.f32 %v669_v5, %v660_v8 }
 0x7fe   :  { %673 = vrot.lane.b32.xlu0 %v671_v19, %s3099_s6 }
 0x850   :  { %v714_v26 = vpop.permute.xlu2 %713 }
 0x851   :  { %v3424_v2 = vadd.f32 %v714_v26, %v706_v24 }
 0x853   :  { %2845 = vtanh.f32 %v3424_v2 }
 0x859   :  { %v2846_v28 = vpop.eup %2845 }
 0x85a   :  { %719 = vrot.lane.b32.xlu1 %v2846_v28, %s3098_s3 }
 0x870   :  { %v674_v33 = vpop.permute.xlu0 %673 }
 0x871   :  { %v3429_v36 = vadd.f32 %v674_v33, %v666_v32 }
 0x873   :  { %2847 = vtanh.f32 %v3429_v36  ;;  %v806_v26 = vrot.slane %v3429_v36, 6 }
 0x879   :  { %v2848_v37 = vpop.eup %2847 }
 0x87a   :  { %679 = vrot.lane.b32.xlu2 %v2848_v37, %s3098_s3 }
 0x8cc   :  { %v720_v6 = vpop.permute.xlu1 %719 }
 0x8cd   :  { %v722_v7 = vmul.f32 %v720_v6, %v700_v61 }
 0x8cf   :  { %729 = vrot.lane.b32.xlu0 %v722_v7, %s3099_s6 }
 0x8d4   :  { %v680_v39 = vpop.permute.xlu2 %679 }
 0x8d5   :  { %v3434_v21 = vmul.f32 %v680_v39, %v660_v8  ;;  %v846_v8 = vrot.slane %v3424_v2, 2 }
 0x8d7   :  { %v733_v41 = vrot.slane %v3434_v21, 6 }
 0x8d9   :  { %734 = vrot.lane.b32.xlu1 %v733_v41, %s3099_s6 }
 0x941   :  { %v730_v35 = vpop.permute.xlu0 %729 }
 0x942   :  { %732 = vst.msk [vmem:[#allocation3 + $0x8] sm:$0x3] %vm285_vm9, %v730_v35  ;;  %2708 = vmatmul.msk.f32.vlgmr.msra.gmra.mxu1 %vm90_vm0, %v730_v35 }
 0x94b   :  { %v735_v42 = vpop.permute.xlu1 %734 }
 0x94c   :  { %2707 = vmatmul.msk.f32.vlgmr.msra.gmra.mxu0 %vm90_vm0, %v735_v42 }
 0x9bf   :  { %v778_v43 = vpop.f32.mrf.mxu1 }
 0x9c0   :  { %v782_v9 = vrot.slane %v778_v43, 2 }
 0x9c2   :  { %v784_v11 = vadd.f32 %v782_v9, %v3443_v44 }
 0x9c4   :  { %2849 = vtanh.f32 %v784_v11  ;;  %v2710_v12 = vmul.f32 -1.442695, %v784_v11 }
 0x9c9   :  { %v755_v45 = vpop.f32.mrf.mxu0 }
 0x9ca   :  { %v2850_v46 = vpop.eup %2849  ;;  %v758_v14 = vadd.f32 %v755_v45, %v3305_v22 }
 0x9cb   :  { %850 = vrot.lane.b32.xlu2 %v2850_v46, %s3098_s3 }
 0x9cc   :  { %2851 = vtanh.f32 %v758_v14  ;;  %v2709_v25 = vmul.f32 -1.442695, %v758_v14 }
 0x9cd   :  { %2853 = vpow2.f32 %v2710_v12 }
 0x9d2   :  { %v2852_v10 = vpop.eup %2851 }
 0x9d3   :  { %810 = vrot.lane.b32.xlu0 %v2852_v10, %s3098_s3  ;;  %v2854_v15 = vpop.eup %2853 }
 0x9d4   :  { %v828_v16 = vadd.f32 1.0, %v2854_v15 }
 0x9d6   :  { %2855 = vrcp.f32 %v828_v16  ;;  %v840_v49 = vand.u32 2147483648, %v828_v16  ;;  %vm834_vm6 = vweird.f32 %v828_v16  ;;  %v838_v50 = vand.u32 2147483647, %v828_v16 }
 0x9d7   :  { %2857 = vpow2.f32 %v2709_v25 }
 0x9d8   :  { %v841_v52 = vor.u32 1.1754944e-38, %v840_v49  ;;  %vm839_vm8 = vcmp.eq.f32.partialorder %v838_v50, 8.507059e+37 }
 0x9dc   :  { %v2856_v23 = vpop.eup %2855 }
 0x9dd   :  { %v830_v34 = vmul.f32 %v2856_v23, %v828_v16  ;;  %vm835_vm5 = vweird.f32 %v2856_v23  ;;  %v2858_v29 = vpop.eup %2857 }
 0x9de   :  { %vm836_vm7 = vmor %vm834_vm6, %vm835_vm5  ;;  %v788_v53 = vadd.f32 1.0, %v2858_v29 }
 0x9df   :  { %v831_v17 = vsub.f32 1.0, %v830_v34 }
 0x9e0   :  { %2859 = vrcp.f32 %v788_v53  ;;  %v800_v62 = vand.u32 2147483648, %v788_v53  ;;  %vm794_vm11 = vweird.f32 %v788_v53  ;;  %v798_v63 = vand.u32 2147483647, %v788_v53 }
 0x9e1   :  { %v832_v47 = vmul.f32 %v2856_v23, %v831_v17 }
 0x9e2   :  { %v801_v1 = vor.u32 1.1754944e-38, %v800_v62  ;;  %vm799_vm13 = vcmp.eq.f32.partialorder %v798_v63, 8.507059e+37 }
 0x9e3   :  { %v833_v48 = vadd.f32 %v2856_v23, %v832_v47 }
 0x9e5   :  { %v837_v51 = vsel %vm836_vm7, %v2856_v23, %v833_v48 }
 0x9e6   :  { %v842_v54 = vsel %vm839_vm8, %v841_v52, %v837_v51  ;;  %v2860_v57 = vpop.eup %2859 }
 0x9e7   :  { %v790_v58 = vmul.f32 %v2860_v57, %v788_v53  ;;  %vm795_vm10 = vweird.f32 %v2860_v57  ;;  %v848_v19 = vmul.f32 %v846_v8, %v842_v54 }
 0x9e8   :  { %vm796_vm12 = vmor %vm794_vm11, %vm795_vm10 }
 0x9e9   :  { %v791_v59 = vsub.f32 1.0, %v790_v58 }
 0x9eb   :  { %v792_v60 = vmul.f32 %v2860_v57, %v791_v59 }
 0x9ed   :  { %v793_v61 = vadd.f32 %v2860_v57, %v792_v60 }
 0x9ef   :  { %v797_v0 = vsel %vm796_vm12, %v2860_v57, %v793_v61 }
 0x9f0   :  { %v802_v4 = vsel %vm799_vm13, %v801_v1, %v797_v0 }
 0x9f1   :  { %v808_v28 = vmul.f32 %v806_v26, %v802_v4 }
 0xa25   :  { %v851_v55 = vpop.permute.xlu2 %850 }
 0xa26   :  { %v853_v56 = vmul.f32 %v851_v55, %v842_v54 }
 0xa28   :  { %855 = vrot.lane.b32.xlu1 %v853_v56, %s3099_s6 }
 0xa45   :  { %v811_v3 = vpop.permute.xlu0 %810 }
 0xa46   :  { %v813_v5 = vmul.f32 %v811_v3, %v802_v4 }
 0xa48   :  { %815 = vrot.lane.b32.xlu2 %v813_v5, %s3099_s6 }
 0xa9a   :  { %v856_v20 = vpop.permute.xlu1 %855 }
 0xa9b   :  { %v3452_v24 = vadd.f32 %v856_v20, %v848_v19 }
 0xa9d   :  { %2861 = vtanh.f32 %v3452_v24  ;;  %v991_v8 = vrot.slane %v3452_v24, 2 }
 0xaa2   :  { %v816_v31 = vpop.permute.xlu2 %815 }
 0xaa3   :  { %v2862_v32 = vpop.eup %2861  ;;  %v3456_v33 = vadd.f32 %v816_v31, %v808_v28 }
 0xaa4   :  { %861 = vrot.lane.b32.xlu0 %v2862_v32, %s3098_s3 }
 0xaa5   :  { %2863 = vtanh.f32 %v3456_v33  ;;  %v951_v28 = vrot.slane %v3456_v33, 6 }
 0xaab   :  { %v2864_v37 = vpop.eup %2863 }
 0xaac   :  { %821 = vrot.lane.b32.xlu1 %v2864_v37, %s3098_s3 }
 0xb16   :  { %v862_v2 = vpop.permute.xlu0 %861 }
 0xb17   :  { %v3461_v6 = vmul.f32 %v862_v2, %v842_v54 }
 0xb19   :  { %v901_v7 = vrot.slane %v3461_v6, 6 }
 0xb1b   :  { %902 = vrot.lane.b32.xlu2 %v901_v7, %s3099_s6 }
 0xb1e   :  { %v822_v36 = vpop.permute.xlu1 %821 }
 0xb1f   :  { %v824_v39 = vmul.f32 %v822_v36, %v802_v4 }
 0xb21   :  { %866 = vrot.lane.b32.xlu0 %v824_v39, %s3099_s6 }
 0xb75   :  { %v903_v41 = vpop.permute.xlu2 %902 }
 0xb76   :  { %2712 = vmatmul.msk.f32.vlgmr.msra.gmra.mxu3 %vm90_vm0, %v903_v41 }
 0xb93   :  { %v867_v35 = vpop.permute.xlu0 %866 }
 0xb94   :  { %869 = vst.msk [vmem:[#allocation2 + $0x8] sm:$0x3] %vm285_vm9, %v867_v35  ;;  %2711 = vmatmul.msk.f32.vlgmr.msra.gmra.mxu2 %vm90_vm0, %v867_v35 }
 0xbf9   :  { %v923_v42 = vpop.f32.mrf.mxu3 }
 0xbfa   :  { %v927_v43 = vrot.slane %v923_v42, 4 }
 0xbfc   :  { %v929_v9 = vadd.f32 %v927_v43, %v3443_v44 }
 0xbfe   :  { %2865 = vtanh.f32 %v929_v9  ;;  %v2714_v12 = vmul.f32 -1.442695, %v929_v9 }
 0xc04   :  { %v2866_v11 = vpop.eup %2865 }
 0xc05   :  { %995 = vrot.lane.b32.xlu1 %v2866_v11, %s3098_s3 }
 0xc17   :  { %v894_v45 = vpop.f32.mrf.mxu2 }
 0xc18   :  { %v898_v46 = vrot.slane %v894_v45, 6 }
 0xc1a   :  { %v900_v14 = vadd.f32 %v898_v46, %v3305_v22 }
 0xc1c   :  { %2867 = vtanh.f32 %v900_v14  ;;  %v2713_v15 = vmul.f32 -1.442695, %v900_v14 }
 0xc1d   :  { %2869 = vpow2.f32 %v2714_v12 }
 0xc1e   :  { %2871 = vpow2.f32 %v2713_v15 }
 0xc22   :  { %v2868_v10 = vpop.eup %2867 }
 0xc23   :  { %955 = vrot.lane.b32.xlu2 %v2868_v10, %s3098_s3  ;;  %v2870_v16 = vpop.eup %2869 }
 0xc24   :  { %v973_v23 = vadd.f32 1.0, %v2870_v16  ;;  %v2872_v34 = vpop.eup %2871 }
 0xc25   :  { %v933_v17 = vadd.f32 1.0, %v2872_v34 }
 0xc26   :  { %2873 = vrcp.f32 %v973_v23  ;;  %v985_v53 = vand.u32 2147483648, %v973_v23  ;;  %vm979_vm15 = vweird.f32 %v973_v23  ;;  %v983_v54 = vand.u32 2147483647, %v973_v23 }
 0xc27   :  { %2875 = vrcp.f32 %v933_v17  ;;  %v945_v61 = vand.u32 2147483648, %v933_v17  ;;  %vm939_vm4 = vweird.f32 %v933_v17  ;;  %v943_v63 = vand.u32 2147483647, %v933_v17 }
 0xc28   :  { %v986_v57 = vor.u32 1.1754944e-38, %v985_v53  ;;  %vm984_vm2 = vcmp.eq.f32.partialorder %v983_v54, 8.507059e+37 }
 0xc29   :  { %v946_v1 = vor.u32 1.1754944e-38, %v945_v61  ;;  %vm944_vm6 = vcmp.eq.f32.partialorder %v943_v63, 8.507059e+37 }
 0xc2c   :  { %v2874_v25 = vpop.eup %2873 }
 0xc2d   :  { %v975_v47 = vmul.f32 %v2874_v25, %v973_v23  ;;  %v2876_v48 = vpop.eup %2875  ;;  %vm980_vm14 = vweird.f32 %v2874_v25 }
 0xc2e   :  { %v935_v50 = vmul.f32 %v2876_v48, %v933_v17  ;;  %vm981_vm1 = vmor %vm979_vm15, %vm980_vm14  ;;  %vm940_vm3 = vweird.f32 %v2876_v48 }
 0xc2f   :  { %v976_v49 = vsub.f32 1.0, %v975_v47  ;;  %vm941_vm5 = vmor %vm939_vm4, %vm940_vm3 }
 0xc30   :  { %v936_v51 = vsub.f32 1.0, %v935_v50 }
 0xc31   :  { %v977_v29 = vmul.f32 %v2874_v25, %v976_v49 }
 0xc32   :  { %v937_v55 = vmul.f32 %v2876_v48, %v936_v51 }
 0xc33   :  { %v978_v52 = vadd.f32 %v2874_v25, %v977_v29 }
 0xc34   :  { %v938_v58 = vadd.f32 %v2876_v48, %v937_v55 }
 0xc35   :  { %v982_v56 = vsel %vm981_vm1, %v2874_v25, %v978_v52 }
 0xc36   :  { %v987_v60 = vsel %vm984_vm2, %v986_v57, %v982_v56  ;;  %v942_v0 = vsel %vm941_vm5, %v2876_v48, %v938_v58 }
 0xc37   :  { %v947_v3 = vsel %vm944_vm6, %v946_v1, %v942_v0  ;;  %v993_v19 = vmul.f32 %v991_v8, %v987_v60 }
 0xc38   :  { %v953_v31 = vmul.f32 %v951_v28, %v947_v3 }
 0xc77   :  { %v996_v59 = vpop.permute.xlu1 %995 }
 0xc78   :  { %v998_v62 = vmul.f32 %v996_v59, %v987_v60 }
 0xc7a   :  { %1000 = vrot.lane.b32.xlu0 %v998_v62, %s3099_s6 }
 0xc7d   :  { %v956_v4 = vpop.permute.xlu2 %955 }
 0xc7e   :  { %v958_v5 = vmul.f32 %v956_v4, %v947_v3 }
 0xc80   :  { %960 = vrot.lane.b32.xlu1 %v958_v5, %s3099_s6 }
 0xcec   :  { %v1001_v20 = vpop.permute.xlu0 %1000 }
 0xced   :  { %v3476_v26 = vadd.f32 %v1001_v20, %v993_v19 }
 0xcef   :  { %2877 = vtanh.f32 %v3476_v26  ;;  %v1139_v20 = vrot.slane %v3476_v26, 2 }
 0xcf2   :  { %v961_v32 = vpop.permute.xlu1 %960 }
 0xcf3   :  { %v3480_v37 = vadd.f32 %v961_v32, %v953_v31 }
 0xcf5   :  { %v2878_v2 = vpop.eup %2877  ;;  %2879 = vtanh.f32 %v3480_v37 }
 0xcf6   :  { %1006 = vrot.lane.b32.xlu2 %v2878_v2, %s3098_s3 }
 0xcfb   :  { %v2880_v7 = vpop.eup %2879 }
 0xcfc   :  { %966 = vrot.lane.b32.xlu0 %v2880_v7, %s3098_s3  ;;  %v1099_v7 = vrot.slane %v3480_v37, 6 }
 0xd50   :  { %v1007_v24 = vpop.permute.xlu2 %1006 }
 0xd51   :  { %v3485_v36 = vmul.f32 %v1007_v24, %v987_v60 }
 0xd53   :  { %v1049_v39 = vrot.slane %v3485_v36, 4 }
 0xd55   :  { %1050 = vrot.lane.b32.xlu1 %v1049_v39, %s3099_s6 }
 0xd6e   :  { %v967_v33 = vpop.permute.xlu0 %966 }
 0xd6f   :  { %v3489_v41 = vmul.f32 %v967_v33, %v947_v3 }
 0xd71   :  { %v1020_v35 = vrot.slane %v3489_v41, 2 }
 0xd73   :  { %1021 = vrot.lane.b32.xlu2 %v1020_v35, %s3099_s6 }
 0xdc7   :  { %v1051_v42 = vpop.permute.xlu1 %1050 }
 0xdc8   :  { %2716 = vmatmul.msk.f32.vlgmr.msrb.gmra.mxu1 %vm90_vm0, %v1051_v42 }
 0xdcd   :  { %v1022_v43 = vpop.permute.xlu2 %1021 }
 0xdce   :  { %2715 = vmatmul.msk.f32.vlgmr.msrb.gmra.mxu0 %vm90_vm0, %v1022_v43 }
 0xe45   :  { %v1071_v9 = vpop.f32.mrf.mxu1 }
 0xe46   :  { %v1075_v11 = vrot.slane %v1071_v9, 6 }
 0xe48   :  { %v1077_v45 = vadd.f32 %v1075_v11, %v3443_v44 }
 0xe4a   :  { %2881 = vtanh.f32 %v1077_v45  ;;  %v2718_v16 = vmul.f32 -1.442695, %v1077_v45 }
 0xe4b   :  { %v1042_v46 = vpop.f32.mrf.mxu0 }
 0xe4c   :  { %v1046_v14 = vrot.slane %v1042_v46, 4 }
 0xe4e   :  { %v1048_v10 = vadd.f32 %v1046_v14, %v3305_v22 }
 0xe50   :  { %v2882_v12 = vpop.eup %2881  ;;  %2883 = vtanh.f32 %v1048_v10  ;;  %v2717_v23 = vmul.f32 -1.442695, %v1048_v10 }
 0xe51   :  { %1143 = vrot.lane.b32.xlu0 %v2882_v12, %s3098_s3  ;;  %2885 = vpow2.f32 %v2718_v16 }
 0xe52   :  { %2887 = vpow2.f32 %v2717_v23 }
 0xe56   :  { %v2884_v15 = vpop.eup %2883 }
 0xe57   :  { %1103 = vrot.lane.b32.xlu1 %v2884_v15, %s3098_s3  ;;  %v2886_v34 = vpop.eup %2885 }
 0xe58   :  { %v1121_v17 = vadd.f32 1.0, %v2886_v34  ;;  %v2888_v25 = vpop.eup %2887 }
 0xe59   :  { %v1081_v47 = vadd.f32 1.0, %v2888_v25 }
 0xe5a   :  { %2889 = vrcp.f32 %v1121_v17  ;;  %v1133_v55 = vand.u32 2147483648, %v1121_v17  ;;  %vm1127_vm8 = vweird.f32 %v1121_v17  ;;  %v1131_v56 = vand.u32 2147483647, %v1121_v17 }
 0xe5b   :  { %2891 = vrcp.f32 %v1081_v47  ;;  %v1093_v63 = vand.u32 2147483648, %v1081_v47  ;;  %vm1087_vm13 = vweird.f32 %v1081_v47  ;;  %v1091_v1 = vand.u32 2147483647, %v1081_v47 }
 0xe5c   :  { %v1134_v59 = vor.u32 1.1754944e-38, %v1133_v55  ;;  %vm1132_vm11 = vcmp.eq.f32.partialorder %v1131_v56, 8.507059e+37 }
 0xe5d   :  { %v1094_v4 = vor.u32 1.1754944e-38, %v1093_v63  ;;  %vm1092_vm15 = vcmp.eq.f32.partialorder %v1091_v1, 8.507059e+37 }
 0xe60   :  { %v2890_v48 = vpop.eup %2889 }
 0xe61   :  { %v1123_v49 = vmul.f32 %v2890_v48, %v1121_v17  ;;  %v2892_v50 = vpop.eup %2891  ;;  %vm1128_vm7 = vweird.f32 %v2890_v48 }
 0xe62   :  { %v1083_v51 = vmul.f32 %v2892_v50, %v1081_v47  ;;  %vm1129_vm10 = vmor %vm1127_vm8, %vm1128_vm7  ;;  %vm1088_vm12 = vweird.f32 %v2892_v50 }
 0xe63   :  { %v1124_v29 = vsub.f32 1.0, %v1123_v49  ;;  %vm1089_vm14 = vmor %vm1087_vm13, %vm1088_vm12  ;;  %vm438_vm12 = vcmask 259076  }
 0xe64   :  { %v1084_v53 = vsub.f32 1.0, %v1083_v51 }
 0xe65   :  { %v1125_v52 = vmul.f32 %v2890_v48, %v1124_v29 }
 0xe66   :  { %v1085_v57 = vmul.f32 %v2892_v50, %v1084_v53 }
 0xe67   :  { %v1126_v54 = vadd.f32 %v2890_v48, %v1125_v52 }
 0xe68   :  { %v1086_v60 = vadd.f32 %v2892_v50, %v1085_v57 }
 0xe69   :  { %v1130_v58 = vsel %vm1129_vm10, %v2890_v48, %v1126_v54  ;;  %vm432_vm10 = vcmask 257026  }
 0xe6a   :  { %v1135_v62 = vsel %vm1132_vm11, %v1134_v59, %v1130_v58  ;;  %v1090_v3 = vsel %vm1089_vm14, %v2892_v50, %v1086_v60  ;;  %vm291_vm11 = vcmask 261126  }
 0xe6b   :  { %v1095_v8 = vsel %vm1092_vm15, %v1094_v4, %v1090_v3  ;;  %v1141_v28 = vmul.f32 %v1139_v20, %v1135_v62 }
 0xe6c   :  { %v1101_v24 = vmul.f32 %v1099_v7, %v1095_v8 }
 0xec3   :  { %v1144_v61 = vpop.permute.xlu0 %1143 }
 0xec4   :  { %v1146_v0 = vmul.f32 %v1144_v61, %v1135_v62 }
 0xec6   :  { %1148 = vrot.lane.b32.xlu2 %v1146_v0, %s3099_s6 }
 0xec9   :  { %v1104_v5 = vpop.permute.xlu1 %1103 }
 0xeca   :  { %v1106_v19 = vmul.f32 %v1104_v5, %v1095_v8 }
 0xecc   :  { %1108 = vrot.lane.b32.xlu0 %v1106_v19, %s3099_s6 }
 0xf20   :  { %v1149_v31 = vpop.permute.xlu2 %1148 }
 0xf21   :  { %v3502_v32 = vadd.f32 %v1149_v31, %v1141_v28 }
 0xf23   :  { %2893 = vtanh.f32 %v3502_v32  ;;  %v1284_v28 = vrot.slane %v3502_v32, 2 }
 0xf29   :  { %v2894_v2 = vpop.eup %2893 }
 0xf2a   :  { %1154 = vrot.lane.b32.xlu1 %v2894_v2, %s3098_s3 }
 0xf3e   :  { %v1109_v39 = vpop.permute.xlu0 %1108 }
 0xf3f   :  { %v3507_v33 = vadd.f32 %v1109_v39, %v1101_v24 }
 0xf41   :  { %2895 = vtanh.f32 %v3507_v33  ;;  %v1244_v24 = vrot.slane %v3507_v33, 6  ;;  %v1317_v33 = vld [vmem:[%s3999_s7] sm:$0xff] }
 0xf47   :  { %v2896_v35 = vpop.eup %2895 }
 0xf48   :  { %1114 = vrot.lane.b32.xlu2 %v2896_v35, %s3098_s3 }
 0xf9c   :  { %v1155_v26 = vpop.permute.xlu1 %1154 }
 0xf9d   :  { %v3511_v42 = vmul.f32 %v1155_v26, %v1135_v62 }
 0xf9f   :  { %v1197_v43 = vrot.slane %v3511_v42, 2 }
 0xfa1   :  { %1198 = vrot.lane.b32.xlu0 %v1197_v43, %s3099_s6 }
 0xfa2   :  { %v1115_v9 = vpop.permute.xlu2 %1114 }
 0xfa3   :  { %v3515_v11 = vmul.f32 %v1115_v9, %v1095_v8 }
 0xfa5   :  { %v1168_v37 = vrot.slane %v3515_v11, 4 }
 0xfa7   :  { %1169 = vrot.lane.b32.xlu1 %v1168_v37, %s3099_s6 }
0x1013   :  { %v1199_v45 = vpop.permute.xlu0 %1198 }
0x1014   :  { %2720 = vmatmul.msk.f32.vlgmr.msrb.gmra.mxu3 %vm90_vm0, %v1199_v45 }
0x1019   :  { %v1170_v46 = vpop.permute.xlu1 %1169 }
0x101a   :  { %2719 = vmatmul.msk.f32.vlgmr.msrb.gmra.mxu2 %vm90_vm0, %v1170_v46 }
0x1097   :  { %v1219_v14 = vpop.f32.mrf.mxu3 }
0x1098   :  { %v1222_v10 = vadd.f32 %v1219_v14, %v3443_v44 }
0x109a   :  { %2897 = vtanh.f32 %v1222_v10  ;;  %v2722_v17 = vmul.f32 -1.442695, %v1222_v10 }
0x109d   :  { %v1190_v12 = vpop.f32.mrf.mxu2 }
0x109e   :  { %v1194_v15 = vrot.slane %v1190_v12, 2 }
0x10a0   :  { %v2898_v16 = vpop.eup %2897  ;;  %v1196_v23 = vadd.f32 %v1194_v15, %v3305_v22 }
0x10a1   :  { %1288 = vrot.lane.b32.xlu2 %v2898_v16, %s3098_s3 }
0x10a2   :  { %2899 = vtanh.f32 %v1196_v23  ;;  %v2721_v50 = vmul.f32 -1.442695, %v1196_v23 }
0x10a3   :  { %2901 = vpow2.f32 %v2722_v17 }
0x10a8   :  { %v2900_v34 = vpop.eup %2899 }
0x10a9   :  { %1248 = vrot.lane.b32.xlu0 %v2900_v34, %s3098_s3  ;;  %v2902_v25 = vpop.eup %2901 }
0x10aa   :  { %v1266_v47 = vadd.f32 1.0, %v2902_v25  ;;  %v1396_v25 = vld [vmem:[%s4002_s10 + $0x38] sm:$0xff] }
0x10ab   :  { %1409 = vmatpush.msra.mxu2 %v1396_v25 }
0x10ac   :  { %2903 = vrcp.f32 %v1266_v47  ;;  %v1278_v22 = vand.u32 2147483648, %v1266_v47  ;;  %vm1272_vm2 = vweird.f32 %v1266_v47  ;;  %v1276_v52 = vand.u32 2147483647, %v1266_v47 }
0x10ad   :  { %2905 = vpow2.f32 %v2721_v50  ;;  %v1322_v50 = vld [vmem:[%s3999_s7 + $0x28] sm:$0xff] }
0x10ae   :  { %v1279_v55 = vor.u32 1.1754944e-38, %v1278_v22  ;;  %vm1277_vm4 = vcmp.eq.f32.partialorder %v1276_v52, 8.507059e+37  ;;  %v3621_v22 = vld [vmem:[#allocation4 + $0x18] sm:$0xff]  ;;  %v3623_v52 = vld [vmem:[#allocation4 + $0x10] sm:$0xff] }
0x10b2   :  { %v2904_v48 = vpop.eup %2903 }
0x10b3   :  { %v1268_v49 = vmul.f32 %v2904_v48, %v1266_v47  ;;  %vm1273_vm1 = vweird.f32 %v2904_v48  ;;  %v2906_v53 = vpop.eup %2905  ;;  %v1324_v47 = vld [vmem:[%s3999_s7 + $0x38] sm:$0xff] }
0x10b4   :  { %vm1274_vm3 = vmor %vm1272_vm2, %vm1273_vm1  ;;  %v1226_v56 = vadd.f32 1.0, %v2906_v53  ;;  %1343 = vmatpush.msra.mxu0 %v1324_v47  ;;  %v3629_v53 = vld [vmem:[#allocation4 + $0x8] sm:$0xff] }
0x10b5   :  { %v1269_v44 = vsub.f32 1.0, %v1268_v49  ;;  %v1323_v49 = vld [vmem:[%s3999_s7 + $0x30] sm:$0xff] }
0x10b6   :  { %2907 = vrcp.f32 %v1226_v56  ;;  %v1238_v1 = vand.u32 2147483648, %v1226_v56  ;;  %vm1232_vm6 = vweird.f32 %v1226_v56  ;;  %v1236_v3 = vand.u32 2147483647, %v1226_v56  ;;  %1344 = vmatpush.msra.mxu0 %v1323_v49 }
0x10b7   :  { %v1270_v29 = vmul.f32 %v2904_v48, %v1269_v44  ;;  %v1394_v44 = vld [vmem:[%s4002_s10 + $0x28] sm:$0xff] }
0x10b8   :  { %v1239_v5 = vor.u32 1.1754944e-38, %v1238_v1  ;;  %vm1237_vm8 = vcmp.eq.f32.partialorder %v1236_v3, 8.507059e+37  ;;  %1345 = vmatpush.msra.mxu0 %v1322_v50 }
0x10b9   :  { %v1271_v51 = vadd.f32 %v2904_v48, %v1270_v29  ;;  %v1393_v29 = vld [vmem:[%s4002_s10 + $0x20] sm:$0xff] }
0x10bb   :  { %v1275_v54 = vsel %vm1274_vm3, %v2904_v48, %v1271_v51  ;;  %v1395_v48 = vld [vmem:[%s4002_s10 + $0x30] sm:$0xff]  ;;  %v1321_v51 = vld [vmem:[%s3999_s7 + $0x20] sm:$0xff] }
0x10bc   :  { %v3525_v57 = vsel %vm1277_vm4, %v1279_v55, %v1275_v54  ;;  %v2908_v60 = vpop.eup %2907  ;;  %1410 = vmatpush.msra.mxu2 %v1395_v48  ;;  %1346 = vmatpush.msra.mxu0 %v1321_v51  ;;  %v3634_v54 = vld [vmem:[%s4000_s8 + $0x18] sm:$0xff]  ;;  %v3639_v55 = vld [vmem:[%s4000_s8 + $0x10] sm:$0xff] }
0x10bd   :  { %v1228_v61 = vmul.f32 %v2908_v60, %v1226_v56  ;;  %vm1233_vm5 = vweird.f32 %v2908_v60  ;;  %v1286_v31 = vmul.f32 %v1284_v28, %v3525_v57  ;;  %v3643_v56 = vld [vmem:[#allocation4] sm:$0xff] }
0x10be   :  { %vm1234_vm7 = vmor %vm1232_vm6, %vm1233_vm5  ;;  %1411 = vmatpush.msra.mxu2 %v1394_v44  ;;  %1469 = vmatpush.msrb.mxu0 %v3634_v54 }
0x10bf   :  { %v1229_v62 = vsub.f32 1.0, %v1228_v61 }
0x10c0   :  { %1412 = vmatpush.msra.mxu2 %v1393_v29  ;;  %1470 = vmatpush.msrb.mxu0 %v3639_v55 }
0x10c1   :  { %v1230_v63 = vmul.f32 %v2908_v60, %v1229_v62 }
0x10c2   :  { %1600 = vmatpush.msrb.mxu2 %v3634_v54 }
0x10c3   :  { %v1231_v0 = vadd.f32 %v2908_v60, %v1230_v63 }
0x10c4   :  { %1601 = vmatpush.msrb.mxu2 %v3639_v55 }
0x10c5   :  { %v1235_v4 = vsel %vm1234_vm7, %v2908_v60, %v1231_v0 }
0x10c6   :  { %v1240_v19 = vsel %vm1237_vm8, %v1239_v5, %v1235_v4 }
0x10c7   :  { %v1246_v39 = vmul.f32 %v1244_v24, %v1240_v19 }
0x10fb   :  { %v1289_v58 = vpop.permute.xlu2 %1288 }
0x10fc   :  { %v1291_v59 = vmul.f32 %v1289_v58, %v3525_v57  ;;  %v3657_v58 = vld [vmem:[%s4000_s8] sm:$0xff] }
0x10fe   :  { %1293 = vrot.lane.b32.xlu1 %v1291_v59, %s3099_s6 }
0x111b   :  { %v1249_v8 = vpop.permute.xlu0 %1248 }
0x111c   :  { %v1251_v20 = vmul.f32 %v1249_v8, %v1240_v19 }
0x111e   :  { %1253 = vrot.lane.b32.xlu2 %v1251_v20, %s3099_s6  ;;  %v2782_v20 = vld [vmem:[%s4001_s9] ss:$0 sm:$0xff] }
0x1126   :  { %429 = vrot.lane.b32.xlu2 %v3367_v30, %s3099_s6 }
0x112e   :  { %871 = vrot.lane.b32.xlu2 %v3461_v6, %s3099_s6 }
0x1136   :  { %584 = vrot.lane.b32.xlu2 %v3399_v38, %s3099_s6 }
0x1170   :  { %v1294_v2 = vpop.permute.xlu1 %1293 }
0x1171   :  { %v1296_v7 = vadd.f32 %v1294_v2, %v1286_v31 }
0x1173   :  { %2909 = vtanh.f32 %v1296_v7 }
0x1178   :  { %v1254_v35 = vpop.permute.xlu2 %1253 }
0x1179   :  { %v2910_v26 = vpop.eup %2909  ;;  %v1256_v43 = vadd.f32 %v1254_v35, %v1246_v39 }
0x117a   :  { %1299 = vrot.lane.b32.xlu0 %v2910_v26, %s3098_s3 }
0x117b   :  { %2911 = vtanh.f32 %v1256_v43 }
0x1180   :  { %v430_v30 = vpop.permute.xlu2 %429 }
0x1181   :  { %v2912_v6 = vpop.eup %2911  ;;  %433 = vst.msk [vmem:[#allocation2] sm:$0xc] %vm432_vm10, %v430_v30 }
0x1182   :  { %579 = vrot.lane.b32.xlu0 %v3403_v40, %s3099_s6  ;;  %1259 = vrot.lane.b32.xlu1 %v2912_v6, %s3098_s3  ;;  %v1320_v40 = vld [vmem:[%s3999_s7 + $0x18] sm:$0xff] }
0x1183   :  { %1372 = vmatpush.msra.mxu1 %v1320_v40 }
0x1188   :  { %v872_v38 = vpop.permute.xlu2 %871 }
0x1189   :  { %874 = vst.msk [vmem:[#allocation3] sm:$0xc0] %vm291_vm11, %v872_v38 }
0x118a   :  { %1016 = vrot.lane.b32.xlu0 %v3485_v36, %s3099_s6  ;;  %724 = vrot.lane.b32.xlu1 %v3434_v21, %s3099_s6  ;;  %v1319_v21 = vld [vmem:[%s3999_s7 + $0x10] sm:$0xff]  ;;  %v1318_v36 = vld [vmem:[%s3999_s7 + $0x8] sm:$0xff] }
0x118b   :  { %1373 = vmatpush.msra.mxu1 %v1319_v21 }
0x118d   :  { %1374 = vmatpush.msra.mxu1 %v1318_v36 }
0x118f   :  { %1375 = vmatpush.msra.mxu1 %v1317_v33 }
0x1190   :  { %v585_v32 = vpop.permute.xlu2 %584 }
0x1191   :  { %587 = vst.msk [vmem:[#allocation3 + $0x8] sm:$0xc] %vm432_vm10, %v585_v32  ;;  %1490 = vmatpush.msrb.mxu1 %v3621_v22 }
0x1192   :  { %288 = vrot.lane.b32.xlu0 %v3331_v13, %s3099_s6  ;;  %1164 = vrot.lane.b32.xlu1 %v3511_v42, %s3099_s6  ;;  %v1392_v13 = vld [vmem:[%s4002_s10 + $0x18] sm:$0xff]  ;;  %v1389_v42 = vld [vmem:[%s4002_s10] sm:$0xff] }
0x1193   :  { %1432 = vmatpush.msra.mxu3 %v1392_v13  ;;  %1491 = vmatpush.msrb.mxu1 %v3623_v52 }
0x1195   :  { %1492 = vmatpush.msrb.mxu1 %v3629_v53 }
0x1197   :  { %1493 = vmatpush.msrb.mxu1 %v3643_v56 }
0x119a   :  { %1011 = vrot.lane.b32.xlu0 %v3489_v41, %s3099_s6  ;;  %435 = vrot.lane.b32.xlu1 %v3363_v27, %s3099_s6  ;;  %v1391_v27 = vld [vmem:[%s4002_s10 + $0x10] sm:$0xff]  ;;  %v1390_v41 = vld [vmem:[%s4002_s10 + $0x8] sm:$0xff] }
0x119b   :  { %1433 = vmatpush.msra.mxu3 %v1391_v27 }
0x119d   :  { %1434 = vmatpush.msra.mxu3 %v1390_v41 }
0x119f   :  { %1435 = vmatpush.msra.mxu3 %v1389_v42 }
0x11a1   :  { %1629 = vmatpush.msrb.mxu3 %v3621_v22 }
0x11a2   :  { %1159 = vrot.lane.b32.xlu1 %v3515_v11, %s3099_s6 }
0x11a3   :  { %1630 = vmatpush.msrb.mxu3 %v3623_v52 }
0x11a5   :  { %1631 = vmatpush.msrb.mxu3 %v3629_v53 }
0x11a7   :  { %1632 = vmatpush.msrb.mxu3 %v3643_v56 }
0x11ec   :  { %v1300_v9 = vpop.permute.xlu0 %1299 }
0x11ed   :  { %v1302_v11 = vmul.f32 %v1300_v9, %v3525_v57  ;;  %v3648_v57 = vld [vmem:[%s4000_s8 + $0x8] sm:$0xff] }
0x11ee   :  { %1471 = vmatpush.msrb.mxu0 %v3648_v57  ;;  %1602 = vmatpush.msrb.mxu2 %v3648_v57 }
0x11ef   :  { %1309 = vrot.lane.b32.xlu2 %v1302_v11, %s3099_s6 }
0x11f0   :  { %1472 = vmatpush.msrb.mxu0 %v3657_v58  ;;  %1603 = vmatpush.msrb.mxu2 %v3657_v58 }
0x11f4   :  { %v580_v37 = vpop.permute.xlu0 %579  ;;  %v1260_v45 = vpop.permute.xlu1 %1259 }
0x11f5   :  { %582 = vst.msk [vmem:[#allocation2] sm:$0x30] %vm438_vm12, %v580_v37  ;;  %v1262_v46 = vmul.f32 %v1260_v45, %v1240_v19 }
0x11f7   :  { %1304 = vrot.lane.b32.xlu2 %v1262_v46, %s3099_s6 }
0x11fc   :  { %v1017_v14 = vpop.permute.xlu0 %1016  ;;  %v725_v10 = vpop.permute.xlu1 %724 }
0x11fd   :  { %1019 = vst.msk [vmem:[#allocation3] sm:$0x30] %vm438_vm12, %v1017_v14 }
0x11fe   :  { %727 = vst.msk [vmem:[#allocation2] sm:$0xc0] %vm291_vm11, %v725_v10 }
0x1204   :  { %v289_v12 = vpop.permute.xlu0 %288  ;;  %v1165_v15 = vpop.permute.xlu1 %1164 }
0x1205   :  { %292 = vst.msk [vmem:[#allocation3 + $0x8] sm:$0xc0] %vm291_vm11, %v289_v12  ;;  %v1313_v16 = vld [vmem:[#allocation2] sm:$0xff] }
0x1206   :  { %1167 = vst.msk [vmem:[#allocation3] sm:$0xc] %vm432_vm10, %v1165_v15  ;;  %2725 = vmatmul.msk.f32.vlgmr.msra.gmra.mxu1 %vm90_vm0, %v1313_v16  ;;  %2729 = vmatmul.msk.f32.vlgmr.msra.gmra.mxu3 %vm90_vm0, %v1313_v16 }
0x1207   :  { %1777 = vmatpush.msra.mxu1 %v3621_v22  ;;  %1925 = vmatpush.msra.mxu3 %v3621_v22 }
0x1209   :  { %1778 = vmatpush.msra.mxu1 %v3623_v52  ;;  %1926 = vmatpush.msra.mxu3 %v3623_v52 }
0x120b   :  { %1779 = vmatpush.msra.mxu1 %v3629_v53  ;;  %1927 = vmatpush.msra.mxu3 %v3629_v53 }
0x120c   :  { %v1012_v23 = vpop.permute.xlu0 %1011  ;;  %v436_v34 = vpop.permute.xlu1 %435 }
0x120d   :  { %1014 = vst.msk [vmem:[#allocation2 + $0x8] sm:$0xc] %vm432_vm10, %v1012_v23  ;;  %1780 = vmatpush.msra.mxu1 %v3643_v56  ;;  %1928 = vmatpush.msra.mxu3 %v3643_v56 }
0x120e   :  { %439 = vst.msk [vmem:[#allocation3 + $0x8] sm:$0x30] %vm438_vm12, %v436_v34 }
0x1214   :  { %v1160_v17 = vpop.permute.xlu1 %1159 }
0x1215   :  { %1162 = vst.msk [vmem:[#allocation2 + $0x8] sm:$0x30] %vm438_vm12, %v1160_v17  ;;  %v1316_v62 = vld [vmem:[#allocation3 + $0x8] sm:$0xff] }
0x1249   :  { %v1310_v59 = vpop.permute.xlu2 %1309 }
0x124a   :  { %1312 = vst.msk [vmem:[#allocation3] sm:$0x3] %vm285_vm9, %v1310_v59 }
0x1251   :  { %v1305_v60 = vpop.permute.xlu2 %1304  ;;  %v1315_v61 = vld [vmem:[#allocation3] sm:$0xff] }
0x1252   :  { %1307 = vst.msk [vmem:[#allocation2 + $0x8] sm:$0xc0] %vm291_vm11, %v1305_v60  ;;  %2723 = vmatmul.msk.f32.vlgmr.msra.gmra.mxu0 %vm90_vm0, %v1315_v61  ;;  %2727 = vmatmul.msk.f32.vlgmr.msra.gmra.mxu2 %vm90_vm0, %v1315_v61 }
0x1253   :  { %1748 = vmatpush.msra.mxu0 %v3634_v54  ;;  %1896 = vmatpush.msra.mxu2 %v3634_v54 }
0x1255   :  { %1749 = vmatpush.msra.mxu0 %v3639_v55  ;;  %1897 = vmatpush.msra.mxu2 %v3639_v55 }
0x1257   :  { %1750 = vmatpush.msra.mxu0 %v3648_v57  ;;  %1898 = vmatpush.msra.mxu2 %v3648_v57 }
0x1259   :  { %v1314_v63 = vld [vmem:[#allocation2 + $0x8] sm:$0xff]  ;;  %1751 = vmatpush.msra.mxu0 %v3657_v58  ;;  %1899 = vmatpush.msra.mxu2 %v3657_v58 }
0x125a   :  { %2724 = vmatmul.msk.f32.gmra.mxu0 %vm90_vm0, %v1316_v62  ;;  %2726 = vmatmul.msk.f32.gmra.mxu1 %vm90_vm0, %v1314_v63 }
0x125b   :  { %2728 = vmatmul.msk.f32.gmra.mxu2 %vm90_vm0, %v1316_v62  ;;  %2730 = vmatmul.msk.f32.gmra.mxu3 %vm90_vm0, %v1314_v63 }
0x1262   :  { %1473 = vmatmul.f32.vlgmr.msrb.gmra.mxu0 %v3097_v18  ;;  %1494 = vmatmul.f32.vlgmr.msrb.gmra.mxu1 %v3097_v18  ;;  %v2783_v18 = vld [vmem:[%s4004_s12] ss:$0 sm:$0xff] }
0x1263   :  { %2064 = vmatpush.msrb.mxu1 %v3621_v22  ;;  %2041 = vmatpush.msrb.mxu0 %v3634_v54 }
0x1265   :  { %2065 = vmatpush.msrb.mxu1 %v3623_v52  ;;  %2042 = vmatpush.msrb.mxu0 %v3639_v55 }
0x1267   :  { %2066 = vmatpush.msrb.mxu1 %v3629_v53  ;;  %2043 = vmatpush.msrb.mxu0 %v3648_v57 }
0x1269   :  { %2067 = vmatpush.msrb.mxu1 %v3643_v56  ;;  %2044 = vmatpush.msrb.mxu0 %v3657_v58 }
0x1283   :  { %v1377_v0 = vpop.f32.mrf.mxu1 }
0x1289   :  { %v1437_v3 = vpop.f32.mrf.mxu3 }
0x12cf   :  { %v1348_v1 = vpop.f32.mrf.mxu0 }
0x12d0   :  { %v1378_v2 = vadd.f32 %v1377_v0, %v1348_v1 }
0x12d2   :  { %v3709_v24 = vadd.f32 %v2782_v20, %v1378_v2 }
0x12d5   :  { %v1414_v4 = vpop.f32.mrf.mxu2 }
0x12d6   :  { %v1438_v5 = vadd.f32 %v1437_v3, %v1414_v4 }
0x12d7   :  { %v1351_v8 = vpop.f32.mrf.mxu0  ;;  %v1380_v19 = vpop.f32.mrf.mxu1 }
0x12d8   :  { %v3705_v28 = vadd.f32 %v2783_v18, %v1438_v5  ;;  %v1381_v31 = vadd.f32 %v1380_v19, %v1351_v8 }
0x12da   :  { %v3707_v7 = vadd.f32 %v2782_v20, %v1381_v31 }
0x12de   :  { %v1417_v39 = vpop.f32.mrf.mxu2  ;;  %v1440_v35 = vpop.f32.mrf.mxu3 }
0x12df   :  { %v1441_v26 = vadd.f32 %v1440_v35, %v1417_v39  ;;  %v1474_v43 = vpop.f32.mrf.mxu0  ;;  %v1495_v30 = vpop.f32.mrf.mxu1 }
0x12e0   :  { %v1477_v6 = vadd.f32 %v1474_v43, %v3709_v24  ;;  %v1499_v38 = vrot.slane %v1495_v30, 2 }
0x12e1   :  { %v3712_v32 = vadd.f32 %v2783_v18, %v1441_v26 }
0x12e2   :  { %2913 = vtanh.f32 %v1477_v6  ;;  %v2731_v27 = vmul.f32 -1.442695, %v1477_v6 }
0x12e3   :  { %v1501_v40 = vadd.f32 %v1499_v38, %v3712_v32 }
0x12e5   :  { %2915 = vtanh.f32 %v1501_v40  ;;  %v2732_v36 = vmul.f32 -1.442695, %v1501_v40 }
0x12e6   :  { %2917 = vpow2.f32 %v2731_v27 }
0x12e7   :  { %2919 = vpow2.f32 %v2732_v36 }
0x12e8   :  { %v2914_v13 = vpop.eup %2913 }
0x12e9   :  { %1524 = vrot.lane.b32.xlu1 %v2914_v13, %s3098_s3 }
0x12eb   :  { %v2916_v21 = vpop.eup %2915 }
0x12ec   :  { %1561 = vrot.lane.b32.xlu0 %v2916_v21, %s3098_s3  ;;  %v2918_v41 = vpop.eup %2917 }
0x12ed   :  { %v2920_v33 = vpop.eup %2919  ;;  %v1505_v42 = vadd.f32 1.0, %v2918_v41 }
0x12ee   :  { %v1542_v9 = vadd.f32 1.0, %v2920_v33 }
0x12ef   :  { %2921 = vrcp.f32 %v1505_v42  ;;  %v1517_v23 = vand.u32 2147483648, %v1505_v42  ;;  %vm1511_vm14 = vweird.f32 %v1505_v42  ;;  %v1515_v34 = vand.u32 2147483647, %v1505_v42 }
0x12f0   :  { %2923 = vrcp.f32 %v1542_v9  ;;  %v1554_v47 = vand.u32 2147483648, %v1542_v9  ;;  %vm1548_vm2 = vweird.f32 %v1542_v9  ;;  %v1552_v49 = vand.u32 2147483647, %v1542_v9 }
0x12f1   :  { %v1518_v48 = vor.u32 1.1754944e-38, %v1517_v23  ;;  %vm1516_vm3 = vcmp.eq.f32.partialorder %v1515_v34, 8.507059e+37 }
0x12f2   :  { %v1555_v59 = vor.u32 1.1754944e-38, %v1554_v47  ;;  %vm1553_vm5 = vcmp.eq.f32.partialorder %v1552_v49, 8.507059e+37 }
0x12f5   :  { %v2922_v11 = vpop.eup %2921 }
0x12f6   :  { %v2924_v37 = vpop.eup %2923  ;;  %v1507_v45 = vmul.f32 %v2922_v11, %v1505_v42  ;;  %vm1512_vm13 = vweird.f32 %v2922_v11 }
0x12f7   :  { %v1544_v46 = vmul.f32 %v2924_v37, %v1542_v9  ;;  %vm1513_vm15 = vmor %vm1511_vm14, %vm1512_vm13  ;;  %vm1549_vm1 = vweird.f32 %v2924_v37 }
0x12f8   :  { %v1508_v14 = vsub.f32 1.0, %v1507_v45  ;;  %vm1550_vm4 = vmor %vm1548_vm2, %vm1549_vm1 }
0x12f9   :  { %v1545_v10 = vsub.f32 1.0, %v1544_v46 }
0x12fa   :  { %v1509_v12 = vmul.f32 %v2922_v11, %v1508_v14 }
0x12fb   :  { %v1546_v15 = vmul.f32 %v2924_v37, %v1545_v10 }
0x12fc   :  { %v1510_v16 = vadd.f32 %v2922_v11, %v1509_v12 }
0x12fd   :  { %v1547_v17 = vadd.f32 %v2924_v37, %v1546_v15 }
0x12fe   :  { %v1514_v25 = vsel %vm1513_vm15, %v2922_v11, %v1510_v16 }
0x12ff   :  { %v1519_v50 = vsel %vm1516_vm3, %v1518_v48, %v1514_v25  ;;  %v1551_v29 = vsel %vm1550_vm4, %v2924_v37, %v1547_v17 }
0x1300   :  { %v1556_v61 = vsel %vm1553_vm5, %v1555_v59, %v1551_v29  ;;  %v1522_v3 = vmul.f32 0.0, %v1519_v50 }
0x1301   :  { %v1559_v63 = vmul.f32 0.0, %v1556_v61 }
0x135b   :  { %v1525_v44 = vpop.permute.xlu1 %1524 }
0x135c   :  { %v1527_v51 = vmul.f32 %v1525_v44, %v1519_v50 }
0x135e   :  { %v1562_v60 = vpop.permute.xlu0 %1561  ;;  %1529 = vrot.lane.b32.xlu0 %v1527_v51, %s3099_s6 }
0x135f   :  { %v1564_v62 = vmul.f32 %v1562_v60, %v1556_v61 }
0x1361   :  { %1566 = vrot.lane.b32.xlu2 %v1564_v62, %s3099_s6 }
0x13bb   :  { %v1567_v0 = vpop.permute.xlu2 %1566 }
0x13bc   :  { %v3719_v1 = vadd.f32 %v1567_v0, %v1559_v63 }
0x13be   :  { %2925 = vtanh.f32 %v3719_v1 }
0x13c4   :  { %v2926_v18 = vpop.eup %2925 }
0x13c5   :  { %1572 = vrot.lane.b32.xlu1 %v2926_v18, %s3098_s3 }
0x13d0   :  { %v1530_v4 = vpop.permute.xlu0 %1529 }
0x13d1   :  { %v3723_v5 = vadd.f32 %v1530_v4, %v1522_v3 }
0x13d3   :  { %2927 = vtanh.f32 %v3723_v5  ;;  %v1662_v0 = vrot.slane %v3723_v5, 6 }
0x13d9   :  { %v2928_v8 = vpop.eup %2927 }
0x13da   :  { %1535 = vrot.lane.b32.xlu2 %v2928_v8, %s3098_s3  ;;  %v1702_v8 = vrot.slane %v3719_v1, 2 }
0x1434   :  { %v1536_v19 = vpop.permute.xlu2 %1535 }
0x1435   :  { %v1538_v20 = vmul.f32 %v1536_v19, %v1519_v50 }
0x1437   :  { %v1573_v31 = vpop.permute.xlu1 %1572  ;;  %1577 = vrot.lane.b32.xlu1 %v1538_v20, %s3099_s6 }
0x1438   :  { %v3728_v2 = vmul.f32 %v1573_v31, %v1556_v61 }
0x143a   :  { %v1612_v39 = vrot.slane %v3728_v2, 6 }
0x143c   :  { %1613 = vrot.lane.b32.xlu0 %v1612_v39, %s3099_s6 }
0x14a9   :  { %v1578_v35 = vpop.permute.xlu1 %1577 }
0x14aa   :  { %1580 = vst.msk [vmem:[#allocation2] sm:$0x3] %vm285_vm9, %v1578_v35  ;;  %2733 = vmatmul.msk.f32.vlgmr.msrb.gmra.mxu2 %vm90_vm0, %v1578_v35 }
0x14ab   :  { %2180 = vmatpush.msrb.mxu2 %v3634_v54 }
0x14ad   :  { %2181 = vmatpush.msrb.mxu2 %v3639_v55 }
0x14ae   :  { %v1614_v26 = vpop.permute.xlu0 %1613 }
0x14af   :  { %2734 = vmatmul.msk.f32.vlgmr.msrb.gmra.mxu3 %vm90_vm0, %v1614_v26  ;;  %2182 = vmatpush.msrb.mxu2 %v3648_v57 }
0x14b0   :  { %2209 = vmatpush.msrb.mxu3 %v3621_v22 }
0x14b1   :  { %2183 = vmatpush.msrb.mxu2 %v3657_v58 }
0x14b2   :  { %2210 = vmatpush.msrb.mxu3 %v3623_v52 }
0x14b4   :  { %2211 = vmatpush.msrb.mxu3 %v3629_v53 }
0x14b6   :  { %2212 = vmatpush.msrb.mxu3 %v3643_v56 }
0x152d   :  { %v1605_v43 = vpop.f32.mrf.mxu2 }
0x152e   :  { %v1609_v30 = vrot.slane %v1605_v43, 6 }
0x1530   :  { %v1611_v6 = vadd.f32 %v1609_v30, %v3709_v24 }
0x1532   :  { %2929 = vtanh.f32 %v1611_v6  ;;  %v1634_v38 = vpop.f32.mrf.mxu3  ;;  %v2735_v42 = vmul.f32 -1.442695, %v1611_v6 }
0x1533   :  { %v1638_v40 = vrot.slane %v1634_v38, 4 }
0x1535   :  { %v1640_v13 = vadd.f32 %v1638_v40, %v3712_v32 }
0x1537   :  { %2931 = vtanh.f32 %v1640_v13  ;;  %v2736_v36 = vmul.f32 -1.442695, %v1640_v13 }
0x1538   :  { %v2930_v21 = vpop.eup %2929 }
0x1539   :  { %1666 = vrot.lane.b32.xlu0 %v2930_v21, %s3098_s3  ;;  %2933 = vpow2.f32 %v2736_v36 }
0x153d   :  { %v2932_v27 = vpop.eup %2931 }
0x153e   :  { %1706 = vrot.lane.b32.xlu2 %v2932_v27, %s3098_s3 }
0x153f   :  { %v2934_v41 = vpop.eup %2933 }
0x1540   :  { %v1684_v33 = vadd.f32 1.0, %v2934_v41 }
0x1542   :  { %2935 = vrcp.f32 %v1684_v33  ;;  %v1696_v12 = vand.u32 2147483648, %v1684_v33  ;;  %vm1690_vm7 = vweird.f32 %v1684_v33  ;;  %v1694_v15 = vand.u32 2147483647, %v1684_v33 }
0x1543   :  { %2937 = vpow2.f32 %v2735_v42 }
0x1544   :  { %v1697_v34 = vor.u32 1.1754944e-38, %v1696_v12  ;;  %vm1695_vm13 = vcmp.eq.f32.partialorder %v1694_v15, 8.507059e+37 }
0x1548   :  { %v2936_v9 = vpop.eup %2935 }
0x1549   :  { %v1686_v11 = vmul.f32 %v2936_v9, %v1684_v33  ;;  %v2938_v37 = vpop.eup %2937  ;;  %vm1691_vm6 = vweird.f32 %v2936_v9 }
0x154a   :  { %v1644_v46 = vadd.f32 1.0, %v2938_v37  ;;  %vm1692_vm8 = vmor %vm1690_vm7, %vm1691_vm6 }
0x154b   :  { %v1687_v45 = vsub.f32 1.0, %v1686_v11 }
0x154c   :  { %2939 = vrcp.f32 %v1644_v46  ;;  %v1656_v29 = vand.u32 2147483648, %v1644_v46  ;;  %vm1650_vm15 = vweird.f32 %v1644_v46  ;;  %v1654_v51 = vand.u32 2147483647, %v1644_v46 }
0x154d   :  { %v1688_v14 = vmul.f32 %v2936_v9, %v1687_v45 }
0x154e   :  { %v1657_v60 = vor.u32 1.1754944e-38, %v1656_v29  ;;  %vm1655_vm2 = vcmp.eq.f32.partialorder %v1654_v51, 8.507059e+37 }
0x154f   :  { %v1689_v10 = vadd.f32 %v2936_v9, %v1688_v14 }
0x1551   :  { %v1693_v23 = vsel %vm1692_vm8, %v2936_v9, %v1689_v10 }
0x1552   :  { %v2940_v16 = vpop.eup %2939  ;;  %v1698_v25 = vsel %vm1695_vm13, %v1697_v34, %v1693_v23 }
0x1553   :  { %v1646_v47 = vmul.f32 %v2940_v16, %v1644_v46  ;;  %vm1651_vm14 = vweird.f32 %v2940_v16  ;;  %v1704_v19 = vmul.f32 %v1702_v8, %v1698_v25 }
0x1554   :  { %vm1652_vm1 = vmor %vm1650_vm15, %vm1651_vm14 }
0x1555   :  { %v1647_v49 = vsub.f32 1.0, %v1646_v47 }
0x1557   :  { %v1648_v44 = vmul.f32 %v2940_v16, %v1647_v49 }
0x1559   :  { %v1649_v50 = vadd.f32 %v2940_v16, %v1648_v44 }
0x155b   :  { %v1653_v59 = vsel %vm1652_vm1, %v2940_v16, %v1649_v50 }
0x155c   :  { %v1658_v62 = vsel %vm1655_vm2, %v1657_v60, %v1653_v59 }
0x155d   :  { %v1664_v18 = vmul.f32 %v1662_v0, %v1658_v62 }
0x1598   :  { %v1707_v17 = vpop.permute.xlu2 %1706 }
0x1599   :  { %v1709_v48 = vmul.f32 %v1707_v17, %v1698_v25 }
0x159b   :  { %1711 = vrot.lane.b32.xlu1 %v1709_v48, %s3099_s6 }
0x15ab   :  { %v1667_v61 = vpop.permute.xlu0 %1666 }
0x15ac   :  { %v1669_v63 = vmul.f32 %v1667_v61, %v1658_v62 }
0x15ae   :  { %1671 = vrot.lane.b32.xlu2 %v1669_v63, %s3099_s6 }
0x1608   :  { %v1672_v3 = vpop.permute.xlu2 %1671 }
0x1609   :  { %v3750_v4 = vadd.f32 %v1672_v3, %v1664_v18 }
0x160b   :  { %2941 = vtanh.f32 %v3750_v4 }
0x160d   :  { %v1712_v20 = vpop.permute.xlu1 %1711 }
0x160e   :  { %v3754_v31 = vadd.f32 %v1712_v20, %v1704_v19  ;;  %v1810_v20 = vrot.slane %v3750_v4, 6 }
0x1610   :  { %2943 = vtanh.f32 %v3754_v31 }
0x1611   :  { %v2942_v39 = vpop.eup %2941 }
0x1612   :  { %1677 = vrot.lane.b32.xlu1 %v2942_v39, %s3098_s3 }
0x1616   :  { %v2944_v35 = vpop.eup %2943 }
0x1617   :  { %1717 = vrot.lane.b32.xlu0 %v2944_v35, %s3098_s3 }
0x1684   :  { %v1678_v5 = vpop.permute.xlu1 %1677 }
0x1685   :  { %v3759_v26 = vmul.f32 %v1678_v5, %v1658_v62 }
0x1687   :  { %v1731_v43 = vrot.slane %v3759_v26, 2 }
0x1689   :  { %v1718_v1 = vpop.permute.xlu0 %1717  ;;  %1732 = vrot.lane.b32.xlu0 %v1731_v43, %s3099_s6  ;;  %v1850_v43 = vrot.slane %v3754_v31, 2 }
0x168a   :  { %v3763_v30 = vmul.f32 %v1718_v1, %v1698_v25 }
0x168c   :  { %v1760_v6 = vrot.slane %v3763_v30, 4 }
0x168e   :  { %1761 = vrot.lane.b32.xlu2 %v1760_v6, %s3099_s6 }
0x16e8   :  { %v1762_v38 = vpop.permute.xlu2 %1761 }
0x16e9   :  { %2738 = vmatmul.msk.f32.vlgmr.msra.gmra.mxu1 %vm90_vm0, %v1762_v38 }
0x16ea   :  { %2357 = vmatpush.msra.mxu1 %v3621_v22 }
0x16ec   :  { %2358 = vmatpush.msra.mxu1 %v3623_v52 }
0x16ee   :  { %2359 = vmatpush.msra.mxu1 %v3629_v53 }
0x16f0   :  { %2360 = vmatpush.msra.mxu1 %v3643_v56 }
0x16fb   :  { %v1733_v40 = vpop.permute.xlu0 %1732 }
0x16fc   :  { %2737 = vmatmul.msk.f32.vlgmr.msra.gmra.mxu0 %vm90_vm0, %v1733_v40 }
0x16fd   :  { %2328 = vmatpush.msra.mxu0 %v3634_v54 }
0x16ff   :  { %2329 = vmatpush.msra.mxu0 %v3639_v55 }
0x1701   :  { %2330 = vmatpush.msra.mxu0 %v3648_v57 }
0x1703   :  { %2331 = vmatpush.msra.mxu0 %v3657_v58 }
0x1766   :  { %v1782_v13 = vpop.f32.mrf.mxu1 }
0x1767   :  { %v1786_v21 = vrot.slane %v1782_v13, 6 }
0x1769   :  { %v1788_v27 = vadd.f32 %v1786_v21, %v3712_v32 }
0x176b   :  { %2945 = vtanh.f32 %v1788_v27  ;;  %v2740_v37 = vmul.f32 -1.442695, %v1788_v27 }
0x1771   :  { %v2946_v36 = vpop.eup %2945 }
0x1772   :  { %1854 = vrot.lane.b32.xlu1 %v2946_v36, %s3098_s3 }
0x1779   :  { %v1753_v41 = vpop.f32.mrf.mxu0 }
0x177a   :  { %v1757_v33 = vrot.slane %v1753_v41, 4 }
0x177c   :  { %v1759_v42 = vadd.f32 %v1757_v33, %v3709_v24 }
0x177e   :  { %2947 = vtanh.f32 %v1759_v42  ;;  %v2739_v11 = vmul.f32 -1.442695, %v1759_v42 }
0x1780   :  { %2949 = vpow2.f32 %v2739_v11 }
0x1781   :  { %2951 = vpow2.f32 %v2740_v37 }
0x1784   :  { %v2948_v9 = vpop.eup %2947 }
0x1785   :  { %1814 = vrot.lane.b32.xlu2 %v2948_v9, %s3098_s3 }
0x1786   :  { %v2950_v45 = vpop.eup %2949 }
0x1787   :  { %v1792_v46 = vadd.f32 1.0, %v2950_v45  ;;  %v2952_v14 = vpop.eup %2951 }
0x1788   :  { %v1832_v10 = vadd.f32 1.0, %v2952_v14 }
0x1789   :  { %2953 = vrcp.f32 %v1792_v46  ;;  %v1804_v48 = vand.u32 2147483648, %v1792_v46  ;;  %vm1798_vm4 = vweird.f32 %v1792_v46  ;;  %v1802_v44 = vand.u32 2147483647, %v1792_v46 }
0x178a   :  { %2955 = vrcp.f32 %v1832_v10  ;;  %v1844_v59 = vand.u32 2147483648, %v1832_v10  ;;  %vm1838_vm8 = vweird.f32 %v1832_v10  ;;  %v1842_v62 = vand.u32 2147483647, %v1832_v10 }
0x178b   :  { %v1805_v29 = vor.u32 1.1754944e-38, %v1804_v48  ;;  %vm1803_vm7 = vcmp.eq.f32.partialorder %v1802_v44, 8.507059e+37 }
0x178c   :  { %v1845_v18 = vor.u32 1.1754944e-38, %v1844_v59  ;;  %vm1843_vm14 = vcmp.eq.f32.partialorder %v1842_v62, 8.507059e+37 }
0x178f   :  { %v2954_v12 = vpop.eup %2953 }
0x1790   :  { %v1794_v15 = vmul.f32 %v2954_v12, %v1792_v46  ;;  %v2956_v16 = vpop.eup %2955  ;;  %vm1799_vm3 = vweird.f32 %v2954_v12 }
0x1791   :  { %v1834_v34 = vmul.f32 %v2956_v16, %v1832_v10  ;;  %vm1800_vm5 = vmor %vm1798_vm4, %vm1799_vm3  ;;  %vm1839_vm6 = vweird.f32 %v2956_v16 }
0x1792   :  { %v1795_v23 = vsub.f32 1.0, %v1794_v15  ;;  %vm1840_vm13 = vmor %vm1838_vm8, %vm1839_vm6 }
0x1793   :  { %v1835_v25 = vsub.f32 1.0, %v1834_v34 }
0x1794   :  { %v1796_v17 = vmul.f32 %v2954_v12, %v1795_v23 }
0x1795   :  { %v1836_v49 = vmul.f32 %v2956_v16, %v1835_v25 }
0x1796   :  { %v1797_v47 = vadd.f32 %v2954_v12, %v1796_v17 }
0x1797   :  { %v1837_v51 = vadd.f32 %v2956_v16, %v1836_v49 }
0x1798   :  { %v1801_v50 = vsel %vm1800_vm5, %v2954_v12, %v1797_v47 }
0x1799   :  { %v1806_v61 = vsel %vm1803_vm7, %v1805_v29, %v1801_v50  ;;  %v1841_v0 = vsel %vm1840_vm13, %v2956_v16, %v1837_v51 }
0x179a   :  { %v1846_v3 = vsel %vm1843_vm14, %v1845_v18, %v1841_v0  ;;  %v1812_v39 = vmul.f32 %v1810_v20, %v1806_v61 }
0x179b   :  { %v1852_v1 = vmul.f32 %v1850_v43, %v1846_v3 }
0x17df   :  { %v1815_v60 = vpop.permute.xlu2 %1814 }
0x17e0   :  { %v1817_v63 = vmul.f32 %v1815_v60, %v1806_v61 }
0x17e2   :  { %1819 = vrot.lane.b32.xlu1 %v1817_v63, %s3099_s6 }
0x17e4   :  { %v1855_v8 = vpop.permute.xlu1 %1854 }
0x17e5   :  { %v1857_v19 = vmul.f32 %v1855_v8, %v1846_v3 }
0x17e7   :  { %1859 = vrot.lane.b32.xlu0 %v1857_v19, %s3099_s6 }
0x1854   :  { %v1820_v35 = vpop.permute.xlu1 %1819 }
0x1855   :  { %v3784_v5 = vadd.f32 %v1820_v35, %v1812_v39 }
0x1857   :  { %2957 = vtanh.f32 %v3784_v5  ;;  %v1955_v39 = vrot.slane %v3784_v5, 6 }
0x1859   :  { %v1860_v6 = vpop.permute.xlu0 %1859 }
0x185a   :  { %v3788_v38 = vadd.f32 %v1860_v6, %v1852_v1 }
0x185c   :  { %2959 = vtanh.f32 %v3788_v38  ;;  %v1995_v18 = vrot.slane %v3788_v38, 2 }
0x185d   :  { %v2958_v40 = vpop.eup %2957 }
0x185e   :  { %1825 = vrot.lane.b32.xlu0 %v2958_v40, %s3098_s3 }
0x1862   :  { %v2960_v13 = vpop.eup %2959 }
0x1863   :  { %1865 = vrot.lane.b32.xlu2 %v2960_v13, %s3098_s3 }
0x18bd   :  { %v1866_v4 = vpop.permute.xlu2 %1865 }
0x18be   :  { %v3793_v21 = vmul.f32 %v1866_v4, %v1846_v3 }
0x18c0   :  { %v1908_v27 = vrot.slane %v3793_v21, 2 }
0x18c2   :  { %1909 = vrot.lane.b32.xlu1 %v1908_v27, %s3099_s6 }
0x18d0   :  { %v1826_v31 = vpop.permute.xlu0 %1825 }
0x18d1   :  { %v3797_v36 = vmul.f32 %v1826_v31, %v1806_v61 }
0x18d3   :  { %v1879_v41 = vrot.slane %v3797_v36, 4 }
0x18d5   :  { %1880 = vrot.lane.b32.xlu2 %v1879_v41, %s3099_s6 }
0x192f   :  { %v1881_v33 = vpop.permute.xlu2 %1880 }
0x1930   :  { %2741 = vmatmul.msk.f32.vlgmr.msra.gmra.mxu2 %vm90_vm0, %v1881_v33 }
0x1931   :  { %2476 = vmatpush.msra.mxu2 %v3634_v54 }
0x1933   :  { %2477 = vmatpush.msra.mxu2 %v3639_v55 }
0x1934   :  { %v1910_v42 = vpop.permute.xlu1 %1909 }
0x1935   :  { %2742 = vmatmul.msk.f32.vlgmr.msra.gmra.mxu3 %vm90_vm0, %v1910_v42  ;;  %2478 = vmatpush.msra.mxu2 %v3648_v57 }
0x1936   :  { %2505 = vmatpush.msra.mxu3 %v3621_v22 }
0x1937   :  { %2479 = vmatpush.msra.mxu2 %v3657_v58 }
0x1938   :  { %2506 = vmatpush.msra.mxu3 %v3623_v52 }
0x193a   :  { %2507 = vmatpush.msra.mxu3 %v3629_v53 }
0x193c   :  { %2508 = vmatpush.msra.mxu3 %v3643_v56 }
0x19b3   :  { %v1901_v9 = vpop.f32.mrf.mxu2 }
0x19b4   :  { %v1905_v11 = vrot.slane %v1901_v9, 2 }
0x19b6   :  { %v1907_v54 = vadd.f32 %v1905_v11, %v3709_v24 }
0x19b8   :  { %2961 = vtanh.f32 %v1907_v54  ;;  %v1930_v55 = vpop.f32.mrf.mxu3  ;;  %v2743_v52 = vmul.f32 -1.442695, %v1907_v54 }
0x19b9   :  { %v1933_v37 = vadd.f32 %v1930_v55, %v3712_v32 }
0x19bb   :  { %2963 = vtanh.f32 %v1933_v37  ;;  %v2744_v58 = vmul.f32 -1.442695, %v1933_v37 }
0x19bc   :  { %2965 = vpow2.f32 %v2743_v52 }
0x19bd   :  { %2967 = vpow2.f32 %v2744_v58 }
0x19be   :  { %v2962_v57 = vpop.eup %2961 }
0x19bf   :  { %1959 = vrot.lane.b32.xlu1 %v2962_v57, %s3098_s3 }
0x19c1   :  { %v2964_v22 = vpop.eup %2963 }
0x19c2   :  { %1999 = vrot.lane.b32.xlu0 %v2964_v22, %s3098_s3  ;;  %v2966_v53 = vpop.eup %2965 }
0x19c3   :  { %v2968_v56 = vpop.eup %2967  ;;  %v1937_v45 = vadd.f32 1.0, %v2966_v53 }
0x19c4   :  { %v1977_v46 = vadd.f32 1.0, %v2968_v56 }
0x19c5   :  { %2969 = vrcp.f32 %v1937_v45  ;;  %v1949_v17 = vand.u32 2147483648, %v1937_v45  ;;  %vm1943_vm1 = vweird.f32 %v1937_v45  ;;  %v1947_v25 = vand.u32 2147483647, %v1937_v45 }
0x19c6   :  { %2971 = vrcp.f32 %v1977_v46  ;;  %v1989_v49 = vand.u32 2147483648, %v1977_v46  ;;  %vm1983_vm4 = vweird.f32 %v1977_v46  ;;  %v1987_v50 = vand.u32 2147483647, %v1977_v46 }
0x19c7   :  { %v1950_v44 = vor.u32 1.1754944e-38, %v1949_v17  ;;  %vm1948_vm5 = vcmp.eq.f32.partialorder %v1947_v25, 8.507059e+37 }
0x19c8   :  { %v1990_v61 = vor.u32 1.1754944e-38, %v1989_v49  ;;  %vm1988_vm7 = vcmp.eq.f32.partialorder %v1987_v50, 8.507059e+37 }
0x19cb   :  { %v2970_v24 = vpop.eup %2969 }
0x19cc   :  { %v2972_v14 = vpop.eup %2971  ;;  %v1939_v32 = vmul.f32 %v2970_v24, %v1937_v45  ;;  %vm1944_vm15 = vweird.f32 %v2970_v24 }
0x19cd   :  { %v1979_v10 = vmul.f32 %v2972_v14, %v1977_v46  ;;  %vm1945_vm2 = vmor %vm1943_vm1, %vm1944_vm15  ;;  %vm1984_vm3 = vweird.f32 %v2972_v14 }
0x19ce   :  { %v1940_v12 = vsub.f32 1.0, %v1939_v32  ;;  %vm1985_vm6 = vmor %vm1983_vm4, %vm1984_vm3 }
0x19cf   :  { %v1980_v15 = vsub.f32 1.0, %v1979_v10 }
0x19d0   :  { %v1941_v16 = vmul.f32 %v2970_v24, %v1940_v12 }
0x19d1   :  { %v1981_v23 = vmul.f32 %v2972_v14, %v1980_v15 }
0x19d2   :  { %v1942_v34 = vadd.f32 %v2970_v24, %v1941_v16 }
0x19d3   :  { %v1982_v47 = vadd.f32 %v2972_v14, %v1981_v23 }
0x19d4   :  { %v1946_v48 = vsel %vm1945_vm2, %v2970_v24, %v1942_v34 }
0x19d5   :  { %v1951_v29 = vsel %vm1948_vm5, %v1950_v44, %v1946_v48  ;;  %v1986_v59 = vsel %vm1985_vm6, %v2972_v14, %v1982_v47 }
0x19d6   :  { %v1991_v63 = vsel %vm1988_vm7, %v1990_v61, %v1986_v59  ;;  %v1957_v35 = vmul.f32 %v1955_v39, %v1951_v29 }
0x19d7   :  { %v1997_v3 = vmul.f32 %v1995_v18, %v1991_v63 }
0x1a31   :  { %v1960_v51 = vpop.permute.xlu1 %1959 }
0x1a32   :  { %v1962_v60 = vmul.f32 %v1960_v51, %v1951_v29 }
0x1a34   :  { %v2000_v62 = vpop.permute.xlu0 %1999  ;;  %1964 = vrot.lane.b32.xlu0 %v1962_v60, %s3099_s6 }
0x1a35   :  { %v2002_v0 = vmul.f32 %v2000_v62, %v1991_v63 }
0x1a37   :  { %2004 = vrot.lane.b32.xlu2 %v2002_v0, %s3099_s6 }
0x1a91   :  { %v2005_v8 = vpop.permute.xlu2 %2004 }
0x1a92   :  { %v3818_v19 = vadd.f32 %v2005_v8, %v1997_v3 }
0x1a94   :  { %2973 = vtanh.f32 %v3818_v19  ;;  %v2137_v0 = vrot.slane %v3818_v19, 2 }
0x1a9a   :  { %v2974_v20 = vpop.eup %2973 }
0x1a9b   :  { %2010 = vrot.lane.b32.xlu1 %v2974_v20, %s3098_s3 }
0x1aa6   :  { %v1965_v43 = vpop.permute.xlu0 %1964 }
0x1aa7   :  { %v3823_v1 = vadd.f32 %v1965_v43, %v1957_v35 }
0x1aa9   :  { %2975 = vtanh.f32 %v3823_v1  ;;  %v2097_v62 = vrot.slane %v3823_v1, 6 }
0x1aaf   :  { %v2976_v6 = vpop.eup %2975 }
0x1ab0   :  { %1970 = vrot.lane.b32.xlu2 %v2976_v6, %s3098_s3 }
0x1b0a   :  { %v1971_v38 = vpop.permute.xlu2 %1970 }
0x1b0b   :  { %v3827_v40 = vmul.f32 %v1971_v38, %v1951_v29 }
0x1b0d   :  { %v2024_v13 = vrot.slane %v3827_v40, 6  ;;  %v2011_v4 = vpop.permute.xlu1 %2010 }
0x1b0e   :  { %v2013_v27 = vmul.f32 %v2011_v4, %v1991_v63 }
0x1b0f   :  { %2025 = vrot.lane.b32.xlu1 %v2024_v13, %s3099_s6 }
0x1b10   :  { %2020 = vrot.lane.b32.xlu0 %v2013_v27, %s3099_s6 }
0x1b81   :  { %v2026_v5 = vpop.permute.xlu1 %2025 }
0x1b82   :  { %v2021_v31 = vpop.permute.xlu0 %2020  ;;  %2745 = vmatmul.msk.f32.vlgmr.msrb.gmra.mxu0 %vm90_vm0, %v2026_v5 }
0x1b83   :  { %2023 = vst.msk [vmem:[#allocation3 + $0x8] sm:$0x3] %vm285_vm9, %v2021_v31  ;;  %2746 = vmatmul.msk.f32.vlgmr.msrb.gmra.mxu1 %vm90_vm0, %v2021_v31 }
0x1bff   :  { %v2046_v41 = vpop.f32.mrf.mxu0 }
0x1c00   :  { %v2049_v33 = vadd.f32 %v2046_v41, %v3707_v7  ;;  %v2069_v42 = vpop.f32.mrf.mxu1 }
0x1c01   :  { %v2073_v9 = vrot.slane %v2069_v42, 2 }
0x1c02   :  { %2977 = vtanh.f32 %v2049_v33  ;;  %v2747_v52 = vmul.f32 -1.442695, %v2049_v33 }
0x1c03   :  { %v2075_v11 = vadd.f32 %v2073_v9, %v3705_v28 }
0x1c05   :  { %2979 = vtanh.f32 %v2075_v11  ;;  %v2748_v37 = vmul.f32 -1.442695, %v2075_v11 }
0x1c07   :  { %2981 = vpow2.f32 %v2748_v37 }
0x1c08   :  { %v2978_v54 = vpop.eup %2977 }
0x1c09   :  { %2101 = vrot.lane.b32.xlu0 %v2978_v54, %s3098_s3 }
0x1c0b   :  { %v2980_v55 = vpop.eup %2979 }
0x1c0c   :  { %2141 = vrot.lane.b32.xlu2 %v2980_v55, %s3098_s3 }
0x1c0d   :  { %v2982_v57 = vpop.eup %2981 }
0x1c0e   :  { %v2119_v22 = vadd.f32 1.0, %v2982_v57 }
0x1c10   :  { %2983 = vrcp.f32 %v2119_v22  ;;  %v2131_v32 = vand.u32 2147483648, %v2119_v22  ;;  %vm2125_vm13 = vweird.f32 %v2119_v22  ;;  %v2129_v10 = vand.u32 2147483647, %v2119_v22 }
0x1c11   :  { %2985 = vpow2.f32 %v2747_v52 }
0x1c12   :  { %v2132_v15 = vor.u32 1.1754944e-38, %v2131_v32  ;;  %vm2130_vm15 = vcmp.eq.f32.partialorder %v2129_v10, 8.507059e+37 }
0x1c16   :  { %v2984_v58 = vpop.eup %2983 }
0x1c17   :  { %v2121_v53 = vmul.f32 %v2984_v58, %v2119_v22  ;;  %v2986_v45 = vpop.eup %2985  ;;  %vm2126_vm8 = vweird.f32 %v2984_v58 }
0x1c18   :  { %v2079_v46 = vadd.f32 1.0, %v2986_v45  ;;  %vm2127_vm14 = vmor %vm2125_vm13, %vm2126_vm8 }
0x1c19   :  { %v2122_v56 = vsub.f32 1.0, %v2121_v53 }
0x1c1a   :  { %2987 = vrcp.f32 %v2079_v46  ;;  %v2091_v44 = vand.u32 2147483648, %v2079_v46  ;;  %vm2085_vm2 = vweird.f32 %v2079_v46  ;;  %v2089_v50 = vand.u32 2147483647, %v2079_v46 }
0x1c1b   :  { %v2123_v24 = vmul.f32 %v2984_v58, %v2122_v56 }
0x1c1c   :  { %v2092_v51 = vor.u32 1.1754944e-38, %v2091_v44  ;;  %vm2090_vm4 = vcmp.eq.f32.partialorder %v2089_v50, 8.507059e+37 }
0x1c1d   :  { %v2124_v14 = vadd.f32 %v2984_v58, %v2123_v24 }
0x1c1f   :  { %v2128_v12 = vsel %vm2127_vm14, %v2984_v58, %v2124_v14 }
0x1c20   :  { %v2988_v16 = vpop.eup %2987  ;;  %v2133_v34 = vsel %vm2130_vm15, %v2132_v15, %v2128_v12 }
0x1c21   :  { %v2081_v25 = vmul.f32 %v2988_v16, %v2079_v46  ;;  %vm2086_vm1 = vweird.f32 %v2988_v16  ;;  %v2139_v8 = vmul.f32 %v2137_v0, %v2133_v34 }
0x1c22   :  { %vm2087_vm3 = vmor %vm2085_vm2, %vm2086_vm1 }
0x1c23   :  { %v2082_v47 = vsub.f32 1.0, %v2081_v25 }
0x1c25   :  { %v2083_v48 = vmul.f32 %v2988_v16, %v2082_v47 }
0x1c27   :  { %v2084_v49 = vadd.f32 %v2988_v16, %v2083_v48 }
0x1c29   :  { %v2088_v29 = vsel %vm2087_vm3, %v2988_v16, %v2084_v49 }
0x1c2a   :  { %v2093_v60 = vsel %vm2090_vm4, %v2092_v51, %v2088_v29 }
0x1c2b   :  { %v2099_v63 = vmul.f32 %v2097_v62, %v2093_v60 }
0x1c66   :  { %v2142_v23 = vpop.permute.xlu2 %2141 }
0x1c67   :  { %v2144_v17 = vmul.f32 %v2142_v23, %v2133_v34 }
0x1c69   :  { %2146 = vrot.lane.b32.xlu1 %v2144_v17, %s3099_s6 }
0x1c7b   :  { %v2102_v59 = vpop.permute.xlu0 %2101 }
0x1c7c   :  { %v2104_v61 = vmul.f32 %v2102_v59, %v2093_v60 }
0x1c7e   :  { %2106 = vrot.lane.b32.xlu2 %v2104_v61, %s3099_s6 }
0x1cd8   :  { %v2107_v18 = vpop.permute.xlu2 %2106 }
0x1cd9   :  { %v3843_v3 = vadd.f32 %v2107_v18, %v2099_v63 }
0x1cdb   :  { %2989 = vtanh.f32 %v3843_v3  ;;  %v2147_v20 = vpop.permute.xlu1 %2146  ;;  %v2242_v61 = vrot.slane %v3843_v3, 6 }
0x1cdc   :  { %v3846_v39 = vadd.f32 %v2147_v20, %v2139_v8 }
0x1cde   :  { %2991 = vtanh.f32 %v3846_v39  ;;  %v2282_v18 = vrot.slane %v3846_v39, 2 }
0x1ce1   :  { %v2990_v35 = vpop.eup %2989 }
0x1ce2   :  { %2112 = vrot.lane.b32.xlu1 %v2990_v35, %s3098_s3 }
0x1ce4   :  { %v2992_v43 = vpop.eup %2991 }
0x1ce5   :  { %2152 = vrot.lane.b32.xlu0 %v2992_v43, %s3098_s3 }
0x1d54   :  { %v2113_v1 = vpop.permute.xlu1 %2112 }
0x1d55   :  { %v2115_v6 = vmul.f32 %v2113_v1, %v2093_v60 }
0x1d57   :  { %v2153_v19 = vpop.permute.xlu0 %2152  ;;  %2157 = vrot.lane.b32.xlu0 %v2115_v6, %s3099_s6 }
0x1d58   :  { %v3852_v38 = vmul.f32 %v2153_v19, %v2133_v34 }
0x1d5a   :  { %v2192_v13 = vrot.slane %v3852_v38, 6 }
0x1d5c   :  { %2193 = vrot.lane.b32.xlu2 %v2192_v13, %s3099_s6 }
0x1db6   :  { %v2194_v4 = vpop.permute.xlu2 %2193 }
0x1db7   :  { %2750 = vmatmul.msk.f32.vlgmr.msrb.gmra.mxu3 %vm90_vm0, %v2194_v4 }
0x1dc9   :  { %v2158_v27 = vpop.permute.xlu0 %2157 }
0x1dca   :  { %2160 = vst.msk [vmem:[#allocation2 + $0x8] sm:$0x3] %vm285_vm9, %v2158_v27  ;;  %2749 = vmatmul.msk.f32.vlgmr.msrb.gmra.mxu2 %vm90_vm0, %v2158_v27 }
0x1e3a   :  { %v2214_v5 = vpop.f32.mrf.mxu3 }
0x1e3b   :  { %v2218_v31 = vrot.slane %v2214_v5, 4 }
0x1e3d   :  { %v2220_v41 = vadd.f32 %v2218_v31, %v3705_v28 }
0x1e3f   :  { %2993 = vtanh.f32 %v2220_v41  ;;  %v2752_v37 = vmul.f32 -1.442695, %v2220_v41 }
0x1e45   :  { %v2994_v33 = vpop.eup %2993 }
0x1e46   :  { %2286 = vrot.lane.b32.xlu1 %v2994_v33, %s3098_s3 }
0x1e4d   :  { %v2185_v42 = vpop.f32.mrf.mxu2 }
0x1e4e   :  { %v2189_v9 = vrot.slane %v2185_v42, 6 }
0x1e50   :  { %v2191_v11 = vadd.f32 %v2189_v9, %v3707_v7 }
0x1e52   :  { %2995 = vtanh.f32 %v2191_v11  ;;  %v2751_v55 = vmul.f32 -1.442695, %v2191_v11 }
0x1e54   :  { %2997 = vpow2.f32 %v2751_v55 }
0x1e55   :  { %2999 = vpow2.f32 %v2752_v37 }
0x1e58   :  { %v2996_v54 = vpop.eup %2995 }
0x1e59   :  { %2246 = vrot.lane.b32.xlu2 %v2996_v54, %s3098_s3 }
0x1e5a   :  { %v2998_v57 = vpop.eup %2997 }
0x1e5b   :  { %v2224_v22 = vadd.f32 1.0, %v2998_v57  ;;  %v3000_v52 = vpop.eup %2999 }
0x1e5c   :  { %v2264_v58 = vadd.f32 1.0, %v3000_v52 }
0x1e5d   :  { %3001 = vrcp.f32 %v2224_v22  ;;  %v2236_v12 = vand.u32 2147483648, %v2224_v22  ;;  %vm2230_vm6 = vweird.f32 %v2224_v22  ;;  %v2234_v16 = vand.u32 2147483647, %v2224_v22 }
0x1e5e   :  { %3003 = vrcp.f32 %v2264_v58  ;;  %v2276_v25 = vand.u32 2147483648, %v2264_v58  ;;  %vm2270_vm14 = vweird.f32 %v2264_v58  ;;  %v2274_v49 = vand.u32 2147483647, %v2264_v58 }
0x1e5f   :  { %v2237_v34 = vor.u32 1.1754944e-38, %v2236_v12  ;;  %vm2235_vm13 = vcmp.eq.f32.partialorder %v2234_v16, 8.507059e+37 }
0x1e60   :  { %v2277_v29 = vor.u32 1.1754944e-38, %v2276_v25  ;;  %vm2275_vm1 = vcmp.eq.f32.partialorder %v2274_v49, 8.507059e+37 }
0x1e63   :  { %v3002_v53 = vpop.eup %3001 }
0x1e64   :  { %v2226_v56 = vmul.f32 %v3002_v53, %v2224_v22  ;;  %v3004_v45 = vpop.eup %3003  ;;  %vm2231_vm5 = vweird.f32 %v3002_v53 }
0x1e65   :  { %v2266_v24 = vmul.f32 %v3004_v45, %v2264_v58  ;;  %vm2232_vm7 = vmor %vm2230_vm6, %vm2231_vm5  ;;  %vm2271_vm8 = vweird.f32 %v3004_v45 }
0x1e66   :  { %v2227_v46 = vsub.f32 1.0, %v2226_v56  ;;  %vm2272_vm15 = vmor %vm2270_vm14, %vm2271_vm8 }
0x1e67   :  { %v2267_v32 = vsub.f32 1.0, %v2266_v24 }
0x1e68   :  { %v2228_v14 = vmul.f32 %v3002_v53, %v2227_v46 }
0x1e69   :  { %v2268_v15 = vmul.f32 %v3004_v45, %v2267_v32 }
0x1e6a   :  { %v2229_v10 = vadd.f32 %v3002_v53, %v2228_v14 }
0x1e6b   :  { %v2269_v17 = vadd.f32 %v3004_v45, %v2268_v15 }
0x1e6c   :  { %v2233_v23 = vsel %vm2232_vm7, %v3002_v53, %v2229_v10 }
0x1e6d   :  { %v2238_v48 = vsel %vm2235_vm13, %v2237_v34, %v2233_v23  ;;  %v2273_v50 = vsel %vm2272_vm15, %v3004_v45, %v2269_v17 }
0x1e6e   :  { %v2278_v51 = vsel %vm2275_vm1, %v2277_v29, %v2273_v50  ;;  %v2244_v62 = vmul.f32 %v2242_v61, %v2238_v48 }
0x1e6f   :  { %v2284_v8 = vmul.f32 %v2282_v18, %v2278_v51 }
0x1eb3   :  { %v2247_v47 = vpop.permute.xlu2 %2246 }
0x1eb4   :  { %v2249_v44 = vmul.f32 %v2247_v47, %v2238_v48 }
0x1eb6   :  { %2251 = vrot.lane.b32.xlu1 %v2249_v44, %s3099_s6 }
0x1eb8   :  { %v2287_v59 = vpop.permute.xlu1 %2286 }
0x1eb9   :  { %v2289_v60 = vmul.f32 %v2287_v59, %v2278_v51 }
0x1ebb   :  { %2291 = vrot.lane.b32.xlu0 %v2289_v60, %s3099_s6 }
0x1f28   :  { %v2252_v63 = vpop.permute.xlu1 %2251 }
0x1f29   :  { %v3866_v0 = vadd.f32 %v2252_v63, %v2244_v62 }
0x1f2b   :  { %3005 = vtanh.f32 %v3866_v0 }
0x1f2d   :  { %v2292_v20 = vpop.permute.xlu0 %2291 }
0x1f2e   :  { %v3870_v35 = vadd.f32 %v2292_v20, %v2284_v8 }
0x1f30   :  { %3007 = vtanh.f32 %v3870_v35  ;;  %v2430_v62 = vrot.slane %v3870_v35, 2 }
0x1f31   :  { %v3006_v43 = vpop.eup %3005 }
0x1f32   :  { %2257 = vrot.lane.b32.xlu0 %v3006_v43, %s3098_s3  ;;  %v2390_v43 = vrot.slane %v3866_v0, 6 }
0x1f36   :  { %v3008_v1 = vpop.eup %3007 }
0x1f37   :  { %2297 = vrot.lane.b32.xlu2 %v3008_v1, %s3098_s3 }
0x1f91   :  { %v2298_v3 = vpop.permute.xlu2 %2297 }
0x1f92   :  { %v3875_v6 = vmul.f32 %v2298_v3, %v2278_v51 }
0x1f94   :  { %v2340_v19 = vrot.slane %v3875_v6, 4 }
0x1f96   :  { %2341 = vrot.lane.b32.xlu1 %v2340_v19, %s3099_s6 }
0x1fa4   :  { %v2258_v39 = vpop.permute.xlu0 %2257 }
0x1fa5   :  { %v3879_v13 = vmul.f32 %v2258_v39, %v2238_v48 }
0x1fa7   :  { %v2311_v4 = vrot.slane %v3879_v13, 2 }
0x1fa9   :  { %2312 = vrot.lane.b32.xlu2 %v2311_v4, %s3099_s6 }
0x2003   :  { %v2313_v27 = vpop.permute.xlu2 %2312 }
0x2004   :  { %2753 = vmatmul.msk.f32.vlgmr.msra.gmra.mxu0 %vm90_vm0, %v2313_v27 }
0x2008   :  { %v2342_v5 = vpop.permute.xlu1 %2341 }
0x2009   :  { %2754 = vmatmul.msk.f32.vlgmr.msra.gmra.mxu1 %vm90_vm0, %v2342_v5 }
0x2081   :  { %v2333_v31 = vpop.f32.mrf.mxu0 }
0x2082   :  { %v2337_v41 = vrot.slane %v2333_v31, 4 }
0x2084   :  { %v2339_v33 = vadd.f32 %v2337_v41, %v3707_v7 }
0x2086   :  { %3009 = vtanh.f32 %v2339_v33  ;;  %v2362_v42 = vpop.f32.mrf.mxu1  ;;  %v2755_v37 = vmul.f32 -1.442695, %v2339_v33 }
0x2087   :  { %v2366_v9 = vrot.slane %v2362_v42, 6 }
0x2089   :  { %v2368_v11 = vadd.f32 %v2366_v9, %v3705_v28 }
0x208b   :  { %3011 = vtanh.f32 %v2368_v11  ;;  %v2756_v57 = vmul.f32 -1.442695, %v2368_v11 }
0x208c   :  { %v3010_v54 = vpop.eup %3009  ;;  %3013 = vpow2.f32 %v2755_v37 }
0x208d   :  { %2394 = vrot.lane.b32.xlu1 %v3010_v54, %s3098_s3  ;;  %3015 = vpow2.f32 %v2756_v57 }
0x2091   :  { %v3012_v55 = vpop.eup %3011 }
0x2092   :  { %2434 = vrot.lane.b32.xlu0 %v3012_v55, %s3098_s3  ;;  %v3014_v22 = vpop.eup %3013 }
0x2093   :  { %v2372_v52 = vadd.f32 1.0, %v3014_v22  ;;  %v3016_v58 = vpop.eup %3015 }
0x2094   :  { %v2412_v53 = vadd.f32 1.0, %v3016_v58 }
0x2095   :  { %3017 = vrcp.f32 %v2372_v52  ;;  %v2384_v15 = vand.u32 2147483648, %v2372_v52  ;;  %vm2378_vm3 = vweird.f32 %v2372_v52  ;;  %v2382_v23 = vand.u32 2147483647, %v2372_v52 }
0x2096   :  { %3019 = vrcp.f32 %v2412_v53  ;;  %v2424_v47 = vand.u32 2147483648, %v2412_v53  ;;  %vm2418_vm7 = vweird.f32 %v2412_v53  ;;  %v2422_v44 = vand.u32 2147483647, %v2412_v53 }
0x2097   :  { %v2385_v17 = vor.u32 1.1754944e-38, %v2384_v15  ;;  %vm2383_vm6 = vcmp.eq.f32.partialorder %v2382_v23, 8.507059e+37 }
0x2098   :  { %v2425_v51 = vor.u32 1.1754944e-38, %v2424_v47  ;;  %vm2423_vm13 = vcmp.eq.f32.partialorder %v2422_v44, 8.507059e+37 }
0x209b   :  { %v3018_v56 = vpop.eup %3017 }
0x209c   :  { %v2374_v45 = vmul.f32 %v3018_v56, %v2372_v52  ;;  %v3020_v46 = vpop.eup %3019  ;;  %vm2379_vm2 = vweird.f32 %v3018_v56 }
0x209d   :  { %v2414_v14 = vmul.f32 %v3020_v46, %v2412_v53  ;;  %vm2380_vm4 = vmor %vm2378_vm3, %vm2379_vm2  ;;  %vm2419_vm5 = vweird.f32 %v3020_v46 }
0x209e   :  { %v2375_v24 = vsub.f32 1.0, %v2374_v45  ;;  %vm2420_vm8 = vmor %vm2418_vm7, %vm2419_vm5 }
0x209f   :  { %v2415_v10 = vsub.f32 1.0, %v2414_v14 }
0x20a0   :  { %v2376_v32 = vmul.f32 %v3018_v56, %v2375_v24 }
0x20a1   :  { %v2416_v16 = vmul.f32 %v3020_v46, %v2415_v10 }
0x20a2   :  { %v2377_v12 = vadd.f32 %v3018_v56, %v2376_v32 }
0x20a3   :  { %v2417_v25 = vadd.f32 %v3020_v46, %v2416_v16 }
0x20a4   :  { %v2381_v34 = vsel %vm2380_vm4, %v3018_v56, %v2377_v12 }
0x20a5   :  { %v2386_v48 = vsel %vm2383_vm6, %v2385_v17, %v2381_v34  ;;  %v2421_v29 = vsel %vm2420_vm8, %v3020_v46, %v2417_v25 }
0x20a6   :  { %v2426_v60 = vsel %vm2423_vm13, %v2425_v51, %v2421_v29  ;;  %v2392_v1 = vmul.f32 %v2390_v43, %v2386_v48 }
0x20a7   :  { %v2432_v63 = vmul.f32 %v2430_v62, %v2426_v60 }
0x20ff   :  { %v2395_v49 = vpop.permute.xlu1 %2394 }
0x2100   :  { %v2397_v50 = vmul.f32 %v2395_v49, %v2386_v48 }
0x2102   :  { %2399 = vrot.lane.b32.xlu0 %v2397_v50, %s3099_s6 }
0x2104   :  { %v2435_v59 = vpop.permute.xlu0 %2434 }
0x2105   :  { %v2437_v61 = vmul.f32 %v2435_v59, %v2426_v60 }
0x2107   :  { %2439 = vrot.lane.b32.xlu2 %v2437_v61, %s3099_s6 }
0x2161   :  { %v2440_v18 = vpop.permute.xlu2 %2439 }
0x2162   :  { %v3892_v8 = vadd.f32 %v2440_v18, %v2432_v63 }
0x2164   :  { %3021 = vtanh.f32 %v3892_v8  ;;  %v2575_v18 = vrot.slane %v3892_v8, 2 }
0x216a   :  { %v3022_v20 = vpop.eup %3021 }
0x216b   :  { %2445 = vrot.lane.b32.xlu1 %v3022_v20, %s3098_s3 }
0x2174   :  { %v2400_v3 = vpop.permute.xlu0 %2399 }
0x2175   :  { %v3897_v19 = vadd.f32 %v2400_v3, %v2392_v1 }
0x2177   :  { %3023 = vtanh.f32 %v3897_v19  ;;  %v2535_v62 = vrot.slane %v3897_v19, 6 }
0x217d   :  { %v3024_v39 = vpop.eup %3023 }
0x217e   :  { %2405 = vrot.lane.b32.xlu2 %v3024_v39, %s3098_s3 }
0x21d8   :  { %v2406_v35 = vpop.permute.xlu2 %2405 }
0x21d9   :  { %v3901_v4 = vmul.f32 %v2406_v35, %v2386_v48 }
0x21db   :  { %v2459_v27 = vrot.slane %v3901_v4, 4 }
0x21dd   :  { %v2446_v5 = vpop.permute.xlu1 %2445  ;;  %2460 = vrot.lane.b32.xlu1 %v2459_v27, %s3099_s6 }
0x21de   :  { %v3905_v31 = vmul.f32 %v2446_v5, %v2426_v60 }
0x21e0   :  { %v2488_v0 = vrot.slane %v3905_v31, 2 }
0x21e2   :  { %2489 = vrot.lane.b32.xlu0 %v2488_v0, %s3099_s6 }
0x224f   :  { %v2461_v41 = vpop.permute.xlu1 %2460 }
0x2250   :  { %2757 = vmatmul.msk.f32.vlgmr.msra.gmra.mxu2 %vm90_vm0, %v2461_v41 }
0x2254   :  { %v2490_v33 = vpop.permute.xlu0 %2489 }
0x2255   :  { %2758 = vmatmul.msk.f32.vlgmr.msra.gmra.mxu3 %vm90_vm0, %v2490_v33 }
0x22d3   :  { %v2481_v42 = vpop.f32.mrf.mxu2 }
0x22d4   :  { %v2485_v9 = vrot.slane %v2481_v42, 2 }
0x22d6   :  { %v2487_v11 = vadd.f32 %v2485_v9, %v3707_v7 }
0x22d8   :  { %3025 = vtanh.f32 %v2487_v11  ;;  %v2510_v54 = vpop.f32.mrf.mxu3  ;;  %v2759_v53 = vmul.f32 -1.442695, %v2487_v11 }
0x22d9   :  { %v2513_v55 = vadd.f32 %v2510_v54, %v3705_v28  ;;  %v2615_v54 = vld [vmem:[%s4005_s13 + $0x38] sm:$0xff] }
0x22da   :  { %2634 = vmatpush.msrb.mxu0 %v2615_v54 }
0x22db   :  { %3027 = vtanh.f32 %v2513_v55  ;;  %v2760_v22 = vmul.f32 -1.442695, %v2513_v55  ;;  %v2614_v55 = vld [vmem:[%s4005_s13 + $0x30] sm:$0xff] }
0x22dc   :  { %2635 = vmatpush.msrb.mxu0 %v2614_v55 }
0x22dd   :  { %3029 = vpow2.f32 %v2760_v22 }
0x22de   :  { %v3026_v37 = vpop.eup %3025 }
0x22df   :  { %2539 = vrot.lane.b32.xlu0 %v3026_v37, %s3098_s3  ;;  %v2613_v37 = vld [vmem:[%s4005_s13 + $0x28] sm:$0xff] }
0x22e0   :  { %2636 = vmatpush.msrb.mxu0 %v2613_v37 }
0x22e1   :  { %v3028_v57 = vpop.eup %3027 }
0x22e2   :  { %2579 = vrot.lane.b32.xlu2 %v3028_v57, %s3098_s3  ;;  %v2612_v57 = vld [vmem:[%s4005_s13 + $0x20] sm:$0xff] }
0x22e3   :  { %v3030_v52 = vpop.eup %3029  ;;  %2637 = vmatpush.msrb.mxu0 %v2612_v57 }
0x22e4   :  { %v2557_v58 = vadd.f32 1.0, %v3030_v52 }
0x22e6   :  { %3031 = vrcp.f32 %v2557_v58  ;;  %v2569_v32 = vand.u32 2147483648, %v2557_v58  ;;  %vm2563_vm15 = vweird.f32 %v2557_v58  ;;  %v2567_v10 = vand.u32 2147483647, %v2557_v58 }
0x22e7   :  { %3033 = vpow2.f32 %v2759_v53 }
0x22e8   :  { %v2570_v15 = vor.u32 1.1754944e-38, %v2569_v32  ;;  %vm2568_vm2 = vcmp.eq.f32.partialorder %v2567_v10, 8.507059e+37 }
0x22ec   :  { %v3032_v56 = vpop.eup %3031 }
0x22ed   :  { %v2559_v7 = vmul.f32 %v3032_v56, %v2557_v58  ;;  %v3034_v46 = vpop.eup %3033  ;;  %vm2564_vm14 = vweird.f32 %v3032_v56 }
0x22ee   :  { %v2517_v24 = vadd.f32 1.0, %v3034_v46  ;;  %vm2565_vm1 = vmor %vm2563_vm15, %vm2564_vm14 }
0x22ef   :  { %v2560_v45 = vsub.f32 1.0, %v2559_v7  ;;  %v2784_v7 = vld [vmem:[#allocation6] ss:$0 sm:$0xff] }
0x22f0   :  { %3035 = vrcp.f32 %v2517_v24  ;;  %v2529_v44 = vand.u32 2147483648, %v2517_v24  ;;  %vm2523_vm4 = vweird.f32 %v2517_v24  ;;  %v2527_v50 = vand.u32 2147483647, %v2517_v24 }
0x22f1   :  { %v2561_v28 = vmul.f32 %v3032_v56, %v2560_v45 }
0x22f2   :  { %v2530_v51 = vor.u32 1.1754944e-38, %v2529_v44  ;;  %vm2528_vm6 = vcmp.eq.f32.partialorder %v2527_v50, 8.507059e+37 }
0x22f3   :  { %v2562_v14 = vadd.f32 %v3032_v56, %v2561_v28 }
0x22f5   :  { %v2566_v12 = vsel %vm2565_vm1, %v3032_v56, %v2562_v14 }
0x22f6   :  { %v3036_v16 = vpop.eup %3035  ;;  %v2571_v34 = vsel %vm2568_vm2, %v2570_v15, %v2566_v12 }
0x22f7   :  { %v2519_v25 = vmul.f32 %v3036_v16, %v2517_v24  ;;  %vm2524_vm3 = vweird.f32 %v3036_v16  ;;  %v2577_v1 = vmul.f32 %v2575_v18, %v2571_v34 }
0x22f8   :  { %vm2525_vm5 = vmor %vm2523_vm4, %vm2524_vm3 }
0x22f9   :  { %v2520_v47 = vsub.f32 1.0, %v2519_v25 }
0x22fb   :  { %v2521_v48 = vmul.f32 %v3036_v16, %v2520_v47 }
0x22fd   :  { %v2522_v49 = vadd.f32 %v3036_v16, %v2521_v48 }
0x22ff   :  { %v2526_v29 = vsel %vm2525_vm5, %v3036_v16, %v2522_v49 }
0x2300   :  { %v2531_v60 = vsel %vm2528_vm6, %v2530_v51, %v2526_v29 }
0x2301   :  { %v2537_v63 = vmul.f32 %v2535_v62, %v2531_v60 }
0x233c   :  { %v2580_v23 = vpop.permute.xlu2 %2579 }
0x233d   :  { %v2582_v17 = vmul.f32 %v2580_v23, %v2571_v34 }
0x233f   :  { %2584 = vrot.lane.b32.xlu1 %v2582_v17, %s3099_s6 }
0x2351   :  { %v2540_v59 = vpop.permute.xlu0 %2539 }
0x2352   :  { %v2542_v61 = vmul.f32 %v2540_v59, %v2531_v60 }
0x2354   :  { %2544 = vrot.lane.b32.xlu2 %v2542_v61, %s3099_s6 }
0x235c   :  { %1722 = vrot.lane.b32.xlu2 %v3759_v26, %s3099_s6 }
0x2364   :  { %2162 = vrot.lane.b32.xlu2 %v3852_v38, %s3099_s6 }
0x236c   :  { %1875 = vrot.lane.b32.xlu2 %v3793_v21, %s3099_s6 }
0x23ae   :  { %v2545_v20 = vpop.permute.xlu2 %2544 }
0x23af   :  { %v2547_v43 = vadd.f32 %v2545_v20, %v2537_v63 }
0x23b1   :  { %3037 = vtanh.f32 %v2547_v43  ;;  %v2585_v3 = vpop.permute.xlu1 %2584 }
0x23b2   :  { %v2587_v39 = vadd.f32 %v2585_v3, %v2577_v1 }
0x23b4   :  { %3039 = vtanh.f32 %v2587_v39 }
0x23b6   :  { %v1723_v35 = vpop.permute.xlu2 %1722 }
0x23b7   :  { %v3038_v26 = vpop.eup %3037  ;;  %1725 = vst.msk [vmem:[#allocation2] sm:$0xc] %vm432_vm10, %v1723_v35 }
0x23b8   :  { %2550 = vrot.lane.b32.xlu1 %v3038_v26, %s3098_s3 }
0x23ba   :  { %v3040_v38 = vpop.eup %3039 }
0x23bb   :  { %2590 = vrot.lane.b32.xlu0 %v3040_v38, %s3098_s3 }
0x23be   :  { %v2163_v21 = vpop.permute.xlu2 %2162 }
0x23bf   :  { %2165 = vst.msk [vmem:[#allocation3] sm:$0xc0] %vm291_vm11, %v2163_v21 }
0x23c0   :  { %2015 = vrot.lane.b32.xlu1 %v3827_v40, %s3099_s6  ;;  %v2610_v40 = vld [vmem:[%s4005_s13 + $0x10] sm:$0xff] }
0x23c3   :  { %1870 = vrot.lane.b32.xlu0 %v3797_v36, %s3099_s6  ;;  %v2611_v36 = vld [vmem:[%s4005_s13 + $0x18] sm:$0xff] }
0x23c4   :  { %2663 = vmatpush.msrb.mxu1 %v2611_v36 }
0x23c6   :  { %v1876_v8 = vpop.permute.xlu2 %1875  ;;  %2664 = vmatpush.msrb.mxu1 %v2610_v40 }
0x23c7   :  { %1878 = vst.msk [vmem:[#allocation3 + $0x8] sm:$0xc] %vm432_vm10, %v1876_v8 }
0x23c8   :  { %2455 = vrot.lane.b32.xlu1 %v3905_v31, %s3099_s6 }
0x23cb   :  { %2307 = vrot.lane.b32.xlu0 %v3875_v6, %s3099_s6 }
0x23d0   :  { %1727 = vrot.lane.b32.xlu1 %v3763_v30, %s3099_s6  ;;  %v2609_v30 = vld [vmem:[%s4005_s13 + $0x8] sm:$0xff] }
0x23d1   :  { %2665 = vmatpush.msrb.mxu1 %v2609_v30 }
0x23d3   :  { %1582 = vrot.lane.b32.xlu0 %v3728_v2, %s3099_s6  ;;  %v2608_v2 = vld [vmem:[%s4005_s13] sm:$0xff] }
0x23d4   :  { %2666 = vmatpush.msrb.mxu1 %v2608_v2 }
0x23d8   :  { %2450 = vrot.lane.b32.xlu1 %v3901_v4, %s3099_s6 }
0x23db   :  { %2302 = vrot.lane.b32.xlu0 %v3879_v13, %s3099_s6 }
0x242a   :  { %v2551_v6 = vpop.permute.xlu1 %2550 }
0x242b   :  { %v2553_v5 = vmul.f32 %v2551_v6, %v2531_v60 }
0x242d   :  { %v2591_v13 = vpop.permute.xlu0 %2590 }
0x242e   :  { %v2593_v19 = vmul.f32 %v2591_v13, %v2571_v34 }
0x2430   :  { %2600 = vrot.lane.b32.xlu2 %v2593_v19, %s3099_s6 }
0x2432   :  { %v2016_v4 = vpop.permute.xlu1 %2015 }
0x2433   :  { %2018 = vst.msk [vmem:[#allocation2] sm:$0xc0] %vm291_vm11, %v2016_v4 }
0x2435   :  { %v1871_v27 = vpop.permute.xlu0 %1870 }
0x2436   :  { %1873 = vst.msk [vmem:[#allocation2] sm:$0x30] %vm438_vm12, %v1871_v27 }
0x2438   :  { %2595 = vrot.lane.b32.xlu2 %v2553_v5, %s3099_s6 }
0x243a   :  { %v2456_v31 = vpop.permute.xlu1 %2455 }
0x243b   :  { %2458 = vst.msk [vmem:[#allocation3] sm:$0xc] %vm432_vm10, %v2456_v31 }
0x243d   :  { %v2308_v0 = vpop.permute.xlu0 %2307  ;;  %v2604_v41 = vld [vmem:[#allocation2] sm:$0xff] }
0x243e   :  { %2310 = vst.msk [vmem:[#allocation3] sm:$0x30] %vm438_vm12, %v2308_v0  ;;  %2763 = vmatmul.msk.f32.vlgmr.msrb.gmra.mxu1 %vm90_vm0, %v2604_v41 }
0x2442   :  { %v1728_v33 = vpop.permute.xlu1 %1727 }
0x2443   :  { %1730 = vst.msk [vmem:[#allocation3 + $0x8] sm:$0x30] %vm438_vm12, %v1728_v33 }
0x2445   :  { %v1583_v42 = vpop.permute.xlu0 %1582 }
0x2446   :  { %1585 = vst.msk [vmem:[#allocation3 + $0x8] sm:$0xc0] %vm291_vm11, %v1583_v42 }
0x244a   :  { %v2451_v9 = vpop.permute.xlu1 %2450 }
0x244b   :  { %2453 = vst.msk [vmem:[#allocation2 + $0x8] sm:$0x30] %vm438_vm12, %v2451_v9 }
0x244d   :  { %v2303_v11 = vpop.permute.xlu0 %2302  ;;  %v2607_v53 = vld [vmem:[#allocation3 + $0x8] sm:$0xff] }
0x244e   :  { %2305 = vst.msk [vmem:[#allocation2 + $0x8] sm:$0xc] %vm432_vm10, %v2303_v11  ;;  %vm2680_vm10 = vcmask 39936  }
0x248a   :  { %v2601_v22 = vpop.permute.xlu2 %2600 }
0x248b   :  { %2603 = vst.msk [vmem:[#allocation3] sm:$0x3] %vm285_vm9, %v2601_v22 }
0x2492   :  { %v2596_v52 = vpop.permute.xlu2 %2595  ;;  %v2606_v58 = vld [vmem:[#allocation3] sm:$0xff] }
0x2493   :  { %2598 = vst.msk [vmem:[#allocation2 + $0x8] sm:$0xc0] %vm291_vm11, %v2596_v52  ;;  %2761 = vmatmul.msk.f32.vlgmr.msrb.gmra.mxu0 %vm90_vm0, %v2606_v58 }
0x249a   :  { %v2605_v56 = vld [vmem:[#allocation2 + $0x8] sm:$0xff] }
0x249b   :  { %2762 = vmatmul.msk.f32.gmra.mxu0 %vm90_vm0, %v2607_v53  ;;  %2764 = vmatmul.msk.f32.gmra.mxu1 %vm90_vm0, %v2605_v56 }
0x24bb   :  { %v2668_v45 = vpop.f32.mrf.mxu1 }
0x2510   :  { %v2639_v46 = vpop.f32.mrf.mxu0 }
0x2511   :  { %v2669_v24 = vadd.f32 %v2668_v45, %v2639_v46 }
0x2513   :  { %v2678_v28 = vadd.f32 %v2784_v7, %v2669_v24 }
0x2515   :  { %2681 = vst.msk [vmem:[%s4007_s15] sm:$0xff] %vm2680_vm10, %v2678_v28 }
0x2518   :  { %v2642_v14 = vpop.f32.mrf.mxu0  ;;  %v2671_v32 = vpop.f32.mrf.mxu1 }
0x2519   :  { %v2672_v10 = vadd.f32 %v2671_v32, %v2642_v14 }
0x251b   :  { %v2679_v12 = vadd.f32 %v2784_v7, %v2672_v10 }
0x251d   :  { %2682 = vst.msk [vmem:[%s4007_s15 + $0x8] sm:$0xff] %vm2680_vm10, %v2679_v12 }
0x251e   :  { %2687 = vsyncpa [#allocation5], 1 }
0x251f   :  { %2688 = vsyncpa [#allocation7], 1 }

</bundles_post_ra>
